<compile_context>
chip_gen: v5e
topology: v5e:2x2
jax: 0.10.0
libtpu: 0.0.40
codegen_flags: <defaults>
</compile_context>

<pallas_src>
import math

import jax
import jax.numpy as jnp
from jax import lax
from jax.experimental import pallas as pl
from jax.experimental.pallas import tpu as pltpu


def encoder_kernel(x_ref, xq_ref, mask_ref,
                   wq_ref, bq_ref, wkv_ref, bkv_ref, wo_ref, bo_ref,
                   g1_ref, be1_ref, w1_ref, b1_ref, w2_ref, b2_ref,
                   g2_ref, be2_ref,
                   out_ref, attn_ref,
                   qh_sc, kh_sc, vh_sc, ctxm_sc):
    """One grid step == (batch element, query block)."""
    f32, bf16 = jnp.float32, jnp.bfloat16
    nh, tq, dh = qh_sc.shape
    T = kh_sc.shape[1]
    HD = nh * dh

    x_all = x_ref[0].astype(bf16)          # (T, H)   K/V source rows
    xq32 = xq_ref[0].astype(f32)           # (tq, H)  query rows (f32 residual path)
    xq_bf = xq32.astype(bf16)

    # ---- fused lane-dense projections: one MXU push each (no per-head loop,
    #      no (nh, T, H) activation broadcast) --------------------------------
    q2 = jnp.dot(xq_bf, wq_ref[...], preferred_element_type=f32) + bq_ref[...]     # (tq, HD)
    kv2 = jnp.dot(x_all, wkv_ref[...], preferred_element_type=f32) + bkv_ref[...]  # (T, 2*HD)

    # ---- head split via cheap VMEM slice stores (layout-safe, uses vst slots) -
    for h in range(nh):                       # static, unrolled (nh is small)
        qh_sc[h] = q2[:, h * dh:(h + 1) * dh]
        kh_sc[h] = kv2[:, h * dh:(h + 1) * dh]
        vh_sc[h] = kv2[:, HD + h * dh:HD + (h + 1) * dh]
    q = qh_sc[...].astype(bf16)               # (nh, tq, dh)
    k = kh_sc[...].astype(bf16)               # (nh, T,  dh)
    v = vh_sc[...].astype(bf16)               # (nh, T,  dh)

    # ---- scores + masked softmax over keys (f32 statistics) ------------------
    scale = 1.0 / math.sqrt(dh)
    s = lax.dot_general(q, k, (((2,), (2,)), ((0,), (0,))),
                        preferred_element_type=f32) * scale          # (nh, tq, T)
    keep = mask_ref[0] != 0                                          # (tq, T) bool, int8 input
    s = jnp.where(keep[None, :, :], s, jnp.float32(-1e9))
    s = s - jnp.max(s, axis=-1, keepdims=True)
    e = jnp.exp(s)
    denom = jnp.sum(e, axis=-1, keepdims=True)
    probs = e * (1.0 / denom)                 # exact reciprocal: stored rows sum to 1
    attn_ref[0] = probs.astype(attn_ref.dtype)   # single lane-dense store per step

    # ---- context; head reduction of the output projection done on the MXU ----
    ctx = lax.dot_general(probs.astype(bf16), v, (((2,), (1,)), ((0,), (0,))),
                          preferred_element_type=f32)                # (nh, tq, dh)
    for h in range(nh):                       # merge heads -> (tq, HD) in VMEM
        ctxm_sc[:, h * dh:(h + 1) * dh] = ctx[h]
    attn_out = jnp.dot(ctxm_sc[...].astype(bf16), wo_ref[...],
                       preferred_element_type=f32) + bo_ref[...]     # (tq, H)

    # ---- residual + LayerNorm (PyTorch defaults: eps=1e-5, biased variance) --
    def layernorm(y, g, b, eps=1e-5):
        mu = jnp.mean(y, axis=-1, keepdims=True)
        var = jnp.mean(jnp.square(y - mu), axis=-1, keepdims=True)
        return (y - mu) * lax.rsqrt(var + eps) * g + b

    ln1 = layernorm(attn_out + xq32, g1_ref[...], be1_ref[...])      # (tq, H)

    # ---- feed forward: Linear -> ReLU -> Linear ------------------------------
    # TODO(synk): feed_forward_dropout treated as eval-mode identity (deterministic kernel).
    hid = jnp.dot(ln1.astype(bf16), w1_ref[...], preferred_element_type=f32) + b1_ref[...]
    hid = jnp.maximum(hid, 0.0)
    ffn = jnp.dot(hid.astype(bf16), w2_ref[...], preferred_element_type=f32) + b2_ref[...]

    out_ref[0] = layernorm(ln1 + ffn, g2_ref[...], be2_ref[...]).astype(out_ref.dtype)


def encoder_forward(x, mask, params, num_heads, dim_head, *,
                    block_q=None, attn_dtype=jnp.float32):
    f32, bf16 = jnp.float32, jnp.bfloat16
    B, T, H = x.shape
    nh, dh = num_heads, dim_head
    HD = nh * dh
    F = params["w1"].shape[1]

    # Query-block size: must divide T; if it is not the full sequence it must be
    # a multiple of 32 so every block (including the int8 mask) is tile-legal.
    if block_q is None:
        block_q = min(T, 256)
    if T % block_q != 0 or (block_q != T and block_q % 32 != 0):
        block_q = T
    nq = T // block_q

    # --- weight prep (plain XLA, once): bf16 matmul weights, f32 bias/LN params.
    # Q is kept separate from K|V so only the query-block rows go through Wq.
    wq = params["wq"].astype(bf16)                                           # (H, HD)
    bq = params["bq"].astype(f32)                                            # (1, HD)
    wkv = jnp.concatenate([params["wk"], params["wv"]], axis=1).astype(bf16)  # (H, 2*HD)
    bkv = jnp.concatenate([params["bk"], params["bv"]], axis=1).astype(f32)   # (1, 2*HD)
    wo = params["wo"].astype(bf16)                                           # (HD, H)
    bo = params["bo"].astype(f32)
    w1 = params["w1"].astype(bf16)
    b1 = params["b1"].astype(f32)
    w2 = params["w2"].astype(bf16)
    b2 = params["b2"].astype(f32)
    g1, be1 = params["g1"].astype(f32), params["be1"].astype(f32)
    g2, be2 = params["g2"].astype(f32), params["be2"].astype(f32)
    mask_i8 = (mask != 0).astype(jnp.int8)    # 1-byte predicate: 4x less DMA than f32
    xf = x.astype(f32)

    # Weights/biases are identical for every grid step -> single-buffer them.
    single = pl.Buffered(1)

    def wspec(shape):
        return pl.BlockSpec(shape, lambda b, q: (0,) * len(shape), pipeline_mode=single)

    in_specs = [
        pl.BlockSpec((1, T, H), lambda b, q: (b, 0, 0)),        # x: full rows (K/V source)
        pl.BlockSpec((1, block_q, H), lambda b, q: (b, q, 0)),  # x: query-block rows
        pl.BlockSpec((1, block_q, T), lambda b, q: (b, q, 0)),  # mask (int8)
        wspec((H, HD)), wspec((1, HD)),                         # wq, bq
        wspec((H, 2 * HD)), wspec((1, 2 * HD)),                 # wkv, bkv
        wspec((HD, H)), wspec((1, H)),                          # wo, bo
        wspec((1, H)), wspec((1, H)),                           # ln1 gamma, beta
        wspec((H, F)), wspec((1, F)),                           # ffn w1, b1
        wspec((F, H)), wspec((1, H)),                           # ffn w2, b2
        wspec((1, H)), wspec((1, H)),                           # ln2 gamma, beta
    ]
    out_specs = [
        pl.BlockSpec((1, block_q, H), lambda b, q: (b, q, 0)),
        pl.BlockSpec((1, nh, block_q, T), lambda b, q: (b, 0, q, 0)),
    ]
    out_shape = [
        jax.ShapeDtypeStruct((B, T, H), f32),
        jax.ShapeDtypeStruct((B, nh, T, T), attn_dtype),
    ]
    scratch_shapes = [
        pltpu.VMEM((nh, block_q, dh), f32),   # q heads
        pltpu.VMEM((nh, T, dh), f32),         # k heads
        pltpu.VMEM((nh, T, dh), f32),         # v heads
        pltpu.VMEM((block_q, HD), f32),       # merged per-head context
    ]

    # --- VMEM budget computed from the actual block sizes, with headroom ------
    def nbytes(shape, dtype):
        return math.prod(shape) * jnp.dtype(dtype).itemsize

    weight_bytes = (sum(nbytes(s, bf16) for s in [(H, HD), (H, 2 * HD), (HD, H), (H, F), (F, H)])
                    + sum(nbytes(s, f32) for s in [(1, HD), (1, 2 * HD), (1, F)] + [(1, H)] * 6))
    io_bytes = (nbytes((T, H), f32) + nbytes((block_q, H), f32)
                + nbytes((block_q, T), jnp.int8) + nbytes((block_q, H), f32)
                + nbytes((nh, block_q, T), attn_dtype))
    scratch_bytes = (nbytes((nh, block_q, dh), f32) + 2 * nbytes((nh, T, dh), f32)
                     + nbytes((block_q, HD), f32))
    interm_bytes = 4 * nbytes((nh, block_q, T), f32) + 4 * nbytes((block_q, F), f32)
    est = weight_bytes + 2 * io_bytes + scratch_bytes + interm_bytes
    vmem_limit = int(min(64 * 1024 * 1024, max(16 * 1024 * 1024, 2 * est)))

    fn = pl.pallas_call(
        encoder_kernel,
        grid=(B, nq),
        in_specs=in_specs,
        out_specs=out_specs,
        out_shape=out_shape,
        scratch_shapes=scratch_shapes,
        compiler_params=pltpu.CompilerParams(
            dimension_semantics=("parallel", "parallel"),
            vmem_limit_bytes=vmem_limit,
        ),
    )
    out, attn = fn(xf, xf, mask_i8,
                   wq, bq, wkv, bkv, wo, bo,
                   g1, be1, w1, b1, w2, b2, g2, be2)
    return out, attn


if __name__ == "__main__":
    B, T = 2, 64
    hidden_dim = 32
    num_heads = 4
    dim_head = 8
    expansion = 4
    HD = num_heads * dim_head
    F = hidden_dim * expansion

    key = jax.random.PRNGKey(0)
    keys = jax.random.split(key, 13)

    def init(k, shape, scale=0.05):
        return (scale * jax.random.normal(k, shape)).astype(jnp.float32)

    params = dict(
        wq=init(keys[0], (hidden_dim, HD)), bq=init(keys[1], (1, HD)),
        wk=init(keys[2], (hidden_dim, HD)), bk=init(keys[3], (1, HD)),
        wv=init(keys[4], (hidden_dim, HD)), bv=init(keys[5], (1, HD)),
        wo=init(keys[6], (HD, hidden_dim)), bo=init(keys[7], (1, hidden_dim)),
        g1=jnp.ones((1, hidden_dim), jnp.float32),
        be1=jnp.zeros((1, hidden_dim), jnp.float32),
        w1=init(keys[8], (hidden_dim, F)), b1=init(keys[9], (1, F)),
        w2=init(keys[10], (F, hidden_dim)), b2=init(keys[11], (1, hidden_dim)),
        g2=jnp.ones((1, hidden_dim), jnp.float32),
        be2=jnp.zeros((1, hidden_dim), jnp.float32),
    )

    x = init(keys[12], (B, T, hidden_dim), scale=1.0)
    # mask: 1 = attend, 0 = masked (causal, so masking is actually exercised
    # and no row is fully masked).
    causal = jnp.tril(jnp.ones((T, T), jnp.int32))
    mask = jnp.broadcast_to(causal, (B, T, T))

    out, attn = encoder_forward(x, mask, params, num_heads, dim_head, block_q=32)
    jax.block_until_ready((out, attn))

    assert out.shape == (B, T, hidden_dim)
    assert attn.shape == (B, num_heads, T, T)
    assert bool(jnp.all(jnp.isfinite(out))) and bool(jnp.all(jnp.isfinite(attn)))
    # masked (future) positions get ~zero probability; rows sum to ~1 (exact softmax div)
    assert bool(jnp.all(attn * (1 - causal)[None, None].astype(attn.dtype) < 1e-6))
    assert bool(jnp.all(jnp.abs(jnp.sum(attn, axis=-1) - 1.0) < 1e-3))
    print("KERNEL_OK")
</pallas_src>

<mosaic_0001>
module attributes {stable_mosaic.version = 11 : i64} {
  func.func @encoder_kernel(%arg0: i32, %arg1: i32, %arg2: memref<1x64x32xf32, #tpu.memory_space<vmem>>, %arg3: memref<1x32x32xf32, #tpu.memory_space<vmem>>, %arg4: memref<1x32x64xi8, #tpu.memory_space<vmem>>, %arg5: memref<32x32xbf16, #tpu.memory_space<vmem>>, %arg6: memref<1x32xf32, #tpu.memory_space<vmem>>, %arg7: memref<32x64xbf16, #tpu.memory_space<vmem>>, %arg8: memref<1x64xf32, #tpu.memory_space<vmem>>, %arg9: memref<32x32xbf16, #tpu.memory_space<vmem>>, %arg10: memref<1x32xf32, #tpu.memory_space<vmem>>, %arg11: memref<1x32xf32, #tpu.memory_space<vmem>>, %arg12: memref<1x32xf32, #tpu.memory_space<vmem>>, %arg13: memref<32x128xbf16, #tpu.memory_space<vmem>>, %arg14: memref<1x128xf32, #tpu.memory_space<vmem>>, %arg15: memref<128x32xbf16, #tpu.memory_space<vmem>>, %arg16: memref<1x32xf32, #tpu.memory_space<vmem>>, %arg17: memref<1x32xf32, #tpu.memory_space<vmem>>, %arg18: memref<1x32xf32, #tpu.memory_space<vmem>>, %arg19: memref<1x32x32xf32, #tpu.memory_space<vmem>>, %arg20: memref<1x4x32x64xf32, #tpu.memory_space<vmem>>, %arg21: memref<4x32x8xf32, #tpu.memory_space<vmem>>, %arg22: memref<4x64x8xf32, #tpu.memory_space<vmem>>, %arg23: memref<4x64x8xf32, #tpu.memory_space<vmem>>, %arg24: memref<32x32xf32, #tpu.memory_space<vmem>>) attributes {dimension_semantics = [#tpu.dimension_semantics<parallel>, #tpu.dimension_semantics<parallel>], iteration_bounds = array<i64: 2, 2>, scalar_prefetch = 0 : i64, scratch_operands = 4 : i64, tpu.core_type = #tpu.core_type<tc>, window_params = [{transform_indices = @transform_0, window_bounds = array<i64: 1, 64, 32>}, {transform_indices = @transform_1, window_bounds = array<i64: 1, 32, 32>}, {transform_indices = @transform_2, window_bounds = array<i64: 1, 32, 64>}, {pipeline_mode = #tpu.pipeline_mode<synchronous>, transform_indices = @transform_3, window_bounds = array<i64: 32, 32>}, {pipeline_mode = #tpu.pipeline_mode<synchronous>, transform_indices = @transform_4, window_bounds = array<i64: 1, 32>}, {pipeline_mode = #tpu.pipeline_mode<synchronous>, transform_indices = @transform_5, window_bounds = array<i64: 32, 64>}, {pipeline_mode = #tpu.pipeline_mode<synchronous>, transform_indices = @transform_6, window_bounds = array<i64: 1, 64>}, {pipeline_mode = #tpu.pipeline_mode<synchronous>, transform_indices = @transform_7, window_bounds = array<i64: 32, 32>}, {pipeline_mode = #tpu.pipeline_mode<synchronous>, transform_indices = @transform_8, window_bounds = array<i64: 1, 32>}, {pipeline_mode = #tpu.pipeline_mode<synchronous>, transform_indices = @transform_9, window_bounds = array<i64: 1, 32>}, {pipeline_mode = #tpu.pipeline_mode<synchronous>, transform_indices = @transform_10, window_bounds = array<i64: 1, 32>}, {pipeline_mode = #tpu.pipeline_mode<synchronous>, transform_indices = @transform_11, window_bounds = array<i64: 32, 128>}, {pipeline_mode = #tpu.pipeline_mode<synchronous>, transform_indices = @transform_12, window_bounds = array<i64: 1, 128>}, {pipeline_mode = #tpu.pipeline_mode<synchronous>, transform_indices = @transform_13, window_bounds = array<i64: 128, 32>}, {pipeline_mode = #tpu.pipeline_mode<synchronous>, transform_indices = @transform_14, window_bounds = array<i64: 1, 32>}, {pipeline_mode = #tpu.pipeline_mode<synchronous>, transform_indices = @transform_15, window_bounds = array<i64: 1, 32>}, {pipeline_mode = #tpu.pipeline_mode<synchronous>, transform_indices = @transform_16, window_bounds = array<i64: 1, 32>}, {transform_indices = @transform_17, window_bounds = array<i64: 1, 32, 32>}, {transform_indices = @transform_18, window_bounds = array<i64: 1, 4, 32, 64>}]} {
    %c0 = arith.constant 0 : index
    %c0_0 = arith.constant 0 : index
    %c0_1 = arith.constant 0 : index
    %0 = vector.load %arg2[%c0, %c0_0, %c0_1] : memref<1x64x32xf32, #tpu.memory_space<vmem>>, vector<1x64x32xf32>
    %1 = vector.shape_cast %0 : vector<1x64x32xf32> to vector<64x32xf32>
    %2 = arith.truncf %1 : vector<64x32xf32> to vector<64x32xbf16>
    %c0_2 = arith.constant 0 : index
    %c0_3 = arith.constant 0 : index
    %c0_4 = arith.constant 0 : index
    %3 = vector.load %arg3[%c0_2, %c0_3, %c0_4] : memref<1x32x32xf32, #tpu.memory_space<vmem>>, vector<1x32x32xf32>
    %4 = vector.shape_cast %3 : vector<1x32x32xf32> to vector<32x32xf32>
    %5 = arith.truncf %4 : vector<32x32xf32> to vector<32x32xbf16>
    %c0_5 = arith.constant 0 : index
    %c0_6 = arith.constant 0 : index
    %6 = vector.load %arg5[%c0_5, %c0_6] : memref<32x32xbf16, #tpu.memory_space<vmem>>, vector<32x32xbf16>
    %cst = arith.constant dense<0.000000e+00> : vector<32x32xf32>
    %7 = tpu.matmul %5, %6, %cst {dimension_numbers = #tpu.dot_dimension_numbers<[1], [0], [0], [1], [0, 0, 1, 1], [], []>} : vector<32x32xbf16>, vector<32x32xbf16>, vector<32x32xf32> -> vector<32x32xf32>
    %c0_7 = arith.constant 0 : index
    %c0_8 = arith.constant 0 : index
    %8 = vector.load %arg6[%c0_7, %c0_8] : memref<1x32xf32, #tpu.memory_space<vmem>>, vector<1x32xf32>
    %9 = vector.broadcast %8 : vector<1x32xf32> to vector<32x32xf32>
    %10 = arith.addf %7, %9 : vector<32x32xf32>
    %c0_9 = arith.constant 0 : index
    %c0_10 = arith.constant 0 : index
    %11 = vector.load %arg7[%c0_9, %c0_10] : memref<32x64xbf16, #tpu.memory_space<vmem>>, vector<32x64xbf16>
    %cst_11 = arith.constant dense<0.000000e+00> : vector<64x64xf32>
    %12 = tpu.matmul %2, %11, %cst_11 {dimension_numbers = #tpu.dot_dimension_numbers<[1], [0], [0], [1], [0, 0, 1, 1], [], []>} : vector<64x32xbf16>, vector<32x64xbf16>, vector<64x64xf32> -> vector<64x64xf32>
    %c0_12 = arith.constant 0 : index
    %c0_13 = arith.constant 0 : index
    %13 = vector.load %arg8[%c0_12, %c0_13] : memref<1x64xf32, #tpu.memory_space<vmem>>, vector<1x64xf32>
    %14 = vector.broadcast %13 : vector<1x64xf32> to vector<64x64xf32>
    %15 = arith.addf %12, %14 : vector<64x64xf32>
    %16 = vector.extract_strided_slice %10 {offsets = [0, 0], sizes = [32, 8], strides = [1, 1]} : vector<32x32xf32> to vector<32x8xf32>
    %c0_14 = arith.constant 0 : index
    %c0_15 = arith.constant 0 : index
    %c0_16 = arith.constant 0 : index
    %17 = vector.load %arg21[%c0_14, %c0_15, %c0_16] : memref<4x32x8xf32, #tpu.memory_space<vmem>>, vector<1x32x8xf32>
    %18 = vector.shape_cast %17 : vector<1x32x8xf32> to vector<32x8xf32>
    %19 = vector.shape_cast %16 : vector<32x8xf32> to vector<1x32x8xf32>
    tpu.vector_store %arg21[%c0_14, %c0_15, %c0_16], %19 {strides = array<i32>} : memref<4x32x8xf32, #tpu.memory_space<vmem>>, vector<1x32x8xf32>,
    %20 = vector.extract_strided_slice %15 {offsets = [0, 0], sizes = [64, 8], strides = [1, 1]} : vector<64x64xf32> to vector<64x8xf32>
    %c0_17 = arith.constant 0 : index
    %c0_18 = arith.constant 0 : index
    %c0_19 = arith.constant 0 : index
    %21 = vector.load %arg22[%c0_17, %c0_18, %c0_19] : memref<4x64x8xf32, #tpu.memory_space<vmem>>, vector<1x64x8xf32>
    %22 = vector.shape_cast %21 : vector<1x64x8xf32> to vector<64x8xf32>
    %23 = vector.shape_cast %20 : vector<64x8xf32> to vector<1x64x8xf32>
    tpu.vector_store %arg22[%c0_17, %c0_18, %c0_19], %23 {strides = array<i32>} : memref<4x64x8xf32, #tpu.memory_space<vmem>>, vector<1x64x8xf32>,
    %24 = vector.extract_strided_slice %15 {offsets = [0, 32], sizes = [64, 8], strides = [1, 1]} : vector<64x64xf32> to vector<64x8xf32>
    %c0_20 = arith.constant 0 : index
    %c0_21 = arith.constant 0 : index
    %c0_22 = arith.constant 0 : index
    %25 = vector.load %arg23[%c0_20, %c0_21, %c0_22] : memref<4x64x8xf32, #tpu.memory_space<vmem>>, vector<1x64x8xf32>
    %26 = vector.shape_cast %25 : vector<1x64x8xf32> to vector<64x8xf32>
    %27 = vector.shape_cast %24 : vector<64x8xf32> to vector<1x64x8xf32>
    tpu.vector_store %arg23[%c0_20, %c0_21, %c0_22], %27 {strides = array<i32>} : memref<4x64x8xf32, #tpu.memory_space<vmem>>, vector<1x64x8xf32>,
    %28 = vector.extract_strided_slice %10 {offsets = [0, 8], sizes = [32, 8], strides = [1, 1]} : vector<32x32xf32> to vector<32x8xf32>
    %c1 = arith.constant 1 : index
    %c0_23 = arith.constant 0 : index
    %c0_24 = arith.constant 0 : index
    %29 = vector.load %arg21[%c1, %c0_23, %c0_24] : memref<4x32x8xf32, #tpu.memory_space<vmem>>, vector<1x32x8xf32>
    %30 = vector.shape_cast %29 : vector<1x32x8xf32> to vector<32x8xf32>
    %31 = vector.shape_cast %28 : vector<32x8xf32> to vector<1x32x8xf32>
    tpu.vector_store %arg21[%c1, %c0_23, %c0_24], %31 {strides = array<i32>} : memref<4x32x8xf32, #tpu.memory_space<vmem>>, vector<1x32x8xf32>,
    %32 = vector.extract_strided_slice %15 {offsets = [0, 8], sizes = [64, 8], strides = [1, 1]} : vector<64x64xf32> to vector<64x8xf32>
    %c1_25 = arith.constant 1 : index
    %c0_26 = arith.constant 0 : index
    %c0_27 = arith.constant 0 : index
    %33 = vector.load %arg22[%c1_25, %c0_26, %c0_27] : memref<4x64x8xf32, #tpu.memory_space<vmem>>, vector<1x64x8xf32>
    %34 = vector.shape_cast %33 : vector<1x64x8xf32> to vector<64x8xf32>
    %35 = vector.shape_cast %32 : vector<64x8xf32> to vector<1x64x8xf32>
    tpu.vector_store %arg22[%c1_25, %c0_26, %c0_27], %35 {strides = array<i32>} : memref<4x64x8xf32, #tpu.memory_space<vmem>>, vector<1x64x8xf32>,
    %36 = vector.extract_strided_slice %15 {offsets = [0, 40], sizes = [64, 8], strides = [1, 1]} : vector<64x64xf32> to vector<64x8xf32>
    %c1_28 = arith.constant 1 : index
    %c0_29 = arith.constant 0 : index
    %c0_30 = arith.constant 0 : index
    %37 = vector.load %arg23[%c1_28, %c0_29, %c0_30] : memref<4x64x8xf32, #tpu.memory_space<vmem>>, vector<1x64x8xf32>
    %38 = vector.shape_cast %37 : vector<1x64x8xf32> to vector<64x8xf32>
    %39 = vector.shape_cast %36 : vector<64x8xf32> to vector<1x64x8xf32>
    tpu.vector_store %arg23[%c1_28, %c0_29, %c0_30], %39 {strides = array<i32>} : memref<4x64x8xf32, #tpu.memory_space<vmem>>, vector<1x64x8xf32>,
    %40 = vector.extract_strided_slice %10 {offsets = [0, 16], sizes = [32, 8], strides = [1, 1]} : vector<32x32xf32> to vector<32x8xf32>
    %c2 = arith.constant 2 : index
    %c0_31 = arith.constant 0 : index
    %c0_32 = arith.constant 0 : index
    %41 = vector.load %arg21[%c2, %c0_31, %c0_32] : memref<4x32x8xf32, #tpu.memory_space<vmem>>, vector<1x32x8xf32>
    %42 = vector.shape_cast %41 : vector<1x32x8xf32> to vector<32x8xf32>
    %43 = vector.shape_cast %40 : vector<32x8xf32> to vector<1x32x8xf32>
    tpu.vector_store %arg21[%c2, %c0_31, %c0_32], %43 {strides = array<i32>} : memref<4x32x8xf32, #tpu.memory_space<vmem>>, vector<1x32x8xf32>,
    %44 = vector.extract_strided_slice %15 {offsets = [0, 16], sizes = [64, 8], strides = [1, 1]} : vector<64x64xf32> to vector<64x8xf32>
    %c2_33 = arith.constant 2 : index
    %c0_34 = arith.constant 0 : index
    %c0_35 = arith.constant 0 : index
    %45 = vector.load %arg22[%c2_33, %c0_34, %c0_35] : memref<4x64x8xf32, #tpu.memory_space<vmem>>, vector<1x64x8xf32>
    %46 = vector.shape_cast %45 : vector<1x64x8xf32> to vector<64x8xf32>
    %47 = vector.shape_cast %44 : vector<64x8xf32> to vector<1x64x8xf32>
    tpu.vector_store %arg22[%c2_33, %c0_34, %c0_35], %47 {strides = array<i32>} : memref<4x64x8xf32, #tpu.memory_space<vmem>>, vector<1x64x8xf32>,
    %48 = vector.extract_strided_slice %15 {offsets = [0, 48], sizes = [64, 8], strides = [1, 1]} : vector<64x64xf32> to vector<64x8xf32>
    %c2_36 = arith.constant 2 : index
    %c0_37 = arith.constant 0 : index
    %c0_38 = arith.constant 0 : index
    %49 = vector.load %arg23[%c2_36, %c0_37, %c0_38] : memref<4x64x8xf32, #tpu.memory_space<vmem>>, vector<1x64x8xf32>
    %50 = vector.shape_cast %49 : vector<1x64x8xf32> to vector<64x8xf32>
    %51 = vector.shape_cast %48 : vector<64x8xf32> to vector<1x64x8xf32>
    tpu.vector_store %arg23[%c2_36, %c0_37, %c0_38], %51 {strides = array<i32>} : memref<4x64x8xf32, #tpu.memory_space<vmem>>, vector<1x64x8xf32>,
    %52 = vector.extract_strided_slice %10 {offsets = [0, 24], sizes = [32, 8], strides = [1, 1]} : vector<32x32xf32> to vector<32x8xf32>
    %c3 = arith.constant 3 : index
    %c0_39 = arith.constant 0 : index
    %c0_40 = arith.constant 0 : index
    %53 = vector.load %arg21[%c3, %c0_39, %c0_40] : memref<4x32x8xf32, #tpu.memory_space<vmem>>, vector<1x32x8xf32>
    %54 = vector.shape_cast %53 : vector<1x32x8xf32> to vector<32x8xf32>
    %55 = vector.shape_cast %52 : vector<32x8xf32> to vector<1x32x8xf32>
    tpu.vector_store %arg21[%c3, %c0_39, %c0_40], %55 {strides = array<i32>} : memref<4x32x8xf32, #tpu.memory_space<vmem>>, vector<1x32x8xf32>,
    %56 = vector.extract_strided_slice %15 {offsets = [0, 24], sizes = [64, 8], strides = [1, 1]} : vector<64x64xf32> to vector<64x8xf32>
    %c3_41 = arith.constant 3 : index
    %c0_42 = arith.constant 0 : index
    %c0_43 = arith.constant 0 : index
    %57 = vector.load %arg22[%c3_41, %c0_42, %c0_43] : memref<4x64x8xf32, #tpu.memory_space<vmem>>, vector<1x64x8xf32>
    %58 = vector.shape_cast %57 : vector<1x64x8xf32> to vector<64x8xf32>
    %59 = vector.shape_cast %56 : vector<64x8xf32> to vector<1x64x8xf32>
    tpu.vector_store %arg22[%c3_41, %c0_42, %c0_43], %59 {strides = array<i32>} : memref<4x64x8xf32, #tpu.memory_space<vmem>>, vector<1x64x8xf32>,
    %60 = vector.extract_strided_slice %15 {offsets = [0, 56], sizes = [64, 8], strides = [1, 1]} : vector<64x64xf32> to vector<64x8xf32>
    %c3_44 = arith.constant 3 : index
    %c0_45 = arith.constant 0 : index
    %c0_46 = arith.constant 0 : index
    %61 = vector.load %arg23[%c3_44, %c0_45, %c0_46] : memref<4x64x8xf32, #tpu.memory_space<vmem>>, vector<1x64x8xf32>
    %62 = vector.shape_cast %61 : vector<1x64x8xf32> to vector<64x8xf32>
    %63 = vector.shape_cast %60 : vector<64x8xf32> to vector<1x64x8xf32>
    tpu.vector_store %arg23[%c3_44, %c0_45, %c0_46], %63 {strides = array<i32>} : memref<4x64x8xf32, #tpu.memory_space<vmem>>, vector<1x64x8xf32>,
    %c0_47 = arith.constant 0 : index
    %c0_48 = arith.constant 0 : index
    %c0_49 = arith.constant 0 : index
    %64 = vector.load %arg21[%c0_47, %c0_48, %c0_49] : memref<4x32x8xf32, #tpu.memory_space<vmem>>, vector<4x32x8xf32>
    %65 = arith.truncf %64 : vector<4x32x8xf32> to vector<4x32x8xbf16>
    %c0_50 = arith.constant 0 : index
    %c0_51 = arith.constant 0 : index
    %c0_52 = arith.constant 0 : index
    %66 = vector.load %arg22[%c0_50, %c0_51, %c0_52] : memref<4x64x8xf32, #tpu.memory_space<vmem>>, vector<4x64x8xf32>
    %67 = arith.truncf %66 : vector<4x64x8xf32> to vector<4x64x8xbf16>
    %c0_53 = arith.constant 0 : index
    %c0_54 = arith.constant 0 : index
    %c0_55 = arith.constant 0 : index
    %68 = vector.load %arg23[%c0_53, %c0_54, %c0_55] : memref<4x64x8xf32, #tpu.memory_space<vmem>>, vector<4x64x8xf32>
    %69 = arith.truncf %68 : vector<4x64x8xf32> to vector<4x64x8xbf16>
    %cst_56 = arith.constant dense<0.000000e+00> : vector<4x32x64xf32>
    %70 = tpu.matmul %65, %67, %cst_56 {dimension_numbers = #tpu.dot_dimension_numbers<[2], [2], [1], [1], [0, 0, 0, 1, 1, 1], [0], [0]>} : vector<4x32x8xbf16>, vector<4x64x8xbf16>, vector<4x32x64xf32> -> vector<4x32x64xf32>
    %cst_57 = arith.constant 0.353553385 : f32
    %71 = vector.broadcast %cst_57 : f32 to vector<4x32x64xf32>
    %72 = arith.mulf %70, %71 : vector<4x32x64xf32>
    %c0_58 = arith.constant 0 : index
    %c0_59 = arith.constant 0 : index
    %c0_60 = arith.constant 0 : index
    %73 = vector.load %arg4[%c0_58, %c0_59, %c0_60] : memref<1x32x64xi8, #tpu.memory_space<vmem>>, vector<1x32x64xi8>
    %74 = vector.shape_cast %73 : vector<1x32x64xi8> to vector<32x64xi8>
    %c0_i8 = arith.constant 0 : i8
    %75 = vector.broadcast %c0_i8 : i8 to vector<32x64xi8>
    %76 = arith.cmpi ne, %74, %75 : vector<32x64xi8>
    %77 = vector.shape_cast %76 : vector<32x64xi1> to vector<1x32x64xi1>
    %cst_61 = arith.constant -1.000000e+09 : f32
    %78 = vector.shape_cast %77 : vector<1x32x64xi1> to vector<1x32x64xi1>
    %79 = vector.broadcast %78 : vector<1x32x64xi1> to vector<4x32x64xi1>
    %80 = vector.broadcast %cst_61 : f32 to vector<4x32x64xf32>
    %81 = arith.select %79, %72, %80 : vector<4x32x64xi1>, vector<4x32x64xf32>
    %cst_62 = arith.constant dense<0xFF800000> : vector<4x32xf32>
    %82 = vector.multi_reduction <maximumf>, %81, %cst_62 [2] : vector<4x32x64xf32> to vector<4x32xf32>
    %83 = vector.shape_cast %82 : vector<4x32xf32> to vector<4x32x1xf32>
    %84 = vector.broadcast %83 : vector<4x32x1xf32> to vector<4x32x64xf32>
    %85 = arith.subf %81, %84 : vector<4x32x64xf32>
    %86 = math.exp %85 : vector<4x32x64xf32>
    %cst_63 = arith.constant dense<0.000000e+00> : vector<4x32xf32>
    %87 = vector.multi_reduction <add>, %86, %cst_63 [2] : vector<4x32x64xf32> to vector<4x32xf32>
    %88 = vector.shape_cast %87 : vector<4x32xf32> to vector<4x32x1xf32>
    %cst_64 = arith.constant 1.000000e+00 : f32
    %89 = vector.broadcast %cst_64 : f32 to vector<4x32x1xf32>
    %90 = arith.divf %89, %88 : vector<4x32x1xf32>
    %91 = vector.broadcast %90 : vector<4x32x1xf32> to vector<4x32x64xf32>
    %92 = arith.mulf %86, %91 : vector<4x32x64xf32>
    %c0_65 = arith.constant 0 : index
    %c0_66 = arith.constant 0 : index
    %c0_67 = arith.constant 0 : index
    %c0_68 = arith.constant 0 : index
    %93 = vector.load %arg20[%c0_65, %c0_66, %c0_67, %c0_68] : memref<1x4x32x64xf32, #tpu.memory_space<vmem>>, vector<1x4x32x64xf32>
    %94 = vector.shape_cast %93 : vector<1x4x32x64xf32> to vector<4x32x64xf32>
    %95 = vector.shape_cast %92 : vector<4x32x64xf32> to vector<1x4x32x64xf32>
    tpu.vector_store %arg20[%c0_65, %c0_66, %c0_67, %c0_68], %95 {strides = array<i32>} : memref<1x4x32x64xf32, #tpu.memory_space<vmem>>, vector<1x4x32x64xf32>,
    %96 = arith.truncf %92 : vector<4x32x64xf32> to vector<4x32x64xbf16>
    %cst_69 = arith.constant dense<0.000000e+00> : vector<4x32x8xf32>
    %97 = tpu.matmul %96, %69, %cst_69 {dimension_numbers = #tpu.dot_dimension_numbers<[2], [1], [1], [2], [0, 0, 0, 1, 1, 2], [0], [0]>} : vector<4x32x64xbf16>, vector<4x64x8xbf16>, vector<4x32x8xf32> -> vector<4x32x8xf32>
    %98 = vector.extract_strided_slice %97 {offsets = [0, 0, 0], sizes = [1, 32, 8], strides = [1, 1, 1]} : vector<4x32x8xf32> to vector<1x32x8xf32>
    %99 = vector.shape_cast %98 : vector<1x32x8xf32> to vector<32x8xf32>
    %c0_70 = arith.constant 0 : index
    %c0_71 = arith.constant 0 : index
    %100 = vector.load %arg24[%c0_70, %c0_71] : memref<32x32xf32, #tpu.memory_space<vmem>>, vector<32x8xf32>
    tpu.vector_store %arg24[%c0_70, %c0_71], %99 {strides = array<i32>} : memref<32x32xf32, #tpu.memory_space<vmem>>, vector<32x8xf32>,
    %101 = vector.extract_strided_slice %97 {offsets = [1, 0, 0], sizes = [1, 32, 8], strides = [1, 1, 1]} : vector<4x32x8xf32> to vector<1x32x8xf32>
    %102 = vector.shape_cast %101 : vector<1x32x8xf32> to vector<32x8xf32>
    %c0_72 = arith.constant 0 : index
    %c8 = arith.constant 8 : index
    %103 = vector.load %arg24[%c0_72, %c8] : memref<32x32xf32, #tpu.memory_space<vmem>>, vector<32x8xf32>
    tpu.vector_store %arg24[%c0_72, %c8], %102 {strides = array<i32>} : memref<32x32xf32, #tpu.memory_space<vmem>>, vector<32x8xf32>,
    %104 = vector.extract_strided_slice %97 {offsets = [2, 0, 0], sizes = [1, 32, 8], strides = [1, 1, 1]} : vector<4x32x8xf32> to vector<1x32x8xf32>
    %105 = vector.shape_cast %104 : vector<1x32x8xf32> to vector<32x8xf32>
    %c0_73 = arith.constant 0 : index
    %c16 = arith.constant 16 : index
    %106 = vector.load %arg24[%c0_73, %c16] : memref<32x32xf32, #tpu.memory_space<vmem>>, vector<32x8xf32>
    tpu.vector_store %arg24[%c0_73, %c16], %105 {strides = array<i32>} : memref<32x32xf32, #tpu.memory_space<vmem>>, vector<32x8xf32>,
    %107 = vector.extract_strided_slice %97 {offsets = [3, 0, 0], sizes = [1, 32, 8], strides = [1, 1, 1]} : vector<4x32x8xf32> to vector<1x32x8xf32>
    %108 = vector.shape_cast %107 : vector<1x32x8xf32> to vector<32x8xf32>
    %c0_74 = arith.constant 0 : index
    %c24 = arith.constant 24 : index
    %109 = vector.load %arg24[%c0_74, %c24] : memref<32x32xf32, #tpu.memory_space<vmem>>, vector<32x8xf32>
    tpu.vector_store %arg24[%c0_74, %c24], %108 {strides = array<i32>} : memref<32x32xf32, #tpu.memory_space<vmem>>, vector<32x8xf32>,
    %c0_75 = arith.constant 0 : index
    %c0_76 = arith.constant 0 : index
    %110 = vector.load %arg24[%c0_75, %c0_76] : memref<32x32xf32, #tpu.memory_space<vmem>>, vector<32x32xf32>
    %111 = arith.truncf %110 : vector<32x32xf32> to vector<32x32xbf16>
    %c0_77 = arith.constant 0 : index
    %c0_78 = arith.constant 0 : index
    %112 = vector.load %arg9[%c0_77, %c0_78] : memref<32x32xbf16, #tpu.memory_space<vmem>>, vector<32x32xbf16>
    %cst_79 = arith.constant dense<0.000000e+00> : vector<32x32xf32>
    %113 = tpu.matmul %111, %112, %cst_79 {dimension_numbers = #tpu.dot_dimension_numbers<[1], [0], [0], [1], [0, 0, 1, 1], [], []>} : vector<32x32xbf16>, vector<32x32xbf16>, vector<32x32xf32> -> vector<32x32xf32>
    %c0_80 = arith.constant 0 : index
    %c0_81 = arith.constant 0 : index
    %114 = vector.load %arg10[%c0_80, %c0_81] : memref<1x32xf32, #tpu.memory_space<vmem>>, vector<1x32xf32>
    %115 = vector.broadcast %114 : vector<1x32xf32> to vector<32x32xf32>
    %116 = arith.addf %113, %115 : vector<32x32xf32>
    %117 = arith.addf %116, %4 : vector<32x32xf32>
    %c0_82 = arith.constant 0 : index
    %c0_83 = arith.constant 0 : index
    %118 = vector.load %arg11[%c0_82, %c0_83] : memref<1x32xf32, #tpu.memory_space<vmem>>, vector<1x32xf32>
    %c0_84 = arith.constant 0 : index
    %c0_85 = arith.constant 0 : index
    %119 = vector.load %arg12[%c0_84, %c0_85] : memref<1x32xf32, #tpu.memory_space<vmem>>, vector<1x32xf32>
    %cst_86 = arith.constant dense<0.000000e+00> : vector<32xf32>
    %120 = vector.multi_reduction <add>, %117, %cst_86 [1] : vector<32x32xf32> to vector<32xf32>
    %121 = vector.shape_cast %120 : vector<32xf32> to vector<32x1xf32>
    %cst_87 = arith.constant 3.200000e+01 : f32
    %122 = vector.broadcast %cst_87 : f32 to vector<32x1xf32>
    %123 = arith.divf %121, %122 : vector<32x1xf32>
    %124 = vector.broadcast %123 : vector<32x1xf32> to vector<32x32xf32>
    %125 = arith.subf %117, %124 : vector<32x32xf32>
    %126 = arith.mulf %125, %125 : vector<32x32xf32>
    %cst_88 = arith.constant dense<0.000000e+00> : vector<32xf32>
    %127 = vector.multi_reduction <add>, %126, %cst_88 [1] : vector<32x32xf32> to vector<32xf32>
    %128 = vector.shape_cast %127 : vector<32xf32> to vector<32x1xf32>
    %cst_89 = arith.constant 3.200000e+01 : f32
    %129 = vector.broadcast %cst_89 : f32 to vector<32x1xf32>
    %130 = arith.divf %128, %129 : vector<32x1xf32>
    %131 = vector.broadcast %123 : vector<32x1xf32> to vector<32x32xf32>
    %132 = arith.subf %117, %131 : vector<32x32xf32>
    %cst_90 = arith.constant 9.99999974E-6 : f32
    %133 = vector.broadcast %cst_90 : f32 to vector<32x1xf32>
    %134 = arith.addf %130, %133 : vector<32x1xf32>
    %135 = math.rsqrt %134 : vector<32x1xf32>
    %136 = vector.broadcast %135 : vector<32x1xf32> to vector<32x32xf32>
    %137 = arith.mulf %132, %136 : vector<32x32xf32>
    %138 = vector.broadcast %118 : vector<1x32xf32> to vector<32x32xf32>
    %139 = arith.mulf %137, %138 : vector<32x32xf32>
    %140 = vector.broadcast %119 : vector<1x32xf32> to vector<32x32xf32>
    %141 = arith.addf %139, %140 : vector<32x32xf32>
    %142 = arith.truncf %141 : vector<32x32xf32> to vector<32x32xbf16>
    %c0_91 = arith.constant 0 : index
    %c0_92 = arith.constant 0 : index
    %143 = vector.load %arg13[%c0_91, %c0_92] : memref<32x128xbf16, #tpu.memory_space<vmem>>, vector<32x128xbf16>
    %cst_93 = arith.constant dense<0.000000e+00> : vector<32x128xf32>
    %144 = tpu.matmul %142, %143, %cst_93 {dimension_numbers = #tpu.dot_dimension_numbers<[1], [0], [0], [1], [0, 0, 1, 1], [], []>} : vector<32x32xbf16>, vector<32x128xbf16>, vector<32x128xf32> -> vector<32x128xf32>
    %c0_94 = arith.constant 0 : index
    %c0_95 = arith.constant 0 : index
    %145 = vector.load %arg14[%c0_94, %c0_95] : memref<1x128xf32, #tpu.memory_space<vmem>>, vector<1x128xf32>
    %146 = vector.broadcast %145 : vector<1x128xf32> to vector<32x128xf32>
    %147 = arith.addf %144, %146 : vector<32x128xf32>
    %cst_96 = arith.constant 0.000000e+00 : f32
    %148 = vector.broadcast %cst_96 : f32 to vector<32x128xf32>
    %149 = arith.maximumf %147, %148 : vector<32x128xf32>
    %150 = arith.truncf %149 : vector<32x128xf32> to vector<32x128xbf16>
    %c0_97 = arith.constant 0 : index
    %c0_98 = arith.constant 0 : index
    %151 = vector.load %arg15[%c0_97, %c0_98] : memref<128x32xbf16, #tpu.memory_space<vmem>>, vector<128x32xbf16>
    %cst_99 = arith.constant dense<0.000000e+00> : vector<32x32xf32>
    %152 = tpu.matmul %150, %151, %cst_99 {dimension_numbers = #tpu.dot_dimension_numbers<[1], [0], [0], [1], [0, 0, 1, 1], [], []>} : vector<32x128xbf16>, vector<128x32xbf16>, vector<32x32xf32> -> vector<32x32xf32>
    %c0_100 = arith.constant 0 : index
    %c0_101 = arith.constant 0 : index
    %153 = vector.load %arg16[%c0_100, %c0_101] : memref<1x32xf32, #tpu.memory_space<vmem>>, vector<1x32xf32>
    %154 = vector.broadcast %153 : vector<1x32xf32> to vector<32x32xf32>
    %155 = arith.addf %152, %154 : vector<32x32xf32>
    %156 = arith.addf %141, %155 : vector<32x32xf32>
    %c0_102 = arith.constant 0 : index
    %c0_103 = arith.constant 0 : index
    %157 = vector.load %arg17[%c0_102, %c0_103] : memref<1x32xf32, #tpu.memory_space<vmem>>, vector<1x32xf32>
    %c0_104 = arith.constant 0 : index
    %c0_105 = arith.constant 0 : index
    %158 = vector.load %arg18[%c0_104, %c0_105] : memref<1x32xf32, #tpu.memory_space<vmem>>, vector<1x32xf32>
    %cst_106 = arith.constant dense<0.000000e+00> : vector<32xf32>
    %159 = vector.multi_reduction <add>, %156, %cst_106 [1] : vector<32x32xf32> to vector<32xf32>
    %160 = vector.shape_cast %159 : vector<32xf32> to vector<32x1xf32>
    %cst_107 = arith.constant 3.200000e+01 : f32
    %161 = vector.broadcast %cst_107 : f32 to vector<32x1xf32>
    %162 = arith.divf %160, %161 : vector<32x1xf32>
    %163 = vector.broadcast %162 : vector<32x1xf32> to vector<32x32xf32>
    %164 = arith.subf %156, %163 : vector<32x32xf32>
    %165 = arith.mulf %164, %164 : vector<32x32xf32>
    %cst_108 = arith.constant dense<0.000000e+00> : vector<32xf32>
    %166 = vector.multi_reduction <add>, %165, %cst_108 [1] : vector<32x32xf32> to vector<32xf32>
    %167 = vector.shape_cast %166 : vector<32xf32> to vector<32x1xf32>
    %cst_109 = arith.constant 3.200000e+01 : f32
    %168 = vector.broadcast %cst_109 : f32 to vector<32x1xf32>
    %169 = arith.divf %167, %168 : vector<32x1xf32>
    %170 = vector.broadcast %162 : vector<32x1xf32> to vector<32x32xf32>
    %171 = arith.subf %156, %170 : vector<32x32xf32>
    %cst_110 = arith.constant 9.99999974E-6 : f32
    %172 = vector.broadcast %cst_110 : f32 to vector<32x1xf32>
    %173 = arith.addf %169, %172 : vector<32x1xf32>
    %174 = math.rsqrt %173 : vector<32x1xf32>
    %175 = vector.broadcast %174 : vector<32x1xf32> to vector<32x32xf32>
    %176 = arith.mulf %171, %175 : vector<32x32xf32>
    %177 = vector.broadcast %157 : vector<1x32xf32> to vector<32x32xf32>
    %178 = arith.mulf %176, %177 : vector<32x32xf32>
    %179 = vector.broadcast %158 : vector<1x32xf32> to vector<32x32xf32>
    %180 = arith.addf %178, %179 : vector<32x32xf32>
    %c0_111 = arith.constant 0 : index
    %c0_112 = arith.constant 0 : index
    %c0_113 = arith.constant 0 : index
    %181 = vector.load %arg19[%c0_111, %c0_112, %c0_113] : memref<1x32x32xf32, #tpu.memory_space<vmem>>, vector<1x32x32xf32>
    %182 = vector.shape_cast %181 : vector<1x32x32xf32> to vector<32x32xf32>
    %183 = vector.shape_cast %180 : vector<32x32xf32> to vector<1x32x32xf32>
    tpu.vector_store %arg19[%c0_111, %c0_112, %c0_113], %183 {strides = array<i32>} : memref<1x32x32xf32, #tpu.memory_space<vmem>>, vector<1x32x32xf32>,
    return
  }
  func.func @transform_0(%arg0: i32, %arg1: i32) -> (i32, i32, i32) {
    %c0_i32 = arith.constant 0 : i32
    %c0_i32_0 = arith.constant 0 : i32
    %c0_i32_1 = arith.constant 0 : i32
    return %arg0, %c0_i32, %c0_i32_0 : i32, i32, i32
  }
  func.func @transform_1(%arg0: i32, %arg1: i32) -> (i32, i32, i32) {
    %c0_i32 = arith.constant 0 : i32
    %c0_i32_0 = arith.constant 0 : i32
    return %arg0, %arg1, %c0_i32 : i32, i32, i32
  }
  func.func @transform_2(%arg0: i32, %arg1: i32) -> (i32, i32, i32) {
    %c0_i32 = arith.constant 0 : i32
    %c0_i32_0 = arith.constant 0 : i32
    return %arg0, %arg1, %c0_i32 : i32, i32, i32
  }
  func.func @transform_3(%arg0: i32, %arg1: i32) -> (i32, i32) {
    %c0_i32 = arith.constant 0 : i32
    %c0_i32_0 = arith.constant 0 : i32
    %c0_i32_1 = arith.constant 0 : i32
    return %c0_i32, %c0_i32_0 : i32, i32
  }
  func.func @transform_4(%arg0: i32, %arg1: i32) -> (i32, i32) {
    %c0_i32 = arith.constant 0 : i32
    %c0_i32_0 = arith.constant 0 : i32
    %c0_i32_1 = arith.constant 0 : i32
    return %c0_i32, %c0_i32_0 : i32, i32
  }
  func.func @transform_5(%arg0: i32, %arg1: i32) -> (i32, i32) {
    %c0_i32 = arith.constant 0 : i32
    %c0_i32_0 = arith.constant 0 : i32
    %c0_i32_1 = arith.constant 0 : i32
    return %c0_i32, %c0_i32_0 : i32, i32
  }
  func.func @transform_6(%arg0: i32, %arg1: i32) -> (i32, i32) {
    %c0_i32 = arith.constant 0 : i32
    %c0_i32_0 = arith.constant 0 : i32
    %c0_i32_1 = arith.constant 0 : i32
    return %c0_i32, %c0_i32_0 : i32, i32
  }
  func.func @transform_7(%arg0: i32, %arg1: i32) -> (i32, i32) {
    %c0_i32 = arith.constant 0 : i32
    %c0_i32_0 = arith.constant 0 : i32
    %c0_i32_1 = arith.constant 0 : i32
    return %c0_i32, %c0_i32_0 : i32, i32
  }
  func.func @transform_8(%arg0: i32, %arg1: i32) -> (i32, i32) {
    %c0_i32 = arith.constant 0 : i32
    %c0_i32_0 = arith.constant 0 : i32
    %c0_i32_1 = arith.constant 0 : i32
    return %c0_i32, %c0_i32_0 : i32, i32
  }
  func.func @transform_9(%arg0: i32, %arg1: i32) -> (i32, i32) {
    %c0_i32 = arith.constant 0 : i32
    %c0_i32_0 = arith.constant 0 : i32
    %c0_i32_1 = arith.constant 0 : i32
    return %c0_i32, %c0_i32_0 : i32, i32
  }
  func.func @transform_10(%arg0: i32, %arg1: i32) -> (i32, i32) {
    %c0_i32 = arith.constant 0 : i32
    %c0_i32_0 = arith.constant 0 : i32
    %c0_i32_1 = arith.constant 0 : i32
    return %c0_i32, %c0_i32_0 : i32, i32
  }
  func.func @transform_11(%arg0: i32, %arg1: i32) -> (i32, i32) {
    %c0_i32 = arith.constant 0 : i32
    %c0_i32_0 = arith.constant 0 : i32
    %c0_i32_1 = arith.constant 0 : i32
    return %c0_i32, %c0_i32_0 : i32, i32
  }
  func.func @transform_12(%arg0: i32, %arg1: i32) -> (i32, i32) {
    %c0_i32 = arith.constant 0 : i32
    %c0_i32_0 = arith.constant 0 : i32
    %c0_i32_1 = arith.constant 0 : i32
    return %c0_i32, %c0_i32_0 : i32, i32
  }
  func.func @transform_13(%arg0: i32, %arg1: i32) -> (i32, i32) {
    %c0_i32 = arith.constant 0 : i32
    %c0_i32_0 = arith.constant 0 : i32
    %c0_i32_1 = arith.constant 0 : i32
    return %c0_i32, %c0_i32_0 : i32, i32
  }
  func.func @transform_14(%arg0: i32, %arg1: i32) -> (i32, i32) {
    %c0_i32 = arith.constant 0 : i32
    %c0_i32_0 = arith.constant 0 : i32
    %c0_i32_1 = arith.constant 0 : i32
    return %c0_i32, %c0_i32_0 : i32, i32
  }
  func.func @transform_15(%arg0: i32, %arg1: i32) -> (i32, i32) {
    %c0_i32 = arith.constant 0 : i32
    %c0_i32_0 = arith.constant 0 : i32
    %c0_i32_1 = arith.constant 0 : i32
    return %c0_i32, %c0_i32_0 : i32, i32
  }
  func.func @transform_16(%arg0: i32, %arg1: i32) -> (i32, i32) {
    %c0_i32 = arith.constant 0 : i32
    %c0_i32_0 = arith.constant 0 : i32
    %c0_i32_1 = arith.constant 0 : i32
    return %c0_i32, %c0_i32_0 : i32, i32
  }
  func.func @transform_17(%arg0: i32, %arg1: i32) -> (i32, i32, i32) {
    %c0_i32 = arith.constant 0 : i32
    %c0_i32_0 = arith.constant 0 : i32
    return %arg0, %arg1, %c0_i32 : i32, i32, i32
  }
  func.func @transform_18(%arg0: i32, %arg1: i32) -> (i32, i32, i32, i32) {
    %c0_i32 = arith.constant 0 : i32
    %c0_i32_0 = arith.constant 0 : i32
    %c0_i32_1 = arith.constant 0 : i32
    return %arg0, %c0_i32, %arg1, %c0_i32_0 : i32, i32, i32, i32
  }
}

</mosaic_0001>

<bundles_post_ra>
// kernel: tpu_custom_call.1
= control target key start
LH: loop header
LB: loop body
LE: loop exit
PB: predicated region body
PF: predicated region fallthrough
CT: control target
= control target key end

     0   :  { %s4555_s0 = inlined_call_operand.vmem [shape: f32[2,64,32], index: 0, kind: input, shape index: {}]   ;;  %s4556_s1 = inlined_call_operand.vmem [shape: f32[2,64,32], index: 1, kind: input, shape index: {}]   ;;  %s4557_s2 = inlined_call_operand.vmem [shape: s8[2,64,64], index: 2, kind: input, shape index: {}]   ;;  %s4558_s3 = inlined_call_operand.vmem [shape: bf16[32,32], index: 3, kind: input, shape index: {}]   ;;  %s4559_s4 = inlined_call_operand.vmem [shape: f32[1,32], index: 4, kind: input, shape index: {}]   ;;  %s4560_s5 = inlined_call_operand.vmem [shape: bf16[32,64], index: 5, kind: input, shape index: {}]   ;;  %s4561_s6 = inlined_call_operand.vmem [shape: f32[1,64], index: 6, kind: input, shape index: {}]   ;;  %s4562_s7 = inlined_call_operand.vmem [shape: bf16[32,32], index: 7, kind: input, shape index: {}]   ;;  %s4563_s8 = inlined_call_operand.vmem [shape: f32[1,32], index: 8, kind: input, shape index: {}]   ;;  %s4564_s9 = inlined_call_operand.vmem [shape: f32[1,32], index: 9, kind: input, shape index: {}]   ;;  %s4565_s10 = inlined_call_operand.vmem [shape: f32[1,32], index: 10, kind: input, shape index: {}]   ;;  %s4566_s11 = inlined_call_operand.vmem [shape: bf16[32,128], index: 11, kind: input, shape index: {}]   ;;  %s4567_s12 = inlined_call_operand.vmem [shape: f32[1,128], index: 12, kind: input, shape index: {}]   ;;  %s4568_s13 = inlined_call_operand.vmem [shape: bf16[128,32], index: 13, kind: input, shape index: {}]   ;;  %s4569_s14 = inlined_call_operand.vmem [shape: f32[1,32], index: 14, kind: input, shape index: {}]   ;;  %s4570_s15 = inlined_call_operand.vmem [shape: f32[1,32], index: 15, kind: input, shape index: {}]   ;;  %s4571_s16 = inlined_call_operand.vmem [shape: f32[1,32], index: 16, kind: input, shape index: {}]   ;;  %s4572_s17 = inlined_call_operand.vmem [shape: f32[2,64,32], index: 17, kind: output, shape index: {0}]   ;;  %s4573_s18 = inlined_call_operand.hbm [shape: f32[2,4,64,64], index: 18, kind: output, shape index: {1}]  }
   0x1   :  { %4581 = sst [smem:[#allocation19_spill]] %s4555_s0 }
   0x2   :  { %4582 = sst [smem:[#allocation20_spill]] %s4556_s1 }
   0x3   :  { %4583 = sst [smem:[#allocation21_spill]] %s4557_s2 }
   0x4   :  { %4584 = sst [smem:[#allocation22_spill]] %s4560_s5 }
   0x5   :  { %4585 = sst [smem:[#allocation23_spill]] %s4572_s17 }
   0x6   :  { %4586 = sst [smem:[#allocation24_spill]] %s4573_s18 }
   0x7   :  { %24 = vsyncpa [#allocation7], 0 }
   0x8   :  { %26 = vsyncpa [#allocation7 + $0x1], 0  ;;  %s3472_s27 = smov 0   ;;  %s3474_s28 = smov 0  }
   0x9   :  { %s3476_s29 = smov 0   ;;  %s3478_s30 = smov 0  }
   0xa   :  { %s3480_s0 = smov 0   ;;  %s3482_s19 = smov 0  }
   0xb   :  { %s3484_s1 = smov 0   ;;  %s3486_s20 = smov 0  }
   0xc LB: > { %4587 = sst [smem:[#allocation11_spill]] %s3328_s27  ;;  %s2970_s21 = sadd.s32 4294967295, %s3356_s20   ;;  %s3356_s20 = sphi %s3486_s20, %s32_s20   ;;  %s3352_s1 = sphi %s3484_s1, %s4640_s1   ;;  %s3348_s19 = sphi %s3482_s19, %s4639_s19   ;;  %s3344_s0 = sphi %s3480_s0, %s4638_s0   ;;  %s3340_s30 = sphi %s3478_s30, %s4637_s30   ;;  %s3336_s29 = sphi %s3476_s29, %s4636_s29   ;;  %s3332_s28 = sphi %s3474_s28, %s4642_s28   ;;  %s3328_s27 = sphi %s3472_s27, %s4641_s27  }
   0xd   : > { %4588 = sst [smem:[#allocation12_spill]] %s3336_s29  ;;  %s2971_s22 = sadd.s32 4294967294, %s3356_s20  }
   0xe   : > { %4589 = sst [smem:[#allocation13_spill]] %s3348_s19  ;;  %s41_s2 = sadd.s32 1, %s3348_s19 }
   0xf   : > { %4590 = sst [smem:[#allocation14_spill]] %s3352_s1  ;;  %p42_p0 = scmp.ge.s32.totalorder %s41_s2, 2 }
  0x10   : > { %s44_s23 = sadd.s32 1, %s3352_s1  ;;  %p467_p1 = scmp.ne.s32.totalorder %s3336_s29, %s3332_s28 }
  0x11   : > { %p468_p2 = scmp.eq.s32.totalorder %s2970_s21, 3  ;;  %s4644_s2 = smov (%p42_p0, %s41_s2), 0 }
  0x12   : > { %4591 = sst [smem:[#allocation15_spill]] %s4644_s2  ;;  %s4646_s23 = smov (!%p42_p0, %s44_s23), %s3352_s1 }
  0x13   : > { %s453_s24 = ssub.s32 %s3348_s19, %s4644_s2  ;;  %p3523_p3 = por %p468_p2, %p467_p1 }
  0x14   : > { %p46_p4 = scmp.ge.s32.totalorder %s4646_s23, 2  ;;  %p473_p5 = scmp.ne.s32.totalorder %s3332_s28, %s3328_s27 }
  0x15   : > { %p474_p6 = scmp.eq.s32.totalorder %s2971_s22, 3  ;;  %p2974_p7 = scmp.ge.s32.totalorder %s3356_s20, 1 }
  0x16   : > { %s4648_s23 = smov (%p46_p4, %s4646_s23), 0  ;;  %p566_p9 = scmp.lt.s32.totalorder %s3356_s20, 5 }
  0x17   : > { %4593 = sst [smem:[#allocation16_spill]] %s4648_s23  ;;  %p3532_p8 = por %p474_p6, %p473_p5 }
  0x18   : > { %s452_s21 = ssub.s32 %s3352_s1, %s4648_s23  ;;  %s457_s18 = sadd.s32 1, %s3336_s29 }
  0x19   : > { %s4594_s26 = scalar_select %p3532_p8, 1, 0 }
  0x1a   : > { %s454_s17 = sor.u32 %s453_s24, %s452_s21  ;;  %p567_p10 = pnand %p2974_p7, %p566_p9 }
  0x1b   : > { %4595 = sst [smem:[#allocation17_spill]] %s4594_s26  ;;  %p455_p11 = scmp.eq.s32.totalorder %s454_s17, 0 }
  0x1c   : > { %570 = sbr.rel (%p567_p10) target bundleno = 2121 (0x849), region = 88  ;;  %s4597_s5 = sld [smem:[#allocation22_spill]] (!%p567_p10) }
  0x1d   : > { %s3541_s2 = scalar_select %p455_p11, %s3336_s29, %s457_s18  }
  0x1e   : > { %p646_p12 = scmp.lt.s32.totalorder (!%p567_p10), %s3344_s0, 1  ;;  %s4598_s21 = sld [smem:[#allocation19_spill]] (!%p567_p10) }
  0x1f   : > { %4596 = sst [smem:[#allocation18_spill]] %s3541_s2  ;;  %s3562_s27 = sshll.u32 (!%p567_p10), %s3340_s30, 2 }
  0x20   : > { %p654_p13 = scmp.lt.s32.totalorder (!%p567_p10), %s3562_s27, 7  ;;  %s3358_s18 = smov (!%p567_p10), 104  }
  0x21   : > { %s3551_s23 = scalar_select %p646_p12, %s3344_s0, 1  ;;  %vm721_vm0 = vcmask 261120   ;;  %v3084_v8 = vld [vmem:[%s4558_s3 + $0x8] sm:$0xff]  ;;  %v3083_v9 = vld [vmem:[%s4558_s3] sm:$0xff]  ;;  %vm808_vm1 = vcmask 64512   ;;  %vm1613_vm6 = vcmask 523264  }
  0x22   : > { %v3086_v0 = vld [vmem:[%s4597_s5 + $0x8] sm:$0xff]  ;;  %v3085_v1 = vld [vmem:[%s4597_s5] sm:$0xff]  ;;  %s655_s19 = scalar_select %p654_p13, %s3562_s27, 7  ;;  %734 = vmatpush.bf16.msra.mxu0 %v3084_v8 }
  0x23   : > { %785 = vmatpush.bf16.msra.mxu1 %v3086_v0  ;;  %s3082_s17 = sshll.u32 %s3551_s23, 6  ;;  %s2979_s26 = sshll.u32 %s3551_s23, 3  ;;  %v3195_v22 = vld [vmem:[%s4561_s6] ss:$0 sm:$0xff] }
  0x24   : > { %s3557_s1 = scalar_lea.vmem %s4598_s21, %s3082_s17  ;;  %s3568_s22 = sadd.s32 %s2979_s26, %s655_s19  ;;  %v3196_v30 = vld [vmem:[%s4559_s4] ss:$0 sm:$0xff] }
  0x25   : > { %v683_v2 = vld [vmem:[%s3557_s1] sm:$0xff]  ;;  %v684_v3 = vld [vmem:[%s3557_s1 + $0x8] sm:$0xff]  ;;  %v685_v5 = vld [vmem:[%s3557_s1 + $0x10] sm:$0xff]  ;;  %s2980_s17 = sshll.u32 %s3568_s22, 3  ;;  %s4599_s21 = sld [smem:[#allocation20_spill]] }
  0x26   : > { %v691_v4 = vpack.c.bf16 %v684_v3, %v683_v2  ;;  %v686_v6 = vld [vmem:[%s3557_s1 + $0x18] sm:$0xff]  ;;  %735 = vmatpush.bf16.msra.mxu0 %v3083_v9  ;;  %v687_v13 = vld [vmem:[%s3557_s1 + $0x20] sm:$0xff]  ;;  %v688_v14 = vld [vmem:[%s3557_s1 + $0x28] sm:$0xff]  ;;  %s3360_s24 = smov 120   ;;  %s3361_s26 = smov 88  }
  0x27   : > { %786 = vmatpush.bf16.msra.mxu1 %v3085_v1  ;;  %v692_v7 = vpack.c.bf16 %v686_v6, %v685_v5  ;;  %v693_v15 = vpack.c.bf16 %v688_v14, %v687_v13  ;;  %v689_v19 = vld [vmem:[%s3557_s1 + $0x30] sm:$0xff]  ;;  %v690_v20 = vld [vmem:[%s3557_s1 + $0x38] sm:$0xff]  ;;  %s3359_s1 = smov 112   ;;  %s3362_s29 = smov 80  }
  0x28   : > { %v694_v21 = vpack.c.bf16 %v690_v20, %v689_v19  ;;  %s3363_s2 = smov 72   ;;  %p663_p0 = scmp.lt.s32.totalorder %s3340_s30, 1 }
  0x29   : > { %s4600_s19 = sld [smem:[#allocation21_spill]] }
  0x2a   : > { %3004 = vmatmul.msk.bf16.vlgmr.msra.gmra.mxu1 %vm721_vm0, %v691_v4  ;;  %s4650_s30 = smov (!%p663_p0, %s3340_s30), 1 }
  0x2b   : > { %s3578_s5 = scalar_lea.vmem %s4599_s21, %s2980_s17 }
  0x2c   : > { %v695_v10 = vld [vmem:[%s3578_s5] sm:$0xff]  ;;  %v696_v11 = vld [vmem:[%s3578_s5 + $0x8] sm:$0xff]  ;;  %v697_v16 = vld [vmem:[%s3578_s5 + $0x10] sm:$0xff] }
  0x2d   : > { %v699_v12 = vpack.c.bf16 %v696_v11, %v695_v10  ;;  %v698_v17 = vld [vmem:[%s3578_s5 + $0x18] sm:$0xff] }
  0x2e   : > { %v700_v18 = vpack.c.bf16 %v698_v17, %v697_v16 }
  0x2f   : > { %2994 = vmatmul.msk.bf16.vlgmr.msra.gmra.mxu0 %vm721_vm0, %v699_v12 }
  0x3a   : > { %3005 = vmatmul.msk.bf16.gmra.mxu1 %vm721_vm0, %v692_v7 }
  0x3f   : > { %2995 = vmatmul.msk.bf16.gmra.mxu0 %vm721_vm0, %v700_v18 }
  0x4a   : > { %3006 = vmatmul.msk.bf16.gmra.mxu1 %vm721_vm0, %v693_v15 }
  0x5a   : > { %3007 = vmatmul.msk.bf16.gmra.mxu1 %vm721_vm0, %v694_v21 }
  0xa7   : > { %v788_v23 = vpop.f32.mrf.mxu1 }
  0xa8   : > { %v3602_v24 = vadd.f32 %v3195_v22, %v788_v23 }
  0xaa   : > { %813 = vst.msk [vmem:[#allocation3] sm:$0xff] %vm808_vm1, %v3602_v24  ;;  %1048 = vrot.lane.b32.xlu1 %v3602_v24, %s3358_s18 }
  0xac   : > { %v737_v31 = vpop.f32.mrf.mxu0 }
  0xad   : > { %v3629_v33 = vadd.f32 %v3196_v30, %v737_v31 }
  0xaf   : > { %v790_v25 = vpop.f32.mrf.mxu1  ;;  %809 = vst.msk [vmem:[#allocation2] sm:$0xff] %vm808_vm1, %v3629_v33 }
  0xb0   : > { %v3608_v26 = vadd.f32 %v3195_v22, %v790_v25 }
  0xb1   : > { %v1146_v7 = vld [vmem:[#allocation3] sm:$0xff] }
  0xb2   : > { %814 = vst.msk [vmem:[#allocation3 + $0x8] sm:$0xff] %vm808_vm1, %v3608_v26  ;;  %1050 = vrot.lane.b32.xlu2 %v3608_v26, %s3358_s18  ;;  %v1178_v10 = vpack.c.bf16 %v1146_v7, %v1146_v7 }
  0xb4   : > { %v739_v35 = vpop.f32.mrf.mxu0  ;;  %v1292_v13 = vunpack.c.l.b16 %v1178_v10 }
  0xb5   : > { %v3641_v37 = vadd.f32 %v3196_v30, %v739_v35 }
  0xb6   : > { %v1114_v14 = vld [vmem:[#allocation2] sm:$0xff] }
  0xb7   : > { %v793_v27 = vpop.f32.mrf.mxu1  ;;  %810 = vst.msk [vmem:[#allocation2 + $0x8] sm:$0xff] %vm808_vm1, %v3641_v37  ;;  %v1130_v17 = vpack.c.bf16 %v1114_v14, %v1114_v14 }
  0xb8   : > { %v3614_v28 = vadd.f32 %v3195_v22, %v793_v27 }
  0xb9   : > { %v1147_v5 = vld [vmem:[#allocation3 + $0x8] sm:$0xff]  ;;  %v1278_v20 = vunpack.c.l.b16 %v1130_v17 }
  0xba   : > { %815 = vst.msk [vmem:[#allocation3 + $0x10] sm:$0xff] %vm808_vm1, %v3614_v28  ;;  %969 = vrot.lane.b32.xlu0 %v3614_v28, %s3359_s1  ;;  %886 = vrot.lane.b32.xlu2 %v3614_v28, %s3360_s24  ;;  %v1179_v9 = vpack.c.bf16 %v1147_v5, %v1147_v5 }
  0xbb   : > { %1052 = vrot.lane.b32.xlu1 %v3614_v28, %s3358_s18 }
  0xbc   : > { %v742_v42 = vpop.f32.mrf.mxu0  ;;  %v1293_v12 = vunpack.c.l.b16 %v1179_v9 }
  0xbd   : > { %v3671_v43 = vadd.f32 %v3196_v30, %v742_v42 }
  0xbe   : > { %v1115_v15 = vld [vmem:[#allocation2 + $0x8] sm:$0xff]  ;;  %v1300_v16 = vpack.c.b16 %v1293_v12, %v1292_v13 }
  0xbf   : > { %v795_v29 = vpop.f32.mrf.mxu1  ;;  %811 = vst.msk [vmem:[#allocation2 + $0x10] sm:$0xff] %vm808_vm1, %v3671_v43  ;;  %v1131_v18 = vpack.c.bf16 %v1115_v15, %v1115_v15 }
  0xc0   : > { %v3627_v32 = vadd.f32 %v3195_v22, %v795_v29  ;;  %v1311_v19 = vsel %vm808_vm1, %v1300_v16, 0 }
  0xc1   : > { %v1148_v63 = vld [vmem:[#allocation3 + $0x10] sm:$0xff]  ;;  %v1279_v21 = vunpack.c.l.b16 %v1131_v18 }
  0xc2   : > { %816 = vst.msk [vmem:[#allocation3 + $0x18] sm:$0xff] %vm808_vm1, %v3627_v32  ;;  %888 = vrot.lane.b32.xlu0 %v3627_v32, %s3360_s24  ;;  %1054 = vrot.lane.b32.xlu2 %v3627_v32, %s3358_s18  ;;  %v1180_v2 = vpack.c.bf16 %v1148_v63, %v1148_v63 }
  0xc3   : > { %v1282_v23 = vpack.c.b16 %v1279_v21, %v1278_v20 }
  0xc4   : > { %v744_v46 = vpop.f32.mrf.mxu0  ;;  %v1294_v6 = vunpack.c.l.b16 %v1180_v2 }
  0xc5   : > { %v3685_v47 = vadd.f32 %v3196_v30, %v744_v46 }
  0xc6   : > { %v1116_v25 = vld [vmem:[#allocation2 + $0x10] sm:$0xff] }
  0xc7   : > { %v798_v34 = vpop.f32.mrf.mxu1  ;;  %812 = vst.msk [vmem:[#allocation2 + $0x18] sm:$0xff] %vm808_vm1, %v3685_v47  ;;  %v1132_v30 = vpack.c.bf16 %v1116_v25, %v1116_v25 }
  0xc8   : > { %v3639_v36 = vadd.f32 %v3195_v22, %v798_v34 }
  0xc9   : > { %v1149_v61 = vld [vmem:[#allocation3 + $0x18] sm:$0xff] }
  0xca   : > { %817 = vst.msk [vmem:[#allocation3 + $0x20] sm:$0xff] %vm808_vm1, %v3639_v36  ;;  %973 = vrot.lane.b32.xlu0 %v3639_v36, %s3359_s1  ;;  %1056 = vrot.lane.b32.xlu2 %v3639_v36, %s3358_s18  ;;  %v1181_v1 = vpack.c.bf16 %v1149_v61, %v1149_v61 }
  0xcc   : > { %v1295_v4 = vunpack.c.l.b16 %v1181_v1 }
  0xce   : > { %v1301_v8 = vpack.c.b16 %v1295_v4, %v1294_v6  ;;  %v1117_v27 = vld [vmem:[#allocation2 + $0x18] sm:$0xff] }
  0xcf   : > { %v800_v38 = vpop.f32.mrf.mxu1  ;;  %v1133_v31 = vpack.c.bf16 %v1117_v27, %v1117_v27 }
  0xd0   : > { %v3651_v39 = vadd.f32 %v3195_v22, %v800_v38  ;;  %v1314_v11 = vsel %vm808_vm1, %v1301_v8, 0 }
  0xd1   : > { %v1150_v53 = vld [vmem:[#allocation3 + $0x20] sm:$0xff]  ;;  %v1281_v34 = vunpack.c.l.b16 %v1133_v31 }
  0xd2   : > { %818 = vst.msk [vmem:[#allocation3 + $0x28] sm:$0xff] %vm808_vm1, %v3651_v39  ;;  %892 = vrot.lane.b32.xlu0 %v3651_v39, %s3360_s24  ;;  %890 = vrot.lane.b32.xlu2 %v3639_v36, %s3360_s24  ;;  %v1182_v58 = vpack.c.bf16 %v1150_v53, %v1150_v53 }
  0xd3   : > { %975 = vrot.lane.b32.xlu1 %v3651_v39, %s3359_s1 }
  0xd4   : > { %v1296_v62 = vunpack.c.l.b16 %v1182_v58 }
  0xd7   : > { %v803_v40 = vpop.f32.mrf.mxu1 }
  0xd8   : > { %v3661_v41 = vadd.f32 %v3195_v22, %v803_v40 }
  0xd9   : > { %v1151_v51 = vld [vmem:[#allocation3 + $0x28] sm:$0xff] }
  0xda   : > { %819 = vst.msk [vmem:[#allocation3 + $0x30] sm:$0xff] %vm808_vm1, %v3661_v41  ;;  %1060 = vrot.lane.b32.xlu0 %v3661_v41, %s3358_s18  ;;  %1058 = vrot.lane.b32.xlu2 %v3651_v39, %s3358_s18  ;;  %v1183_v56 = vpack.c.bf16 %v1151_v51, %v1151_v51 }
  0xdb   : > { %894 = vrot.lane.b32.xlu1 %v3661_v41, %s3360_s24 }
  0xdc   : > { %v1297_v60 = vunpack.c.l.b16 %v1183_v56 }
  0xde   : > { %v1302_v0 = vpack.c.b16 %v1297_v60, %v1296_v62 }
  0xdf   : > { %v805_v44 = vpop.f32.mrf.mxu1 }
  0xe0   : > { %v3675_v45 = vadd.f32 %v3195_v22, %v805_v44  ;;  %v1317_v3 = vsel %vm808_vm1, %v1302_v0, 0 }
  0xe1   : > { %v1152_v48 = vld [vmem:[#allocation3 + $0x30] sm:$0xff] }
  0xe2   : > { %820 = vst.msk [vmem:[#allocation3 + $0x38] sm:$0xff] %vm808_vm1, %v3675_v45  ;;  %977 = vrot.lane.b32.xlu0 %v3661_v41, %s3359_s1  ;;  %882 = vrot.lane.b32.xlu2 %v3602_v24, %s3360_s24  ;;  %v1184_v49 = vpack.c.bf16 %v1152_v48, %v1152_v48 }
  0xe3   : > { %896 = vrot.lane.b32.xlu1 %v3675_v45, %s3360_s24 }
  0xe4   : > { %v1298_v54 = vunpack.c.l.b16 %v1184_v49 }
  0xe9   : > { %v1153_v50 = vld [vmem:[#allocation3 + $0x38] sm:$0xff] }
  0xea   : > { %1062 = vrot.lane.b32.xlu0 %v3675_v45, %s3358_s18  ;;  %1033 = vrot.lane.b32.xlu2 %v3641_v37, %s3358_s18  ;;  %v1185_v52 = vpack.c.bf16 %v1153_v50, %v1153_v50 }
  0xeb   : > { %979 = vrot.lane.b32.xlu1 %v3675_v45, %s3359_s1 }
  0xec   : > { %v1299_v55 = vunpack.c.l.b16 %v1185_v52 }
  0xee   : > { %v1303_v57 = vpack.c.b16 %v1299_v55, %v1298_v54 }
  0xf0   : > { %v1320_v59 = vsel %vm808_vm1, %v1303_v57, 0 }
  0xf1   : > { %1326 = vmatpush.bf16.xpose.msra.mxu2 %v1320_v59 }
  0xf2   : > { %884 = vrot.lane.b32.xlu0 %v3608_v26, %s3360_s24  ;;  %865 = vrot.lane.b32.xlu2 %v3629_v33, %s3360_s24 }
  0xf3   : > { %971 = vrot.lane.b32.xlu1 %v3627_v32, %s3359_s1 }
  0xf9   : > { %1327 = vmatpush.bf16.xpose.msra.mxu2 %v1317_v3 }
  0xfa   : > { %965 = vrot.lane.b32.xlu0 %v3602_v24, %s3359_s1  ;;  %950 = vrot.lane.b32.xlu2 %v3641_v37, %s3359_s1 }
  0xfb   : > { %1031 = vrot.lane.b32.xlu1 %v3629_v33, %s3358_s18 }
 0x101   : > { %1328 = vmatpush.bf16.xpose.msra.mxu2 %v1314_v11 }
 0x102   : > { %867 = vrot.lane.b32.xlu0 %v3641_v37, %s3360_s24  ;;  %869 = vrot.lane.b32.xlu2 %v3671_v43, %s3360_s24 }
 0x103   : > { %967 = vrot.lane.b32.xlu1 %v3608_v26, %s3359_s1 }
 0x109   : > { %1329 = vmatpush.bf16.xpose.msra.mxu2 %v1311_v19 }
 0x10a   : > { %1035 = vrot.lane.b32.xlu0 %v3671_v43, %s3358_s18  ;;  %954 = vrot.lane.b32.xlu2 %v3685_v47, %s3359_s1 }
 0x10b   : > { %948 = vrot.lane.b32.xlu1 %v3629_v33, %s3359_s1  ;;  %v1280_v33 = vunpack.c.l.b16 %v1132_v30 }
 0x10c   : > { %v1051_v22 = vpop.permute.xlu2 %1050 }
 0x10d   : > { %1074 = vst.msk [vmem:[#allocation3 + $0xc8] sm:$0xff] %vm808_vm1, %v1051_v22  ;;  %v1283_v38 = vpack.c.b16 %v1281_v34, %v1280_v33 }
 0x110   : > { %3008 = vmatmul.msk.bf16.vlgmr.msra.gmra.mxu2 %vm808_vm1, %v1282_v23 }
 0x112   : > { %871 = vrot.lane.b32.xlu0 %v3685_v47, %s3360_s24  ;;  %927 = vrot.lane.b32.xlu2 %v3661_v41, %s3361_s26 }
 0x113   : > { %1037 = vrot.lane.b32.xlu1 %v3685_v47, %s3358_s18  ;;  %s3364_s18 = smov 96  }
 0x114   : > { %v887_v29 = vpop.permute.xlu2 %886 }
 0x115   : > { %909 = vst.msk [vmem:[#allocation3 + $0x50] sm:$0xff] %vm808_vm1, %v887_v29 }
 0x11a   : > { %1010 = vrot.lane.b32.xlu0 %v3661_v41, %s3362_s29  ;;  %1089 = vrot.lane.b32.xlu2 %v3639_v36, %s3363_s2 }
 0x11b   : > { %952 = vrot.lane.b32.xlu1 %v3671_v43, %s3359_s1  ;;  %s2981_s1 = sshll.u32 %s3551_s23, 1 }
 0x11c   : > { %v1055_v35 = vpop.permute.xlu2 %1054  ;;  %v1049_v37 = vpop.permute.xlu1 %1048  ;;  %v1156_v30 = vld [vmem:[#allocation3 + $0x50] sm:$0xff]  ;;  %s3818_s24 = sadd.s32 %s2981_s1, %s4650_s30 }
 0x11d   : > { %1076 = vst.msk [vmem:[#allocation3 + $0xd8] sm:$0xff] %vm808_vm1, %v1055_v35  ;;  %s2982_s30 = sshll.u32 %s3818_s24, 3  ;;  %s3367_s24 = smov 8  }
 0x11e   : > { %1073 = vst.msk [vmem:[#allocation3 + $0xc0] sm:$0xff] %vm808_vm1, %v1049_v37 }
 0x120   : > { %3009 = vmatmul.msk.bf16.gmra.mxu2 %vm808_vm1, %v1283_v38 }
 0x122   : > { %1087 = vrot.lane.b32.xlu0 %v3627_v32, %s3363_s2  ;;  %1091 = vrot.lane.b32.xlu2 %v3651_v39, %s3363_s2 }
 0x123   : > { %1093 = vrot.lane.b32.xlu1 %v3661_v41, %s3363_s2 }
 0x124   : > { %v1057_v40 = vpop.permute.xlu2 %1056 }
 0x125   : > { %1077 = vst.msk [vmem:[#allocation3 + $0xe0] sm:$0xff] %vm808_vm1, %v1057_v40 }
 0x12a   : > { %1008 = vrot.lane.b32.xlu0 %v3651_v39, %s3362_s29  ;;  %1006 = vrot.lane.b32.xlu2 %v3639_v36, %s3362_s29 }
 0x12b   : > { %923 = vrot.lane.b32.xlu1 %v3639_v36, %s3361_s26 }
 0x12c   : > { %v970_v42 = vpop.permute.xlu0 %969  ;;  %v891_v43 = vpop.permute.xlu2 %890  ;;  %v1174_v21 = vld [vmem:[#allocation3 + $0xe0] sm:$0xff] }
 0x12d   : > { %992 = vst.msk [vmem:[#allocation3 + $0x90] sm:$0xff] %vm808_vm1, %v970_v42  ;;  %v1053_v44 = vpop.permute.xlu1 %1052  ;;  %v1206_v37 = vpack.c.bf16 %v1174_v21, %v1174_v21 }
 0x12e   : > { %911 = vst.msk [vmem:[#allocation3 + $0x60] sm:$0xff] %vm808_vm1, %v891_v43 }
 0x12f   : > { %1075 = vst.msk [vmem:[#allocation3 + $0xd0] sm:$0xff] %vm808_vm1, %v1053_v44  ;;  %v1188_v44 = vpack.c.bf16 %v1156_v30, %v1156_v30 }
 0x132   : > { %919 = vrot.lane.b32.xlu0 %v3614_v28, %s3361_s26  ;;  %921 = vrot.lane.b32.xlu2 %v3627_v32, %s3361_s26 }
 0x133   : > { %925 = vrot.lane.b32.xlu1 %v3651_v39, %s3361_s26 }
 0x134   : > { %v889_v46 = vpop.permute.xlu0 %888  ;;  %v1059_v47 = vpop.permute.xlu2 %1058 }
 0x135   : > { %910 = vst.msk [vmem:[#allocation3 + $0x58] sm:$0xff] %vm808_vm1, %v889_v46  ;;  %v1158_v3 = vld [vmem:[#allocation3 + $0x60] sm:$0xff] }
 0x136   : > { %1078 = vst.msk [vmem:[#allocation3 + $0xe8] sm:$0xff] %vm808_vm1, %v1059_v47  ;;  %v1190_v8 = vpack.c.bf16 %v1158_v3, %v1158_v3 }
 0x138   : > { %v1363_v22 = vunpack.c.l.b16 %v1190_v8 }
 0x13a   : > { %1081 = vrot.lane.b32.xlu0 %v3602_v24, %s3363_s2  ;;  %1083 = vrot.lane.b32.xlu2 %v3608_v26, %s3363_s2 }
 0x13b   : > { %1085 = vrot.lane.b32.xlu1 %v3614_v28, %s3363_s2 }
 0x13c   : > { %v974_v48 = vpop.permute.xlu0 %973  ;;  %v883_v49 = vpop.permute.xlu2 %882  ;;  %v1157_v19 = vld [vmem:[#allocation3 + $0x58] sm:$0xff] }
 0x13d   : > { %994 = vst.msk [vmem:[#allocation3 + $0xa0] sm:$0xff] %vm808_vm1, %v974_v48  ;;  %v1175_v15 = vld [vmem:[#allocation3 + $0xe8] sm:$0xff]  ;;  %v1189_v33 = vpack.c.bf16 %v1157_v19, %v1157_v19 }
 0x13e   : > { %907 = vst.msk [vmem:[#allocation3 + $0x40] sm:$0xff] %vm808_vm1, %v883_v49  ;;  %v1207_v31 = vpack.c.bf16 %v1175_v15, %v1175_v15 }
 0x140   : > { %v1498_v49 = vunpack.c.l.b16 %v1207_v31 }
 0x142   : > { %1002 = vrot.lane.b32.xlu0 %v3614_v28, %s3362_s29  ;;  %915 = vrot.lane.b32.xlu2 %v3602_v24, %s3361_s26 }
 0x143   : > { %1004 = vrot.lane.b32.xlu1 %v3627_v32, %s3362_s29 }
 0x144   : > { %v893_v50 = vpop.permute.xlu0 %892  ;;  %v1034_v51 = vpop.permute.xlu2 %1033  ;;  %v1166_v34 = vld [vmem:[#allocation3 + $0xa0] sm:$0xff] }
 0x145   : > { %912 = vst.msk [vmem:[#allocation3 + $0x68] sm:$0xff] %vm808_vm1, %v893_v50  ;;  %v976_v52 = vpop.permute.xlu1 %975  ;;  %v1198_v48 = vpack.c.bf16 %v1166_v34, %v1166_v34 }
 0x146   : > { %1045 = vst.msk [vmem:[#allocation2 + $0x68] sm:$0xff] %vm808_vm1, %v1034_v51 }
 0x147   : > { %995 = vst.msk [vmem:[#allocation3 + $0xa8] sm:$0xff] %vm808_vm1, %v976_v52  ;;  %v1497_v52 = vunpack.c.l.b16 %v1206_v37 }
 0x14a   : > { %917 = vrot.lane.b32.xlu0 %v3608_v26, %s3361_s26  ;;  %1095 = vrot.lane.b32.xlu2 %v3675_v45, %s3363_s2 }
 0x14c   : > { %v1061_v53 = vpop.permute.xlu0 %1060  ;;  %v866_v54 = vpop.permute.xlu2 %865  ;;  %v1159_v1 = vld [vmem:[#allocation3 + $0x68] sm:$0xff] }
 0x14d   : > { %1079 = vst.msk [vmem:[#allocation3 + $0xf0] sm:$0xff] %vm808_vm1, %v1061_v53  ;;  %v895_v55 = vpop.permute.xlu1 %894  ;;  %v1191_v7 = vpack.c.bf16 %v1159_v1, %v1159_v1  ;;  %v1172_v53 = vld [vmem:[#allocation3 + $0xd0] sm:$0xff]  ;;  %v1154_v1 = vld [vmem:[#allocation3 + $0x40] sm:$0xff] }
 0x14e   : > { %878 = vst.msk [vmem:[#allocation2 + $0x20] sm:$0xff] %vm808_vm1, %v866_v54  ;;  %v1167_v20 = vld [vmem:[#allocation3 + $0xa8] sm:$0xff] }
 0x14f   : > { %913 = vst.msk [vmem:[#allocation3 + $0x70] sm:$0xff] %vm808_vm1, %v895_v55  ;;  %v1199_v35 = vpack.c.bf16 %v1167_v20, %v1167_v20  ;;  %v1171_v20 = vld [vmem:[#allocation3 + $0xc8] sm:$0xff] }
 0x152   : > { %929 = vrot.lane.b32.xlu0 %v3675_v45, %s3361_s26  ;;  %1012 = vrot.lane.b32.xlu2 %v3675_v45, %s3362_s29  ;;  %s668_s26 = scalar_lea.vmem %s4600_s19, %s2982_s30  ;;  %s3368_s30 = smov 24  }
 0x154   : > { %v978_v56 = vpop.permute.xlu0 %977  ;;  %v951_v57 = vpop.permute.xlu2 %950  ;;  %v1176_v4 = vld [vmem:[#allocation3 + $0xf0] sm:$0xff] }
 0x155   : > { %996 = vst.msk [vmem:[#allocation3 + $0xb0] sm:$0xff] %vm808_vm1, %v978_v56  ;;  %v897_v58 = vpop.permute.xlu1 %896  ;;  %v1208_v11 = vpack.c.bf16 %v1176_v4, %v1176_v4  ;;  %v1362_v56 = vunpack.c.l.b16 %v1189_v33  ;;  %v3365_v33 = vmov 0  }
 0x156   : > { %962 = vst.msk [vmem:[#allocation2 + $0x48] sm:$0xff] %vm808_vm1, %v951_v57  ;;  %v1160_v59 = vld [vmem:[#allocation3 + $0x70] sm:$0xff]  ;;  %v1431_v57 = vunpack.c.l.b16 %v1199_v35 }
 0x157   : > { %914 = vst.msk [vmem:[#allocation3 + $0x78] sm:$0xff] %vm808_vm1, %v897_v58  ;;  %v1192_v63 = vpack.c.bf16 %v1160_v59, %v1160_v59  ;;  %v1499_v27 = vunpack.c.l.b16 %v1208_v11  ;;  %v1173_v58 = vld [vmem:[#allocation3 + $0xd8] sm:$0xff] }
 0x158   : > { %v1205_v3 = vpack.c.bf16 %v1173_v58, %v1173_v58  ;;  %v1127_v58 = vld [vmem:[#allocation2 + $0x68] sm:$0xff] }
 0x159   : > { %v1365_v5 = vunpack.c.l.b16 %v1192_v63  ;;  %v1503_v63 = vpack.c.b16 %v1498_v49, %v1497_v52 }
 0x15a   : > { %1000 = vrot.lane.b32.xlu0 %v3608_v26, %s3362_s29  ;;  %998 = vrot.lane.b32.xlu2 %v3602_v24, %s3362_s29  ;;  %v1496_v15 = vunpack.c.l.b16 %v1205_v3  ;;  %v1143_v3 = vpack.c.bf16 %v1127_v58, %v1127_v58  ;;  %s643_s29 = sand.u32 1, %s3332_s28  }
 0x15b   : > { %v1518_v8 = vsel %vm808_vm1, %v1503_v63, 0  ;;  %s2975_s2 = sshll.u32 %s643_s29, 7  ;;  %s2777_s22 = scalar_lea.sflag [#allocation7], %s643_s29 }
 0x15c   : > { %v1063_v60 = vpop.permute.xlu0 %1062  ;;  %v870_v61 = vpop.permute.xlu2 %869  ;;  %v1168_v9 = vld [vmem:[#allocation3 + $0xb0] sm:$0xff]  ;;  %s4064_s1 = scalar_lea.vmem [#allocation6], %s2975_s2  ;;  %s4631_s2 = sld [smem:[#allocation23_spill]] }
 0x15d   : > { %1080 = vst.msk [vmem:[#allocation3 + $0xf8] sm:$0xff] %vm808_vm1, %v1063_v60  ;;  %v980_v62 = vpop.permute.xlu1 %979  ;;  %v1200_v18 = vpack.c.bf16 %v1168_v9, %v1168_v9  ;;  %v1186_v9 = vpack.c.bf16 %v1154_v1, %v1154_v1 }
 0x15e   : > { %880 = vst.msk [vmem:[#allocation2 + $0x30] sm:$0xff] %vm808_vm1, %v870_v61  ;;  %v1161_v0 = vld [vmem:[#allocation3 + $0x78] sm:$0xff]  ;;  %v1361_v61 = vunpack.c.l.b16 %v1188_v44 }
 0x15f   : > { %997 = vst.msk [vmem:[#allocation3 + $0xb8] sm:$0xff] %vm808_vm1, %v980_v62  ;;  %v1193_v2 = vpack.c.bf16 %v1161_v0, %v1161_v0  ;;  %v1432_v40 = vunpack.c.l.b16 %v1200_v18  ;;  %v1430_v62 = vunpack.c.l.b16 %v1198_v48  ;;  %v1204_v0 = vpack.c.bf16 %v1172_v53, %v1172_v53 }
 0x160   : > { %v1368_v4 = vpack.c.b16 %v1362_v56, %v1361_v61  ;;  %v1359_v21 = vunpack.c.l.b16 %v1186_v9 }
 0x161   : > { %v1366_v6 = vunpack.c.l.b16 %v1193_v2  ;;  %v1164_v2 = vld [vmem:[#allocation3 + $0x90] sm:$0xff]  ;;  %v1495_v11 = vunpack.c.l.b16 %v1204_v0  ;;  %v1123_v0 = vld [vmem:[#allocation2 + $0x48] sm:$0xff] }
 0x162   : > { %843 = vrot.lane.b32.xlu0 %v3675_v45, %s3364_s18  ;;  %841 = vrot.lane.b32.xlu2 %v3661_v41, %s3364_s18  ;;  %v1364_v45 = vunpack.c.l.b16 %v1191_v7  ;;  %v1139_v9 = vpack.c.bf16 %v1123_v0, %v1123_v0 }
 0x163   : > { %v1370_v10 = vpack.c.b16 %v1366_v6, %v1365_v5  ;;  %v1436_v5 = vpack.c.b16 %v1431_v57, %v1430_v62 }
 0x164   : > { %v885_v12 = vpop.permute.xlu0 %884  ;;  %v955_v13 = vpop.permute.xlu2 %954  ;;  %v1177_v14 = vld [vmem:[#allocation3 + $0xf8] sm:$0xff]  ;;  %v1369_v38 = vpack.c.b16 %v1364_v45, %v1363_v22 }
 0x165   : > { %908 = vst.msk [vmem:[#allocation3 + $0x48] sm:$0xff] %vm808_vm1, %v885_v12  ;;  %v1387_v16 = vsel %vm808_vm1, %v1370_v10, 0  ;;  %v972_v17 = vpop.permute.xlu1 %971  ;;  %v1209_v41 = vpack.c.bf16 %v1177_v14, %v1177_v14  ;;  %v1196_v10 = vpack.c.bf16 %v1164_v2, %v1164_v2  ;;  %v1558_v12 = vld [vmem:[%s668_s26] sm:$0xff]  ;;  %v1451_v45 = vsel %vm808_vm1, %v1436_v5, 0 }
 0x166   : > { %964 = vst.msk [vmem:[#allocation2 + $0x58] sm:$0xff] %vm808_vm1, %v955_v13  ;;  %1393 = vmatpush.bf16.xpose.msra.mxu3 %v1387_v16  ;;  %v1169_v23 = vld [vmem:[#allocation3 + $0xb8] sm:$0xff]  ;;  %v1384_v54 = vsel %vm808_vm1, %v1369_v38, 0  ;;  %v1170_v16 = vld [vmem:[#allocation3 + $0xc0] sm:$0xff]  ;;  %vm1559_vm2 = vnez %v1558_v12 }
 0x167   : > { %993 = vst.msk [vmem:[#allocation3 + $0x98] sm:$0xff] %vm808_vm1, %v972_v17  ;;  %v1201_v25 = vpack.c.bf16 %v1169_v23, %v1169_v23  ;;  %v1500_v29 = vunpack.c.l.b16 %v1209_v41  ;;  %v1381_v17 = vsel %vm808_vm1, %v1368_v4, 0  ;;  %v1428_v22 = vunpack.c.l.b16 %v1196_v10 }
 0x168   : > { %v1502_v23 = vpack.c.b16 %v1496_v15, %v1495_v11  ;;  %v3837_v34 = vsel %vm1559_vm2, 16843009, %v3365_v33  ;;  %v1120_v15 = vld [vmem:[#allocation2 + $0x30] sm:$0xff] }
 0x169   : > { %v1433_v42 = vunpack.c.l.b16 %v1201_v25  ;;  %v1504_v43 = vpack.c.b16 %v1500_v29, %v1499_v27  ;;  %v1202_v25 = vpack.c.bf16 %v1170_v16, %v1170_v16  ;;  %v1118_v27 = vld [vmem:[#allocation2 + $0x20] sm:$0xff]  ;;  %v1203_v29 = vpack.c.bf16 %v1171_v20, %v1171_v20 }
 0x16a   : > { %837 = vrot.lane.b32.xlu0 %v3639_v36, %s3364_s18  ;;  %v1515_v37 = vsel %vm808_vm1, %v1502_v23, 0  ;;  %v1134_v38 = vpack.c.bf16 %v1118_v27, %v1118_v27  ;;  %v1564_v58 = vunpack.c.3.s8 %v3837_v34 }
 0x16b   : > { %v1437_v46 = vpack.c.b16 %v1433_v42, %v1432_v40  ;;  %v1521_v47 = vsel %vm808_vm1, %v1504_v43, 0  ;;  %v1493_v40 = vunpack.c.l.b16 %v1202_v25 }
 0x16c   : > { %v966_v50 = vpop.permute.xlu0 %965  ;;  %v928_v51 = vpop.permute.xlu2 %927  ;;  %1527 = vmatpush.bf16.xpose.msrb.mxu2 %v1521_v47  ;;  %v1155_v59 = vld [vmem:[#allocation3 + $0x48] sm:$0xff]  ;;  %v1561_v47 = vunpack.c.0.s8 %v3837_v34 }
 0x16d   : > { %990 = vst.msk [vmem:[#allocation3 + $0x80] sm:$0xff] %vm808_vm1, %v966_v50  ;;  %v1454_v36 = vsel %vm808_vm1, %v1437_v46, 0  ;;  %v1032_v55 = vpop.permute.xlu1 %1031  ;;  %v1187_v6 = vpack.c.bf16 %v1155_v59, %v1155_v59  ;;  %v1494_v46 = vunpack.c.l.b16 %v1203_v29 }
 0x16e   : > { %946 = vst.msk [vmem:[#allocation4 + $0x70] sm:$0xff] %vm808_vm1, %v928_v51  ;;  %1394 = vmatpush.bf16.xpose.msra.mxu3 %v1384_v54  ;;  %1460 = vmatpush.bf16.xpose.msrb.mxu0 %v1454_v36  ;;  %v1165_v60 = vld [vmem:[#allocation3 + $0x98] sm:$0xff]  ;;  %v1345_v36 = vunpack.c.l.b16 %v1134_v38  ;;  %v1565_v59 = vpack.c.b16 %v1561_v47, %v1561_v47 }
 0x16f   : > { %1044 = vst.msk [vmem:[#allocation2 + $0x60] sm:$0xff] %vm808_vm1, %v1032_v55  ;;  %v1197_v7 = vpack.c.bf16 %v1165_v60, %v1165_v60  ;;  %v1360_v41 = vunpack.c.l.b16 %v1187_v6  ;;  %v1501_v57 = vpack.c.b16 %v1494_v46, %v1493_v40  ;;  %v1562_v6 = vunpack.c.1.s8 %v3837_v34 }
 0x170   : > { %v1566_v11 = vpack.c.b8 %v1565_v59, %v1565_v59 }
 0x171   : > { %v1429_v19 = vunpack.c.l.b16 %v1197_v7  ;;  %v1367_v30 = vpack.c.b16 %v1360_v41, %v1359_v21  ;;  %v1512_v2 = vsel %vm808_vm1, %v1501_v57, 0  ;;  %v1567_v16 = vpack.c.b16 %v1562_v6, %v1562_v6 }
 0x172   : > { %vm1573_vm3 = vnez %v1566_v11 }
 0x173   : > { %v1435_v31 = vpack.c.b16 %v1429_v19, %v1428_v22  ;;  %v1378_v48 = vsel %vm808_vm1, %v1367_v30, 0  ;;  %v1136_v19 = vpack.c.bf16 %v1120_v15, %v1120_v15  ;;  %v1577_v23 = vsel %vm1573_vm3, 16843009, %v3365_v33 }
 0x174   : > { %v868_v13 = vpop.permute.xlu0 %867  ;;  %v1090_v14 = vpop.permute.xlu2 %1089  ;;  %1528 = vmatpush.bf16.xpose.msrb.mxu2 %v1518_v8  ;;  %v1162_v35 = vld [vmem:[#allocation3 + $0x80] sm:$0xff]  ;;  %v1568_v25 = vpack.c.b8 %v1567_v16, %v1567_v16  ;;  %v1563_v30 = vunpack.c.2.s8 %v3837_v34  ;;  %v1581_v40 = vunpack.c.0.s8 %v1577_v23  ;;  %v1571_v34 = vpack.c.b16 %v1564_v58, %v1564_v58 }
 0x175   : > { %879 = vst.msk [vmem:[#allocation2 + $0x28] sm:$0xff] %vm808_vm1, %v868_v13  ;;  %v968_v18 = vpop.permute.xlu1 %967  ;;  %v1448_v49 = vsel %vm808_vm1, %v1435_v31, 0  ;;  %v1194_v52 = vpack.c.bf16 %v1162_v35, %v1162_v35 }
 0x176   : > { %1110 = vst.msk [vmem:[#allocation4 + $0xe0] sm:$0xff] %vm808_vm1, %v1090_v14  ;;  %1395 = vmatpush.bf16.xpose.msra.mxu3 %v1381_v17  ;;  %1461 = vmatpush.bf16.xpose.msrb.mxu0 %v1451_v45  ;;  %v1126_v54 = vld [vmem:[#allocation2 + $0x60] sm:$0xff]  ;;  %v1480_v14 = vunpack.c.l.b16 %v1143_v3  ;;  %v1413_v45 = vunpack.c.l.b16 %v1139_v9  ;;  %vm1574_vm4 = vnez %v1568_v25  ;;  %v1569_v47 = vpack.c.b16 %v1563_v30, %v1563_v30 }
 0x177   : > { %991 = vst.msk [vmem:[#allocation3 + $0x88] sm:$0xff] %vm808_vm1, %v968_v18  ;;  %v1426_v61 = vunpack.c.l.b16 %v1194_v52  ;;  %v1142_v63 = vpack.c.bf16 %v1126_v54, %v1126_v54  ;;  %vm3860_vm5 = vcmp.ne.s32.totalorder %v1581_v40, 0  ;;  %v1578_v54 = vsel %vm1574_vm4, 16843009, %v3365_v33 }
 0x178   : > { %v1570_v57 = vpack.c.b8 %v1569_v47, %v1569_v47  ;;  %v1572_v11 = vpack.c.b8 %v1571_v34, %v1571_v34 }
 0x179   : > { %v1479_v10 = vunpack.c.l.b16 %v1142_v63  ;;  %v1582_v63 = vunpack.c.0.s8 %v1578_v54 }
 0x17a   : > { %vm1575_vm7 = vnez %v1570_v57  ;;  %vm1576_vm9 = vnez %v1572_v11 }
 0x17b   : > { %v1483_v18 = vpack.c.b16 %v1480_v14, %v1479_v10  ;;  %vm3877_vm8 = vcmp.ne.s32.totalorder %v1582_v63, 0  ;;  %v1579_v9 = vsel %vm1575_vm7, 16843009, %v3365_v33 }
 0x17c   : > { %v1036_v42 = vpop.permute.xlu0 %1035  ;;  %v1092_v43 = vpop.permute.xlu2 %1091  ;;  %1529 = vmatpush.bf16.xpose.msrb.mxu2 %v1515_v37  ;;  %v1119_v44 = vld [vmem:[#allocation2 + $0x28] sm:$0xff]  ;;  %v1347_v37 = vunpack.c.l.b16 %v1136_v19  ;;  %v1583_v14 = vunpack.c.0.s8 %v1579_v9 }
 0x17d   : > { %1046 = vst.msk [vmem:[#allocation2 + $0x70] sm:$0xff] %vm808_vm1, %v1036_v42  ;;  %v949_v50 = vpop.permute.xlu1 %948  ;;  %v1135_v51 = vpack.c.bf16 %v1119_v44, %v1119_v44  ;;  %v1238_v40 = vld [vmem:[#allocation4 + $0xe0] sm:$0xff] }
 0x17e   : > { %1111 = vst.msk [vmem:[#allocation4 + $0xe8] sm:$0xff] %vm808_vm1, %v1092_v43  ;;  %1396 = vmatpush.bf16.xpose.msra.mxu3 %v1378_v48  ;;  %1462 = vmatpush.bf16.xpose.msrb.mxu0 %v1448_v49  ;;  %v1163_v53 = vld [vmem:[#allocation3 + $0x88] sm:$0xff]  ;;  %v1125_v43 = vld [vmem:[#allocation2 + $0x58] sm:$0xff]  ;;  %vm3892_vm10 = vcmp.ne.s32.totalorder %v1583_v14, 0 }
 0x17f   : > { %961 = vst.msk [vmem:[#allocation2 + $0x40] sm:$0xff] %vm808_vm1, %v949_v50  ;;  %v1346_v55 = vunpack.c.l.b16 %v1135_v51  ;;  %v1195_v56 = vpack.c.bf16 %v1163_v53, %v1163_v53  ;;  %v1141_v53 = vpack.c.bf16 %v1125_v43, %v1125_v43 }
 0x181   : > { %v1349_v60 = vpack.c.b16 %v1346_v55, %v1345_v36  ;;  %v1427_v62 = vunpack.c.l.b16 %v1195_v56  ;;  %v1415_v0 = vunpack.c.l.b16 %v1141_v53 }
 0x183   : > { %v1434_v1 = vpack.c.b16 %v1427_v62, %v1426_v61 }
 0x184   : > { %v872_v4 = vpop.permute.xlu0 %871  ;;  %v1007_v5 = vpop.permute.xlu2 %1006  ;;  %1530 = vmatpush.bf16.xpose.msrb.mxu2 %v1512_v2  ;;  %v1128_v31 = vld [vmem:[#allocation2 + $0x70] sm:$0xff] }
 0x185   : > { %3010 = vmatmul.msk.bf16.vlgmr.msra.gmra.mxu3 %vm808_vm1, %v1349_v60  ;;  %881 = vst.msk [vmem:[#allocation2 + $0x38] sm:$0xff] %vm808_vm1, %v872_v4  ;;  %v1445_v7 = vsel %vm808_vm1, %v1434_v1, 0  ;;  %v1038_v8 = vpop.permute.xlu1 %1037  ;;  %v1144_v44 = vpack.c.bf16 %v1128_v31, %v1128_v31 }
 0x186   : > { %1027 = vst.msk [vmem:[#allocation4 + $0xa0] sm:$0xff] %vm808_vm1, %v1007_v5  ;;  %1463 = vmatpush.bf16.xpose.msrb.mxu0 %v1445_v7  ;;  %v1122_v12 = vld [vmem:[#allocation2 + $0x40] sm:$0xff] }
 0x187   : > { %1047 = vst.msk [vmem:[#allocation2 + $0x78] sm:$0xff] %vm808_vm1, %v1038_v8  ;;  %v1138_v13 = vpack.c.bf16 %v1122_v12, %v1122_v12  ;;  %v1481_v55 = vunpack.c.l.b16 %v1144_v44 }
 0x189   : > { %v1412_v17 = vunpack.c.l.b16 %v1138_v13 }
 0x18b   : > { %v1416_v41 = vpack.c.b16 %v1413_v45, %v1412_v17  ;;  %3014 = vmatmul.msk.bf16.vlgmr.msrb.gmra.mxu2 %vm808_vm1, %v1483_v18 }
 0x18c   : > { %v1011_v20 = vpop.permute.xlu0 %1010  ;;  %v922_v21 = vpop.permute.xlu2 %921  ;;  %v1121_v22 = vld [vmem:[#allocation2 + $0x38] sm:$0xff] }
 0x18d   : > { %3012 = vmatmul.msk.bf16.vlgmr.msrb.gmra.mxu0 %vm808_vm1, %v1416_v41  ;;  %1029 = vst.msk [vmem:[#allocation4 + $0xb0] sm:$0xff] %vm808_vm1, %v1011_v20  ;;  %v953_v27 = vpop.permute.xlu1 %952  ;;  %v1137_v29 = vpack.c.bf16 %v1121_v22, %v1121_v22  ;;  %v1580_v41 = vsel %vm1576_vm9, 16843009, %v3365_v33 }
 0x18e   : > { %943 = vst.msk [vmem:[#allocation4 + $0x58] sm:$0xff] %vm808_vm1, %v922_v21  ;;  %v1129_v35 = vld [vmem:[#allocation2 + $0x78] sm:$0xff]  ;;  %v1584_v22 = vunpack.c.0.s8 %v1580_v41 }
 0x18f   : > { %963 = vst.msk [vmem:[#allocation2 + $0x50] sm:$0xff] %vm808_vm1, %v953_v27  ;;  %v1348_v38 = vunpack.c.l.b16 %v1137_v29  ;;  %v1145_v46 = vpack.c.bf16 %v1129_v35, %v1129_v35  ;;  %v1239_v27 = vld [vmem:[#allocation4 + $0xe8] sm:$0xff] }
 0x190   : > { %vm3906_vm11 = vcmp.ne.s32.totalorder %v1584_v22, 0  ;;  %v1271_v44 = vpack.c.bf16 %v1239_v27, %v1239_v27 }
 0x191   : > { %v1350_v42 = vpack.c.b16 %v1348_v38, %v1347_v37  ;;  %v1482_v56 = vunpack.c.l.b16 %v1145_v46 }
 0x192   : > { %v2246_v53 = vunpack.c.l.b16 %v1271_v44 }
 0x193   : > { %v1331_v48 = vpop.f32.mrf.mxu2  ;;  %v1484_v2 = vpack.c.b16 %v1482_v56, %v1481_v55 }
 0x194   : > { %v1542_v50 = vmul.f32 0.35355338, %v1331_v48  ;;  %v1088_v51 = vpop.permute.xlu0 %1087  ;;  %v1084_v52 = vpop.permute.xlu2 %1083 }
 0x195   : > { %3011 = vmatmul.msk.bf16.gmra.mxu3 %vm808_vm1, %v1350_v42  ;;  %1109 = vst.msk [vmem:[#allocation4 + $0xd8] sm:$0xff] %vm808_vm1, %v1088_v51  ;;  %v1094_v36 = vpop.permute.xlu1 %1093  ;;  %v1232_v51 = vld [vmem:[#allocation4 + $0xb0] sm:$0xff] }
 0x196   : > { %1107 = vst.msk [vmem:[#allocation4 + $0xc8] sm:$0xff] %vm808_vm1, %v1084_v52  ;;  %v3871_v59 = vsel %vm3860_vm5, %v1542_v50, -1e+09  ;;  %v1124_v60 = vld [vmem:[#allocation2 + $0x50] sm:$0xff]  ;;  %v1270_v50 = vpack.c.bf16 %v1238_v40, %v1238_v40  ;;  %v1264_v58 = vpack.c.bf16 %v1232_v51, %v1232_v51 }
 0x197   : > { %1112 = vst.msk [vmem:[#allocation4 + $0xf0] sm:$0xff] %vm808_vm1, %v1094_v36  ;;  %v1614_v61 = vsel %vm1613_vm6, %v3871_v59, -inf  ;;  %v1140_v62 = vpack.c.bf16 %v1124_v60, %v1124_v60 }
 0x198   : > { %1615 = vmax.xlane.f32.xlu2 %v1614_v61  ;;  %v2245_v57 = vunpack.c.l.b16 %v1270_v50 }
 0x199   : > { %v1414_v1 = vunpack.c.l.b16 %v1140_v62 }
 0x19b   : > { %v1333_v3 = vpop.f32.mrf.mxu2  ;;  %v1417_v4 = vpack.c.b16 %v1415_v0, %v1414_v1  ;;  %3015 = vmatmul.msk.bf16.gmra.mxu2 %vm808_vm1, %v1484_v2  ;;  %v1230_v0 = vld [vmem:[#allocation4 + $0xa0] sm:$0xff]  ;;  %v2251_v1 = vpack.c.b16 %v2246_v53, %v2245_v57 }
 0x19c   : > { %v1543_v6 = vmul.f32 0.35355338, %v1333_v3  ;;  %v1009_v7 = vpop.permute.xlu0 %1008  ;;  %v916_v8 = vpop.permute.xlu2 %915  ;;  %v1237_v54 = vld [vmem:[#allocation4 + $0xd8] sm:$0xff] }
 0x19d   : > { %3013 = vmatmul.msk.bf16.gmra.mxu0 %vm808_vm1, %v1417_v4  ;;  %1028 = vst.msk [vmem:[#allocation4 + $0xa8] sm:$0xff] %vm808_vm1, %v1009_v7  ;;  %v924_v10 = vpop.permute.xlu1 %923  ;;  %v1269_v63 = vpack.c.bf16 %v1237_v54, %v1237_v54  ;;  %v1235_v4 = vld [vmem:[#allocation4 + $0xc8] sm:$0xff] }
 0x19e   : > { %940 = vst.msk [vmem:[#allocation4 + $0x40] sm:$0xff] %vm808_vm1, %v916_v8  ;;  %v3887_v12 = vsel %vm3877_vm8, %v1543_v6, -1e+09  ;;  %v1240_v23 = vld [vmem:[#allocation4 + $0xf0] sm:$0xff]  ;;  %v2188_v8 = vunpack.c.l.b16 %v1264_v58  ;;  %v1267_v14 = vpack.c.bf16 %v1235_v4, %v1235_v4 }
 0x19f   : > { %944 = vst.msk [vmem:[#allocation4 + $0x60] sm:$0xff] %vm808_vm1, %v924_v10  ;;  %v1617_v13 = vsel %vm1613_vm6, %v3887_v12, -inf  ;;  %v1272_v35 = vpack.c.bf16 %v1240_v23, %v1240_v23  ;;  %v1262_v10 = vpack.c.bf16 %v1230_v0, %v1230_v0 }
 0x1a0   : > { %1618 = vmax.xlane.f32.xlu0 %v1617_v13  ;;  %v2244_v13 = vunpack.c.l.b16 %v1269_v63  ;;  %v2242_v23 = vunpack.c.l.b16 %v1267_v14 }
 0x1a1   : > { %v2247_v47 = vunpack.c.l.b16 %v1272_v35 }
 0x1a3   : > { %v1336_v15 = vpop.f32.mrf.mxu2 }
 0x1a4   : > { %v1544_v17 = vmul.f32 0.35355338, %v1336_v15  ;;  %v920_v45 = vpop.permute.xlu0 %919  ;;  %v1096_v18 = vpop.permute.xlu2 %1095  ;;  %v1231_v36 = vld [vmem:[#allocation4 + $0xa8] sm:$0xff] }
 0x1a5   : > { %942 = vst.msk [vmem:[#allocation4 + $0x50] sm:$0xff] %vm808_vm1, %v920_v45  ;;  %v926_v19 = vpop.permute.xlu1 %925  ;;  %v1263_v3 = vpack.c.bf16 %v1231_v36, %v1231_v36 }
 0x1a6   : > { %1113 = vst.msk [vmem:[#allocation4 + $0xf8] sm:$0xff] %vm808_vm1, %v1096_v18  ;;  %v3901_v20 = vsel %vm3892_vm10, %v1544_v17, -1e+09  ;;  %v1222_v50 = vld [vmem:[#allocation4 + $0x60] sm:$0xff] }
 0x1a7   : > { %945 = vst.msk [vmem:[#allocation4 + $0x68] sm:$0xff] %vm808_vm1, %v926_v19  ;;  %v1620_v21 = vsel %vm1613_vm6, %v3901_v20, -inf  ;;  %v2187_v17 = vunpack.c.l.b16 %v1263_v3  ;;  %v1218_v3 = vld [vmem:[#allocation4 + $0x40] sm:$0xff] }
 0x1a8   : > { %1621 = vmax.xlane.f32.xlu0 %v1620_v21  ;;  %v2186_v21 = vunpack.c.l.b16 %v1262_v10 }
 0x1aa   : > { %v2192_v27 = vpack.c.b16 %v2187_v17, %v2186_v21 }
 0x1ab   : > { %v1338_v25 = vpop.f32.mrf.mxu2 }
 0x1ac   : > { %v1545_v29 = vmul.f32 0.35355338, %v1338_v25  ;;  %v1082_v30 = vpop.permute.xlu0 %1081  ;;  %v1013_v31 = vpop.permute.xlu2 %1012  ;;  %v1220_v53 = vld [vmem:[#allocation4 + $0x50] sm:$0xff] }
 0x1ad   : > { %1106 = vst.msk [vmem:[#allocation4 + $0xc0] sm:$0xff] %vm808_vm1, %v1082_v30  ;;  %v1086_v37 = vpop.permute.xlu1 %1085  ;;  %v1241_v38 = vld [vmem:[#allocation4 + $0xf8] sm:$0xff] }
 0x1ae   : > { %1030 = vst.msk [vmem:[#allocation4 + $0xb8] sm:$0xff] %vm808_vm1, %v1013_v31  ;;  %v3914_v42 = vsel %vm3906_vm11, %v1545_v29, -1e+09  ;;  %v1273_v43 = vpack.c.bf16 %v1241_v38, %v1241_v38  ;;  %v1223_v44 = vld [vmem:[#allocation4 + $0x68] sm:$0xff] }
 0x1af   : > { %1108 = vst.msk [vmem:[#allocation4 + $0xd0] sm:$0xff] %vm808_vm1, %v1086_v37  ;;  %v1623_v46 = vsel %vm1613_vm6, %v3914_v42, -inf }
 0x1b0   : > { %1624 = vmax.xlane.f32.xlu0 %v1623_v46  ;;  %v2248_v48 = vunpack.c.l.b16 %v1273_v43  ;;  %v1224_v43 = vld [vmem:[#allocation4 + $0x70] sm:$0xff] }
 0x1b1   : > { %v1256_v46 = vpack.c.bf16 %v1224_v43, %v1224_v43 }
 0x1b2   : > { %v2252_v52 = vpack.c.b16 %v2248_v48, %v2247_v47 }
 0x1b3   : > { %v2129_v54 = vunpack.c.l.b16 %v1256_v46 }
 0x1b4   : > { %2267 = vmatpush.bf16.msra.mxu2 %v2252_v52  ;;  %v1003_v55 = vpop.permute.xlu0 %1002  ;;  %v999_v56 = vpop.permute.xlu2 %998  ;;  %v1234_v60 = vld [vmem:[#allocation4 + $0xc0] sm:$0xff]  ;;  %v1255_v52 = vpack.c.bf16 %v1223_v44, %v1223_v44 }
 0x1b5   : > { %1025 = vst.msk [vmem:[#allocation4 + $0x90] sm:$0xff] %vm808_vm1, %v1003_v55  ;;  %v1005_v61 = vpop.permute.xlu1 %1004  ;;  %v1233_v62 = vld [vmem:[#allocation4 + $0xb8] sm:$0xff]  ;;  %v1266_v7 = vpack.c.bf16 %v1234_v60, %v1234_v60  ;;  %v1254_v55 = vpack.c.bf16 %v1222_v50, %v1222_v50 }
 0x1b6   : > { %1023 = vst.msk [vmem:[#allocation4 + $0x80] sm:$0xff] %vm808_vm1, %v999_v56  ;;  %v1265_v2 = vpack.c.bf16 %v1233_v62, %v1233_v62  ;;  %v1236_v34 = vld [vmem:[#allocation4 + $0xd0] sm:$0xff]  ;;  %v1221_v56 = vld [vmem:[#allocation4 + $0x58] sm:$0xff]  ;;  %v2128_v60 = vunpack.c.l.b16 %v1255_v52 }
 0x1b7   : > { %1026 = vst.msk [vmem:[#allocation4 + $0x98] sm:$0xff] %vm808_vm1, %v1005_v61  ;;  %v1268_v6 = vpack.c.bf16 %v1236_v34, %v1236_v34  ;;  %v2241_v18 = vunpack.c.l.b16 %v1266_v7  ;;  %v1252_v61 = vpack.c.bf16 %v1220_v53, %v1220_v53  ;;  %v2127_v63 = vunpack.c.l.b16 %v1254_v55 }
 0x1b8   : > { %2268 = vmatpush.bf16.msra.mxu2 %v2251_v1  ;;  %v2189_v9 = vunpack.c.l.b16 %v1265_v2  ;;  %v1253_v0 = vpack.c.bf16 %v1221_v56, %v1221_v56 }
 0x1b9   : > { %v2243_v11 = vunpack.c.l.b16 %v1268_v6  ;;  %v2249_v30 = vpack.c.b16 %v2242_v23, %v2241_v18  ;;  %v2133_v4 = vpack.c.b16 %v2128_v60, %v2127_v63  ;;  %v2125_v6 = vunpack.c.l.b16 %v1252_v61 }
 0x1ba   : > { %v2193_v15 = vpack.c.b16 %v2189_v9, %v2188_v8  ;;  %v2126_v9 = vunpack.c.l.b16 %v1253_v0 }
 0x1bb   : > { %v2250_v45 = vpack.c.b16 %v2244_v13, %v2243_v11  ;;  %v1250_v13 = vpack.c.bf16 %v1218_v3, %v1218_v3 }
 0x1bc   : > { %2208 = vmatpush.bf16.msrb.mxu1 %v2193_v15  ;;  %v918_v41 = vpop.permute.xlu0 %917  ;;  %v842_v19 = vpop.permute.xlu2 %841  ;;  %v1228_v22 = vld [vmem:[#allocation4 + $0x90] sm:$0xff]  ;;  %v2132_v15 = vpack.c.b16 %v2126_v9, %v2125_v6 }
 0x1bd   : > { %2269 = vmatpush.bf16.msra.mxu2 %v2250_v45  ;;  %941 = vst.msk [vmem:[#allocation4 + $0x48] sm:$0xff] %vm808_vm1, %v918_v41  ;;  %v1260_v25 = vpack.c.bf16 %v1228_v22, %v1228_v22  ;;  %v1226_v57 = vld [vmem:[#allocation4 + $0x80] sm:$0xff]  ;;  %v2123_v18 = vunpack.c.l.b16 %v1250_v13 }
 0x1be   : > { %859 = vst.msk [vmem:[#allocation4 + $0x30] sm:$0xff] %vm808_vm1, %v842_v19  ;;  %v1229_v29 = vld [vmem:[#allocation4 + $0x98] sm:$0xff]  ;;  %v1258_v1 = vpack.c.bf16 %v1226_v57, %v1226_v57 }
 0x1bf   : > { %v1261_v31 = vpack.c.bf16 %v1229_v29, %v1229_v29  ;;  %v2184_v35 = vunpack.c.l.b16 %v1260_v25 }
 0x1c0   : > { %2209 = vmatpush.bf16.msrb.mxu1 %v2192_v27  ;;  %v2182_v10 = vunpack.c.l.b16 %v1258_v1 }
 0x1c1   : > { %2270 = vmatpush.bf16.msra.mxu2 %v2249_v30  ;;  %v2185_v37 = vunpack.c.l.b16 %v1261_v31 }
 0x1c3   : > { %v2191_v38 = vpack.c.b16 %v2185_v37, %v2184_v35 }
 0x1c4   : > { %v930_v40 = vpop.permute.xlu0 %929  ;;  %v1219_v62 = vld [vmem:[#allocation4 + $0x48] sm:$0xff] }
 0x1c5   : > { %2210 = vmatpush.bf16.msrb.mxu1 %v2191_v38  ;;  %947 = vst.msk [vmem:[#allocation4 + $0x78] sm:$0xff] %vm808_vm1, %v930_v40  ;;  %v1251_v8 = vpack.c.bf16 %v1219_v62, %v1219_v62  ;;  %v1216_v14 = vld [vmem:[#allocation4 + $0x30] sm:$0xff] }
 0x1c6   : > { %v1248_v41 = vpack.c.bf16 %v1216_v14, %v1216_v14 }
 0x1c7   : > { %v2124_v45 = vunpack.c.l.b16 %v1251_v8 }
 0x1c8   : > { %v2070_v25 = vunpack.c.l.b16 %v1248_v41 }
 0x1c9   : > { %v2131_v22 = vpack.c.b16 %v2124_v45, %v2123_v18 }
 0x1cc   : > { %v1001_v47 = vpop.permute.xlu0 %1000  ;;  %v1225_v48 = vld [vmem:[#allocation4 + $0x78] sm:$0xff] }
 0x1cd   : > { %1024 = vst.msk [vmem:[#allocation4 + $0x88] sm:$0xff] %vm808_vm1, %v1001_v47  ;;  %v1257_v51 = vpack.c.bf16 %v1225_v48, %v1225_v48 }
 0x1cf   : > { %v2130_v36 = vunpack.c.l.b16 %v1257_v51 }
 0x1d1   : > { %v2134_v58 = vpack.c.b16 %v2130_v36, %v2129_v54 }
 0x1d3   : > { %2149 = vmatpush.bf16.msra.mxu0 %v2134_v58 }
 0x1d4   : > { %v844_v2 = vpop.permute.xlu0 %843  ;;  %v1227_v34 = vld [vmem:[#allocation4 + $0x88] sm:$0xff] }
 0x1d5   : > { %860 = vst.msk [vmem:[#allocation4 + $0x38] sm:$0xff] %vm808_vm1, %v844_v2  ;;  %v1259_v7 = vpack.c.bf16 %v1227_v34, %v1227_v34 }
 0x1d7   : > { %2150 = vmatpush.bf16.msra.mxu0 %v2133_v4  ;;  %v2183_v11 = vunpack.c.l.b16 %v1259_v7 }
 0x1d9   : > { %v2190_v17 = vpack.c.b16 %v2183_v11, %v2182_v10 }
 0x1db   : > { %2151 = vmatpush.bf16.msra.mxu0 %v2132_v15  ;;  %2211 = vmatpush.bf16.msrb.mxu1 %v2190_v17 }
 0x1dc   : > { %v838_v19 = vpop.permute.xlu0 %837  ;;  %v1217_v21 = vld [vmem:[#allocation4 + $0x38] sm:$0xff] }
 0x1dd   : > { %857 = vst.msk [vmem:[#allocation4 + $0x20] sm:$0xff] %vm808_vm1, %v838_v19  ;;  %v1249_v23 = vpack.c.bf16 %v1217_v21, %v1217_v21 }
 0x1df   : > { %2152 = vmatpush.bf16.msra.mxu0 %v2131_v22  ;;  %v2071_v27 = vunpack.c.l.b16 %v1249_v23 }
 0x1e1   : > { %v2075_v29 = vpack.c.b16 %v2071_v27, %v2070_v25 }
 0x1e3   : > { %2090 = vmatpush.bf16.msrb.mxu3 %v2075_v29 }
 0x208   : > { %v1398_v30 = vpop.f32.mrf.mxu3 }
 0x209   : > { %v1546_v31 = vmul.f32 0.35355338, %v1398_v30 }
 0x20a   : > { %v1465_v35 = vpop.f32.mrf.mxu0 }
 0x20b   : > { %v1550_v37 = vmul.f32 0.35355338, %v1465_v35  ;;  %v3930_v38 = vsel %vm3860_vm5, %v1546_v31, -1e+09  ;;  %v1616_v51 = vpop.xlane.xlu2 %1615 }
 0x20c   : > { %v1626_v40 = vsel %vm1613_vm6, %v3930_v38, -inf  ;;  %v1662_v56 = vsub.f32 %v3871_v59, %v1616_v51 }
 0x20d   : > { %1627 = vmax.xlane.f32.xlu2 %v1626_v40  ;;  %v3936_v43 = vsel %vm3860_vm5, %v1550_v37, -1e+09 }
 0x20e   : > { %v1638_v44 = vsel %vm1613_vm6, %v3936_v43, -inf  ;;  %v1532_v46 = vpop.f32.mrf.mxu2  ;;  %v1678_v63 = vmul.f32 1.442695, %v1662_v56 }
 0x20f   : > { %1639 = vmax.xlane.f32.xlu0 %v1638_v44  ;;  %v1554_v47 = vmul.f32 0.35355338, %v1532_v46 }
 0x210   : > { %v1400_v48 = vpop.f32.mrf.mxu3  ;;  %3204 = vpow2.f32 %v1678_v63 }
 0x211   : > { %v1547_v50 = vmul.f32 0.35355338, %v1400_v48  ;;  %v3946_v36 = vsel %vm3860_vm5, %v1554_v47, -1e+09 }
 0x212   : > { %v1467_v52 = vpop.f32.mrf.mxu0  ;;  %v1650_v60 = vsel %vm1613_vm6, %v3946_v36, -inf }
 0x213   : > { %v1551_v53 = vmul.f32 0.35355338, %v1467_v52  ;;  %v3942_v54 = vsel %vm3877_vm8, %v1547_v50, -1e+09  ;;  %v1619_v18 = vpop.xlane.xlu0 %1618 }
 0x214   : > { %v1629_v55 = vsel %vm1613_vm6, %v3942_v54, -inf  ;;  %v1663_v23 = vsub.f32 %v3887_v12, %v1619_v18 }
 0x215   : > { %1630 = vmax.xlane.f32.xlu2 %v1629_v55  ;;  %v3953_v57 = vsel %vm3877_vm8, %v1551_v53, -1e+09 }
 0x216   : > { %v1641_v58 = vsel %vm1613_vm6, %v3953_v57, -inf  ;;  %v1534_v61 = vpop.f32.mrf.mxu2  ;;  %v3977_v9 = vpop.eup %3204  ;;  %v1680_v29 = vmul.f32 1.442695, %v1663_v23 }
 0x217   : > { %1642 = vmax.xlane.f32.xlu1 %v1641_v58  ;;  %1651 = vmax.xlane.f32.xlu0 %v1650_v60  ;;  %v1555_v49 = vmul.f32 0.35355338, %v1534_v61  ;;  %v1710_v11 = vsel %vm1613_vm6, %v3977_v9, 0.0 }
 0x218   : > { %v1403_v62 = vpop.f32.mrf.mxu3  ;;  %3206 = vpow2.f32 %v1680_v29 }
 0x219   : > { %v3961_v59 = vsel %vm3877_vm8, %v1555_v49, -1e+09  ;;  %v1548_v14 = vmul.f32 0.35355338, %v1403_v62 }
 0x21a   : > { %v1470_v0 = vpop.f32.mrf.mxu0  ;;  %v1653_v3 = vsel %vm1613_vm6, %v3961_v59, -inf }
 0x21b   : > { %v1552_v1 = vmul.f32 0.35355338, %v1470_v0  ;;  %v3995_v21 = vsel %vm3892_vm10, %v1548_v14, -1e+09  ;;  %v4010_v35 = vpop.xlane.xlu0 %1621 }
 0x21c   : > { %v1632_v25 = vsel %vm1613_vm6, %v3995_v21, -inf }
 0x21d   : > { %v3965_v2 = vsel %vm3892_vm10, %v1552_v1, -1e+09 }
 0x21e   : > { %v1644_v34 = vsel %vm1613_vm6, %v3965_v2, -inf  ;;  %v1537_v4 = vpop.f32.mrf.mxu2  ;;  %v4006_v16 = vpop.eup %3206 }
 0x21f   : > { %1645 = vmax.xlane.f32.xlu0 %v1644_v34  ;;  %1654 = vmax.xlane.f32.xlu1 %v1653_v3  ;;  %v1556_v6 = vmul.f32 0.35355338, %v1537_v4  ;;  %v1713_v12 = vsel %vm1613_vm6, %v4006_v16, 0.0 }
 0x220   : > { %v1405_v7 = vpop.f32.mrf.mxu3 }
 0x221   : > { %v3973_v5 = vsel %vm3892_vm10, %v1556_v6, -1e+09  ;;  %v1549_v10 = vmul.f32 0.35355338, %v1405_v7 }
 0x222   : > { %v1656_v8 = vsel %vm1613_vm6, %v3973_v5, -inf  ;;  %v1472_v22 = vpop.f32.mrf.mxu0 }
 0x223   : > { %1657 = vmax.xlane.f32.xlu2 %v1656_v8  ;;  %v3983_v17 = vsel %vm3906_vm11, %v1549_v10, -1e+09  ;;  %v1553_v27 = vmul.f32 0.35355338, %v1472_v22  ;;  %v4012_v37 = vpop.xlane.xlu0 %1624 }
 0x224   : > { %v1635_v41 = vsel %vm1613_vm6, %v3983_v17, -inf }
 0x225   : > { %v4002_v30 = vsel %vm3906_vm11, %v1553_v27, -1e+09 }
 0x226   : > { %v1539_v13 = vpop.f32.mrf.mxu2  ;;  %v1647_v31 = vsel %vm1613_vm6, %v4002_v30, -inf }
 0x227   : > { %1711 = vadd.xlane.f32.xlu1 %v1710_v11  ;;  %v1557_v15 = vmul.f32 0.35355338, %v1539_v13 }
 0x229   : > { %v3987_v45 = vsel %vm3906_vm11, %v1557_v15, -1e+09 }
 0x22a   : > { %v1659_v19 = vsel %vm1613_vm6, %v3987_v45, -inf }
 0x22b   : > { %1636 = vmax.xlane.f32.xlu2 %v1635_v41  ;;  %1660 = vmax.xlane.f32.xlu0 %v1659_v19 }
 0x22f   : > { %1633 = vmax.xlane.f32.xlu1 %v1632_v25 }
 0x237   : > { %1648 = vmax.xlane.f32.xlu1 %v1647_v31 }
 0x23f   : > { %1714 = vadd.xlane.f32.xlu1 %v1713_v12 }
 0x280   : > { %v1628_v40 = vpop.xlane.xlu2 %1627 }
 0x281   : > { %v1666_v61 = vsub.f32 %v3930_v38, %v1628_v40 }
 0x282   : > { %v1640_v44 = vpop.xlane.xlu0 %1639 }
 0x283   : > { %v1670_v33 = vsub.f32 %v3936_v43, %v1640_v44 }
 0x285   : > { %v1694_v46 = vmul.f32 1.442695, %v1670_v33 }
 0x287   : > { %3208 = vpow2.f32 %v1694_v46 }
 0x288   : > { %v1631_v47 = vpop.xlane.xlu2 %1630 }
 0x289   : > { %v1667_v48 = vsub.f32 %v3942_v54, %v1631_v47  ;;  %v1686_v54 = vmul.f32 1.442695, %v1666_v61 }
 0x28a   : > { %v1643_v50 = vpop.xlane.xlu1 %1642  ;;  %v1652_v51 = vpop.xlane.xlu0 %1651 }
 0x28b   : > { %v1688_v52 = vmul.f32 1.442695, %v1667_v48  ;;  %v1671_v53 = vsub.f32 %v3953_v57, %v1643_v50  ;;  %v1674_v55 = vsub.f32 %v3946_v36, %v1652_v51 }
 0x28d   : > { %v4018_v56 = vpop.eup %3208  ;;  %3210 = vpow2.f32 %v1688_v52  ;;  %v1696_v58 = vmul.f32 1.442695, %v1671_v53  ;;  %v1702_v60 = vmul.f32 1.442695, %v1674_v55 }
 0x28e   : > { %v1734_v43 = vsel %vm1613_vm6, %v4018_v56, 0.0 }
 0x28f   : > { %3212 = vpow2.f32 %v1696_v58  ;;  %1735 = vadd.xlane.f32.xlu2 %v1734_v43 }
 0x290   : > { %3214 = vpow2.f32 %v1702_v60 }
 0x291   : > { %3216 = vpow2.f32 %v1686_v54 }
 0x292   : > { %v1655_v49 = vpop.xlane.xlu1 %1654  ;;  %v1646_v57 = vpop.xlane.xlu0 %1645 }
 0x293   : > { %v4023_v62 = vpop.eup %3210  ;;  %v1675_v36 = vsub.f32 %v3961_v59, %v1655_v49  ;;  %v1672_v38 = vsub.f32 %v3965_v2, %v1646_v57 }
 0x294   : > { %v1725_v3 = vsel %vm1613_vm6, %v4023_v62, 0.0 }
 0x295   : > { %v4026_v63 = vpop.eup %3212  ;;  %v1704_v0 = vmul.f32 1.442695, %v1675_v36  ;;  %v1698_v8 = vmul.f32 1.442695, %v1672_v38 }
 0x296   : > { %v4028_v1 = vpop.eup %3214  ;;  %v1737_v34 = vsel %vm1613_vm6, %v4026_v63, 0.0  ;;  %v1658_v4 = vpop.xlane.xlu2 %1657 }
 0x297   : > { %1738 = vadd.xlane.f32.xlu1 %v1737_v34  ;;  %1726 = vadd.xlane.f32.xlu2 %v1725_v3  ;;  %v1746_v59 = vsel %vm1613_vm6, %v4028_v1, 0.0  ;;  %v1676_v6 = vsub.f32 %v3973_v5, %v1658_v4  ;;  %3218 = vpow2.f32 %v1704_v0  ;;  %v4038_v10 = vpop.eup %3216 }
 0x298   : > { %1747 = vadd.xlane.f32.xlu0 %v1746_v59  ;;  %v1722_v14 = vsel %vm1613_vm6, %v4038_v10, 0.0 }
 0x299   : > { %v1706_v7 = vmul.f32 1.442695, %v1676_v6 }
 0x29a   : > { %v1712_v2 = vpop.xlane.xlu1 %1711 }
 0x29b   : > { %3220 = vpow2.f32 %v1706_v7  ;;  %v1767_v29 = vand.u32 2147483647, %v1712_v2  ;;  %v1769_v31 = vand.u32 2147483648, %v1712_v2  ;;  %vm1763_vm13 = vweird.f32 %v1712_v2 }
 0x29c   : > { %3222 = vrcp.f32 %v1712_v2 }
 0x29d   : > { %v4040_v11 = vpop.eup %3218  ;;  %3224 = vpow2.f32 %v1698_v8  ;;  %vm1768_vm15 = vcmp.eq.f32.partialorder %v1767_v29, 8.507059e+37 }
 0x29e   : > { %v1749_v13 = vsel %vm1613_vm6, %v4040_v11, 0.0  ;;  %v1637_v6 = vpop.xlane.xlu2 %1636  ;;  %v1661_v7 = vpop.xlane.xlu0 %1660 }
 0x29f   : > { %1750 = vadd.xlane.f32.xlu1 %v1749_v13  ;;  %v1669_v8 = vsub.f32 %v3983_v17, %v1637_v6  ;;  %v1664_v17 = vsub.f32 %v3901_v20, %v4010_v35 }
 0x2a0   : > { %1723 = vadd.xlane.f32.xlu0 %v1722_v14 }
 0x2a1   : > { %v4047_v5 = vpop.eup %3220 }
 0x2a2   : > { %v3223_v15 = vpop.eup %3222  ;;  %v1634_v18 = vpop.xlane.xlu1 %1633  ;;  %v1752_v41 = vsel %vm1613_vm6, %v4047_v5, 0.0 }
 0x2a3   : > { %v1759_v19 = vmul.f32 %v3223_v15, %v1712_v2  ;;  %v1668_v22 = vsub.f32 %v3995_v21, %v1634_v18  ;;  %1753 = vadd.xlane.f32.xlu2 %v1752_v41  ;;  %v4052_v23 = vpop.eup %3224  ;;  %vm1764_vm12 = vweird.f32 %v3223_v15  ;;  %v1770_v21 = vor.u32 1.1754944e-38, %v1769_v31 }
 0x2a4   : > { %v1740_v40 = vsel %vm1613_vm6, %v4052_v23, 0.0  ;;  %vm1765_vm14 = vmor %vm1763_vm13, %vm1764_vm12  ;;  %v1692_v2 = vmul.f32 1.442695, %v1669_v8  ;;  %v1682_v41 = vmul.f32 1.442695, %v1664_v17 }
 0x2a5   : > { %v1760_v25 = vsub.f32 1.0, %v1759_v19  ;;  %v1690_v27 = vmul.f32 1.442695, %v1668_v22 }
 0x2a7   : > { %v1761_v12 = vmul.f32 %v3223_v15, %v1760_v25  ;;  %3226 = vpow2.f32 %v1690_v27 }
 0x2a8   : > { %1741 = vadd.xlane.f32.xlu0 %v1740_v40 }
 0x2a9   : > { %v1762_v44 = vadd.f32 %v3223_v15, %v1761_v12 }
 0x2aa   : > { %v1649_v33 = vpop.xlane.xlu1 %1648 }
 0x2ab   : > { %v1766_v46 = vsel %vm1765_vm14, %v3223_v15, %v1762_v44  ;;  %v1673_v47 = vsub.f32 %v4002_v30, %v1649_v33 }
 0x2ac   : > { %v1771_v48 = vsel %vm1768_vm15, %v1770_v21, %v1766_v46 }
 0x2ad   : > { %v4059_v50 = vpop.eup %3226  ;;  %v1700_v51 = vmul.f32 1.442695, %v1673_v47  ;;  %v1998_v52 = vmul.f32 %v3977_v9, %v1771_v48 }
 0x2ae   : > { %v1728_v53 = vsel %vm1613_vm6, %v4059_v50, 0.0 }
 0x2af   : > { %3228 = vpow2.f32 %v1700_v51  ;;  %1729 = vadd.xlane.f32.xlu1 %v1728_v53  ;;  %2014 = vst.msk [vmem:[%s4064_s1] sm:$0xff] %vm1613_vm6, %v1998_v52  ;;  %v2030_v3 = vpack.c.bf16 %v1998_v52, %v1998_v52 }
 0x2b1   : > { %v4079_v4 = vunpack.c.l.b16 %v2030_v3 }
 0x2b2   : > { %v1715_v55 = vpop.xlane.xlu1 %1714 }
 0x2b3   : > { %3230 = vrcp.f32 %v1715_v55  ;;  %v1784_v43 = vand.u32 2147483648, %v1715_v55  ;;  %v1782_v49 = vand.u32 2147483647, %v1715_v55  ;;  %vm1778_vm3 = vweird.f32 %v1715_v55 }
 0x2b4   : > { %3232 = vpow2.f32 %v1692_v2 }
 0x2b5   : > { %v4068_v58 = vpop.eup %3228  ;;  %v1785_v36 = vor.u32 1.1754944e-38, %v1784_v43  ;;  %vm1783_vm5 = vcmp.eq.f32.partialorder %v1782_v49, 8.507059e+37 }
 0x2b6   : > { %v1743_v30 = vsel %vm1613_vm6, %v4068_v58, 0.0 }
 0x2b7   : > { %1744 = vadd.xlane.f32.xlu1 %v1743_v30 }
 0x2b9   : > { %v3231_v60 = vpop.eup %3230 }
 0x2ba   : > { %v1774_v9 = vmul.f32 %v3231_v60, %v1715_v55  ;;  %vm1779_vm2 = vweird.f32 %v3231_v60  ;;  %v4089_v14 = vpop.eup %3232 }
 0x2bb   : > { %833 = vrot.lane.b32.xlu2 %v3614_v28, %s3364_s18  ;;  %vm1780_vm4 = vmor %vm1778_vm3, %vm1779_vm2  ;;  %v1731_v18 = vsel %vm1613_vm6, %v4089_v14, 0.0 }
 0x2bc   : > { %v1775_v61 = vsub.f32 1.0, %v1774_v9  ;;  %835 = vrot.lane.b32.xlu0 %v3627_v32, %s3364_s18 }
 0x2be   : > { %v1776_v54 = vmul.f32 %v3231_v60, %v1775_v61 }
 0x2c0   : > { %v1777_v57 = vadd.f32 %v3231_v60, %v1776_v54 }
 0x2c2   : > { %v1781_v0 = vsel %vm1780_vm4, %v3231_v60, %v1777_v57 }
 0x2c3   : > { %v1786_v38 = vsel %vm1783_vm5, %v1785_v36, %v1781_v0 }
 0x2c4   : > { %v1999_v34 = vmul.f32 %v4006_v16, %v1786_v38  ;;  %v1677_v16 = vsub.f32 %v3987_v45, %v1661_v7  ;;  %v1665_v45 = vsub.f32 %v3914_v42, %v4012_v37 }
 0x2c6   : > { %2015 = vst.msk [vmem:[%s4064_s1 + $0x8] sm:$0xff] %vm1613_vm6, %v1999_v34  ;;  %v2031_v28 = vpack.c.bf16 %v1999_v34, %v1999_v34  ;;  %v1708_v13 = vmul.f32 1.442695, %v1677_v16  ;;  %v1684_v22 = vmul.f32 1.442695, %v1665_v45 }
 0x2c8   : > { %v4081_v32 = vunpack.c.l.b16 %v2031_v28  ;;  %3234 = vpow2.f32 %v1708_v13 }
 0x2ca   : > { %v2054_v59 = vpack.c.b16 %v4081_v32, %v4079_v4 }
 0x2ce   : > { %v4091_v15 = vpop.eup %3234 }
 0x2d0   : > { %839 = vrot.lane.b32.xlu1 %v3651_v39, %s3364_s18  ;;  %v1755_v39 = vsel %vm1613_vm6, %v4091_v15, 0.0 }
 0x2e4   : > { %1732 = vadd.xlane.f32.xlu2 %v1731_v18 }
 0x2e6   : > { %1756 = vadd.xlane.f32.xlu0 %v1755_v39 }
 0x2fa   : > { %831 = vrot.lane.b32.xlu0 %v3608_v26, %s3364_s18 }
 0x2fc   : > { %829 = vrot.lane.b32.xlu2 %v3602_v24, %s3364_s18  ;;  %s3366_s18 = smov 16  }
 0x302   : > { %v1736_v19 = vpop.xlane.xlu2 %1735 }
 0x303   : > { %3236 = vrcp.f32 %v1736_v19  ;;  %v1887_v35 = vand.u32 2147483647, %v1736_v19  ;;  %v1889_v37 = vand.u32 2147483648, %v1736_v19  ;;  %vm1883_vm7 = vweird.f32 %v1736_v19 }
 0x304   : > { %3238 = vpow2.f32 %v1682_v41 }
 0x305   : > { %3240 = vpow2.f32 %v1684_v22  ;;  %vm4126_vm8 = vcmp.eq.f32.partialorder %v1887_v35, 8.507059e+37  ;;  %v1890_v52 = vor.u32 1.1754944e-38, %v1889_v37 }
 0x309   : > { %v4105_v25 = vpop.eup %3236 }
 0x30a   : > { %v1879_v27 = vmul.f32 %v4105_v25, %v1736_v19  ;;  %v1739_v26 = vpop.xlane.xlu1 %1738  ;;  %v1727_v29 = vpop.xlane.xlu2 %1726  ;;  %vm1884_vm9 = vweird.f32 %v4105_v25 }
 0x30b   : > { %3242 = vrcp.f32 %v1739_v26  ;;  %v4108_v24 = vpop.xlane.xlu0 %1747  ;;  %v4110_v31 = vpop.eup %3238  ;;  %v1904_v40 = vand.u32 2147483648, %v1739_v26  ;;  %v1902_v47 = vand.u32 2147483647, %v1739_v26  ;;  %v1842_v48 = vand.u32 2147483647, %v1727_v29  ;;  %vm4152_vm14 = vmor %vm1883_vm7, %vm1884_vm9 }
 0x30c   : > { %v1880_v20 = vsub.f32 1.0, %v1879_v27  ;;  %3244 = vrcp.f32 %v1727_v29  ;;  %v4112_v42 = vpop.eup %3240  ;;  %v4122_v21 = vsel %vm1613_vm6, %v4110_v31, 0.0  ;;  %vm1898_vm10 = vweird.f32 %v1739_v26 }
 0x30d   : > { %3246 = vrcp.f32 %v4108_v24  ;;  %v4118_v44 = vsel %vm1613_vm6, %v4112_v42, 0.0  ;;  %v1905_v60 = vor.u32 1.1754944e-38, %v1904_v40  ;;  %vm1838_vm11 = vweird.f32 %v1727_v29 }
 0x30e   : > { %v1881_v12 = vmul.f32 %v4105_v25, %v1880_v20  ;;  %v1844_v49 = vand.u32 2147483648, %v1727_v29  ;;  %vm4139_vm12 = vcmp.eq.f32.partialorder %v1902_v47, 8.507059e+37  ;;  %vm4143_vm13 = vcmp.eq.f32.partialorder %v1842_v48, 8.507059e+37 }
 0x30f   : > { %v1947_v34 = vand.u32 2147483647, %v4108_v24  ;;  %v1949_v3 = vand.u32 2147483648, %v4108_v24  ;;  %vm1943_vm3 = vweird.f32 %v4108_v24 }
 0x310   : > { %v1882_v30 = vadd.f32 %v4105_v25, %v1881_v12  ;;  %v1845_v45 = vor.u32 1.1754944e-38, %v1844_v49 }
 0x311   : > { %v4124_v33 = vpop.eup %3242  ;;  %vm4172_vm7 = vcmp.eq.f32.partialorder %v1947_v34, 8.507059e+37  ;;  %v1950_v19 = vor.u32 1.1754944e-38, %v1949_v3 }
 0x312   : > { %v3245_v51 = vpop.eup %3244  ;;  %v1894_v53 = vmul.f32 %v4124_v33, %v1739_v26  ;;  %v4133_v61 = vpop.xlane.xlu1 %1750  ;;  %vm1899_vm15 = vweird.f32 %v4124_v33  ;;  %v1886_v16 = vsel %vm4152_vm14, %v4105_v25, %v1882_v30 }
 0x313   : > { %v3247_v55 = vpop.eup %3246  ;;  %v1834_v9 = vmul.f32 %v3245_v51, %v1727_v29  ;;  %v4135_v43 = vpop.xlane.xlu0 %1723  ;;  %3248 = vrcp.f32 %v4133_v61  ;;  %vm1839_vm2 = vweird.f32 %v3245_v51  ;;  %vm4168_vm5 = vmor %vm1898_vm10, %vm1899_vm15  ;;  %v1891_v25 = vsel %vm4126_vm8, %v1890_v52, %v1886_v16 }
 0x314   : > { %v1895_v54 = vsub.f32 1.0, %v1894_v53  ;;  %v1939_v57 = vmul.f32 %v3247_v55, %v4108_v24  ;;  %3250 = vrcp.f32 %v4135_v43  ;;  %vm1944_vm4 = vweird.f32 %v3247_v55  ;;  %vm1840_vm9 = vmor %vm1838_vm11, %vm1839_vm2 }
 0x315   : > { %v1835_v0 = vsub.f32 1.0, %v1834_v9  ;;  %vm1958_vm14 = vweird.f32 %v4133_v61  ;;  %v1962_v26 = vand.u32 2147483647, %v4133_v61  ;;  %vm1945_vm10 = vmor %vm1943_vm3, %vm1944_vm4  ;;  %v1964_v12 = vand.u32 2147483648, %v4133_v61 }
 0x316   : > { %v1896_v6 = vmul.f32 %v4124_v33, %v1895_v54  ;;  %v1940_v7 = vsub.f32 1.0, %v1939_v57  ;;  %v4159_v8 = vpop.xlane.xlu2 %1753  ;;  %vm1823_vm8 = vweird.f32 %v4135_v43  ;;  %v1829_v9 = vand.u32 2147483648, %v4135_v43 }
 0x317   : > { %v1836_v2 = vmul.f32 %v3245_v51, %v1835_v0  ;;  %3252 = vrcp.f32 %v4159_v8  ;;  %v1979_v36 = vand.u32 2147483648, %v4159_v8  ;;  %v2006_v3 = vmul.f32 %v4018_v56, %v1891_v25 }
 0x318   : > { %v1897_v13 = vadd.f32 %v4124_v33, %v1896_v6  ;;  %v1941_v18 = vmul.f32 %v3247_v55, %v1940_v7  ;;  %vm1973_vm3 = vweird.f32 %v4159_v8  ;;  %v1977_v6 = vand.u32 2147483647, %v4159_v8 }
 0x319   : > { %v1837_v17 = vadd.f32 %v3245_v51, %v1836_v2  ;;  %v3249_v22 = vpop.eup %3248  ;;  %2022 = vst.msk [vmem:[%s4064_s1 + $0x40] sm:$0xff] %vm1613_vm6, %v2006_v3 }
 0x31a   : > { %v1942_v27 = vadd.f32 %v3247_v55, %v1941_v18  ;;  %v1901_v20 = vsel %vm4168_vm5, %v4124_v33, %v1897_v13  ;;  %v1954_v37 = vmul.f32 %v3249_v22, %v4133_v61  ;;  %v3251_v40 = vpop.eup %3250  ;;  %v1827_v33 = vand.u32 2147483647, %v4135_v43 }
 0x31b   : > { %v1841_v35 = vsel %vm1840_vm9, %v3245_v51, %v1837_v17  ;;  %v4189_v29 = vpop.xlane.xlu0 %1741  ;;  %v1819_v52 = vmul.f32 %v3251_v40, %v4135_v43  ;;  %v1906_v30 = vsel %vm4139_vm12, %v1905_v60, %v1901_v20  ;;  %vm1959_vm11 = vweird.f32 %v3249_v22 }
 0x31c   : > { %v1846_v46 = vsel %vm4143_vm13, %v1845_v45, %v1841_v35  ;;  %v1946_v47 = vsel %vm1945_vm10, %v3247_v55, %v1942_v27  ;;  %v1955_v51 = vsub.f32 1.0, %v1954_v37  ;;  %3254 = vrcp.f32 %v4189_v29  ;;  %vm1960_vm15 = vmor %vm1958_vm14, %vm1959_vm11 }
 0x31d   : > { %v4196_v24 = vmul.f32 %v4023_v62, %v1846_v46  ;;  %v1951_v48 = vsel %vm4172_vm7, %v1950_v19, %v1946_v47  ;;  %v4201_v53 = vpop.eup %3252  ;;  %v1820_v49 = vsub.f32 1.0, %v1819_v52  ;;  %vm4218_vm12 = vcmp.eq.f32.partialorder %v1962_v26, 8.507059e+37 }
 0x31e   : > { %v4206_v55 = vmul.f32 %v4028_v1, %v1951_v48  ;;  %v834_v62 = vpop.permute.xlu2 %833  ;;  %v1956_v54 = vmul.f32 %v3249_v22, %v1955_v51  ;;  %v1969_v57 = vmul.f32 %v4201_v53, %v4159_v8  ;;  %v1965_v60 = vor.u32 1.1754944e-38, %v1964_v12 }
 0x31f   : > { %2019 = vst.msk [vmem:[%s4064_s1 + $0x28] sm:$0xff] %vm1613_vm6, %v4196_v24  ;;  %vm1824_vm13 = vweird.f32 %v3251_v40  ;;  %v1821_v38 = vmul.f32 %v3251_v40, %v1820_v49  ;;  %vm4227_vm2 = vcmp.eq.f32.partialorder %v1827_v33, 8.507059e+37  ;;  %v2007_v16 = vmul.f32 %v4026_v63, %v1906_v30 }
 0x320   : > { %2026 = vst.msk [vmem:[%s4064_s1 + $0x60] sm:$0xff] %vm1613_vm6, %v4206_v55  ;;  %v1957_v0 = vadd.f32 %v3249_v22, %v1956_v54  ;;  %v1970_v34 = vsub.f32 1.0, %v1969_v57  ;;  %v1830_v18 = vor.u32 1.1754944e-38, %v1829_v9  ;;  %vm1825_vm4 = vmor %vm1823_vm8, %vm1824_vm13  ;;  %v1980_v17 = vor.u32 1.1754944e-38, %v1979_v36 }
 0x321   : > { %855 = vst.msk [vmem:[#allocation4 + $0x10] sm:$0xff] %vm808_vm1, %v834_v62  ;;  %v1822_v13 = vadd.f32 %v3251_v40, %v1821_v38  ;;  %v1917_v63 = vand.u32 2147483647, %v4189_v29  ;;  %vm1913_vm5 = vweird.f32 %v4189_v29  ;;  %v2035_v43 = vpack.c.bf16 %v4196_v24, %v4196_v24 }
 0x322   : > { %v4233_v7 = vpop.xlane.xlu1 %1729  ;;  %v1961_v2 = vsel %vm1960_vm15, %v3249_v22, %v1957_v0  ;;  %v3255_v56 = vpop.eup %3254  ;;  %v1971_v39 = vmul.f32 %v4201_v53, %v1970_v34  ;;  %2023 = vst.msk [vmem:[%s4064_s1 + $0x48] sm:$0xff] %vm1613_vm6, %v2007_v16  ;;  %v2042_v22 = vpack.c.bf16 %v4206_v55, %v4206_v55  ;;  %vm4259_vm7 = vcmp.eq.f32.partialorder %v1977_v6, 8.507059e+37 }
 0x323   : > { %3256 = vrcp.f32 %v4233_v7  ;;  %v1966_v61 = vsel %vm4218_vm12, %v1965_v60, %v1961_v2  ;;  %v1826_v41 = vsel %vm1825_vm4, %v3251_v40, %v1822_v13  ;;  %v1909_v19 = vmul.f32 %v3255_v56, %v4189_v29 }
 0x324   : > { %1720 = vadd.xlane.f32.xlu0 %v4118_v44  ;;  %v2011_v45 = vmul.f32 %v4040_v11, %v1966_v61  ;;  %v1831_v44 = vsel %vm4227_vm2, %v1830_v18, %v1826_v41  ;;  %v1919_v11 = vand.u32 2147483648, %v4189_v29  ;;  %v2038_v20 = vpack.c.bf16 %v2006_v3, %v2006_v3 }
 0x325   : > { %1717 = vadd.xlane.f32.xlu2 %v4122_v21  ;;  %v2002_v21 = vmul.f32 %v4038_v10, %v1831_v44  ;;  %v1910_v26 = vsub.f32 1.0, %v1909_v19  ;;  %v1972_v35 = vadd.f32 %v4201_v53, %v1971_v39  ;;  %vm1974_vm9 = vweird.f32 %v4201_v53 }
 0x326   : > { %2027 = vst.msk [vmem:[%s4064_s1 + $0x68] sm:$0xff] %vm1613_vm6, %v2011_v45  ;;  %v2043_v27 = vpack.c.bf16 %v2011_v45, %v2011_v45  ;;  %vm4269_vm14 = vcmp.eq.f32.partialorder %v1917_v63, 8.507059e+37  ;;  %v2039_v12 = vpack.c.bf16 %v2007_v16, %v2007_v16  ;;  %vm1914_vm10 = vweird.f32 %v3255_v56  ;;  %vm4278_vm8 = vmor %vm1973_vm3, %vm1974_vm9 }
 0x327   : > { %2018 = vst.msk [vmem:[%s4064_s1 + $0x20] sm:$0xff] %vm1613_vm6, %v2002_v21  ;;  %v2034_v46 = vpack.c.bf16 %v2002_v21, %v2002_v21  ;;  %v1911_v47 = vmul.f32 %v3255_v56, %v1910_v26  ;;  %v1920_v24 = vor.u32 1.1754944e-38, %v1919_v11  ;;  %v2168_v48 = vunpack.c.l.b16 %v2038_v20  ;;  %vm1915_vm11 = vmor %vm1913_vm5, %vm1914_vm10  ;;  %v1214_v21 = vld [vmem:[#allocation4 + $0x20] sm:$0xff] }
 0x328   : > { %v2228_v33 = vunpack.c.l.b16 %v2043_v27  ;;  %v2169_v51 = vunpack.c.l.b16 %v2039_v12  ;;  %v2110_v9 = vunpack.c.l.b16 %v2035_v43  ;;  %v2227_v62 = vunpack.c.l.b16 %v2042_v22  ;;  %v1212_v37 = vld [vmem:[#allocation4 + $0x10] sm:$0xff] }
 0x329   : > { %v3257_v40 = vpop.eup %3256  ;;  %v1912_v55 = vadd.f32 %v3255_v56, %v1911_v47  ;;  %v2109_v57 = vunpack.c.l.b16 %v2034_v46  ;;  %v1976_v1 = vsel %vm4278_vm8, %v4201_v53, %v1972_v35  ;;  %v1857_v8 = vand.u32 2147483647, %v4233_v7 }
 0x32a   : > { %v1849_v10 = vmul.f32 %v3257_v40, %v4233_v7  ;;  %v1745_v52 = vpop.xlane.xlu1 %1744  ;;  %v2172_v49 = vpack.c.b16 %v2169_v51, %v2168_v48  ;;  %v1859_v60 = vand.u32 2147483648, %v4233_v7  ;;  %v2231_v36 = vpack.c.b16 %v2228_v33, %v2227_v62 }
 0x32b   : > { %3258 = vrcp.f32 %v1745_v52  ;;  %v1916_v0 = vsel %vm1915_vm11, %v3255_v56, %v1912_v55  ;;  %vm1854_vm12 = vweird.f32 %v3257_v40  ;;  %v2113_v29 = vpack.c.b16 %v2110_v9, %v2109_v57 }
 0x32c   : > { %v1850_v54 = vsub.f32 1.0, %v1849_v10  ;;  %3020 = vmatmul.msk.bf16.vlgmr.msrb.gmra.mxu1 %vm1613_vm6, %v2172_v49  ;;  %v1921_v3 = vsel %vm4269_vm14, %v1920_v24, %v1916_v0  ;;  %3022 = vmatmul.msk.bf16.vlgmr.msra.gmra.mxu2 %vm1613_vm6, %v2231_v36  ;;  %v1981_v28 = vsel %vm4259_vm7, %v1980_v17, %v1976_v1  ;;  %vm1853_vm13 = vweird.f32 %v4233_v7 }
 0x32d   : > { %v2008_v53 = vmul.f32 %v4052_v23, %v1921_v3  ;;  %3018 = vmatmul.msk.bf16.vlgmr.msra.gmra.mxu0 %vm1613_vm6, %v2113_v29  ;;  %v4300_v16 = vmul.f32 %v4047_v5, %v1981_v28  ;;  %vm1855_vm15 = vmor %vm1853_vm13, %vm1854_vm12  ;;  %v1860_v13 = vor.u32 1.1754944e-38, %v1859_v60  ;;  %vm1858_vm2 = vcmp.eq.f32.partialorder %v1857_v8, 8.507059e+37 }
 0x32e   : > { %v1851_v38 = vmul.f32 %v3257_v40, %v1850_v54  ;;  %v836_v34 = vpop.permute.xlu0 %835  ;;  %v1934_v5 = vand.u32 2147483648, %v1745_v52  ;;  %v1932_v17 = vand.u32 2147483647, %v1745_v52  ;;  %vm1928_vm4 = vweird.f32 %v1745_v52 }
 0x32f   : > { %856 = vst.msk [vmem:[#allocation4 + $0x18] sm:$0xff] %vm808_vm1, %v836_v34  ;;  %v2040_v22 = vpack.c.bf16 %v2008_v53, %v2008_v53  ;;  %v1246_v20 = vpack.c.bf16 %v1214_v21, %v1214_v21  ;;  %v1244_v47 = vpack.c.bf16 %v1212_v37, %v1212_v37 }
 0x330   : > { %v1852_v6 = vadd.f32 %v3257_v40, %v1851_v38  ;;  %2024 = vst.msk [vmem:[%s4064_s1 + $0x50] sm:$0xff] %vm1613_vm6, %v2008_v53  ;;  %v1935_v45 = vor.u32 1.1754944e-38, %v1934_v5  ;;  %vm1933_vm7 = vcmp.eq.f32.partialorder %v1932_v17, 8.507059e+37 }
 0x331   : > { %v3259_v2 = vpop.eup %3258  ;;  %2028 = vst.msk [vmem:[%s4064_s1 + $0x70] sm:$0xff] %vm1613_vm6, %v4300_v16  ;;  %v2170_v44 = vunpack.c.l.b16 %v2040_v22  ;;  %v2066_v10 = vunpack.c.l.b16 %v1244_v47 }
 0x332   : > { %v1924_v18 = vmul.f32 %v3259_v2, %v1745_v52  ;;  %v1856_v23 = vsel %vm1855_vm15, %v3257_v40, %v1852_v6  ;;  %vm1929_vm3 = vweird.f32 %v3259_v2 }
 0x333   : > { %v1861_v56 = vsel %vm1858_vm2, %v1860_v13, %v1856_v23  ;;  %vm1930_vm5 = vmor %vm1928_vm4, %vm1929_vm3 }
 0x334   : > { %v1925_v61 = vsub.f32 1.0, %v1924_v18  ;;  %v4308_v7 = vmul.f32 %v4059_v50, %v1861_v56 }
 0x336   : > { %v1926_v39 = vmul.f32 %v3259_v2, %v1925_v61  ;;  %2020 = vst.msk [vmem:[%s4064_s1 + $0x30] sm:$0xff] %vm1613_vm6, %v4308_v7  ;;  %v1213_v26 = vld [vmem:[#allocation4 + $0x18] sm:$0xff]  ;;  %v2036_v18 = vpack.c.bf16 %v4308_v7, %v4308_v7  ;;  %v2044_v61 = vpack.c.bf16 %v4300_v16, %v4300_v16 }
 0x337   : > { %v1245_v40 = vpack.c.bf16 %v1213_v26, %v1213_v26 }
 0x338   : > { %v1927_v63 = vadd.f32 %v3259_v2, %v1926_v39 }
 0x339   : > { %v2067_v24 = vunpack.c.l.b16 %v1245_v40 }
 0x33a   : > { %v1931_v41 = vsel %vm1930_vm5, %v3259_v2, %v1927_v63  ;;  %v2111_v63 = vunpack.c.l.b16 %v2036_v18  ;;  %v3088_v18 = vld [vmem:[%s4562_s7 + $0x8] sm:$0xff] }
 0x33b   : > { %v1936_v19 = vsel %vm1933_vm7, %v1935_v45, %v1931_v41  ;;  %v2073_v48 = vpack.c.b16 %v2067_v24, %v2066_v10 }
 0x33c   : > { %v2009_v43 = vmul.f32 %v4068_v58, %v1936_v19  ;;  %v2068_v58 = vunpack.c.l.b16 %v1246_v20 }
 0x33e   : > { %2025 = vst.msk [vmem:[%s4064_s1 + $0x58] sm:$0xff] %vm1613_vm6, %v2009_v43  ;;  %v2041_v50 = vpack.c.bf16 %v2009_v43, %v2009_v43 }
 0x340   : > { %v2171_v25 = vunpack.c.l.b16 %v2041_v50 }
 0x342   : > { %v840_v11 = vpop.permute.xlu1 %839  ;;  %v2173_v27 = vpack.c.b16 %v2171_v25, %v2170_v44 }
 0x343   : > { %858 = vst.msk [vmem:[#allocation4 + $0x28] sm:$0xff] %vm808_vm1, %v840_v11 }
 0x344   : > { %3021 = vmatmul.msk.bf16.gmra.mxu1 %vm1613_vm6, %v2173_v27 }
 0x34a   : > { %v1215_v35 = vld [vmem:[#allocation4 + $0x28] sm:$0xff] }
 0x34b   : > { %v1247_v12 = vpack.c.bf16 %v1215_v35, %v1215_v35 }
 0x34d   : > { %v2069_v46 = vunpack.c.l.b16 %v1247_v12 }
 0x34f   : > { %v2074_v33 = vpack.c.b16 %v2069_v46, %v2068_v58 }
 0x351   : > { %2091 = vmatpush.bf16.msrb.mxu3 %v2074_v33 }
 0x355   : > { %2092 = vmatpush.bf16.msrb.mxu3 %v2073_v48 }
 0x357   : > { %v1733_v51 = vpop.xlane.xlu2 %1732 }
 0x358   : > { %3260 = vrcp.f32 %v1733_v51  ;;  %v1874_v57 = vand.u32 2147483648, %v1733_v51  ;;  %v1872_v60 = vand.u32 2147483647, %v1733_v51  ;;  %vm1868_vm14 = vweird.f32 %v1733_v51 }
 0x359   : > { %v1757_v52 = vpop.xlane.xlu0 %1756 }
 0x35a   : > { %3262 = vrcp.f32 %v1757_v52  ;;  %v1994_v36 = vand.u32 2147483648, %v1757_v52  ;;  %v1992_v38 = vand.u32 2147483647, %v1757_v52  ;;  %v1875_v34 = vor.u32 1.1754944e-38, %v1874_v57 }
 0x35b   : > { %vm1988_vm11 = vweird.f32 %v1757_v52  ;;  %vm1873_vm12 = vcmp.eq.f32.partialorder %v1872_v60, 8.507059e+37 }
 0x35c   : > { %v1995_v28 = vor.u32 1.1754944e-38, %v1994_v36  ;;  %vm1993_vm15 = vcmp.eq.f32.partialorder %v1992_v38, 8.507059e+37 }
 0x35e   : > { %v3261_v30 = vpop.eup %3260 }
 0x35f   : > { %v1864_v55 = vmul.f32 %v3261_v30, %v1733_v51  ;;  %v830_v9 = vpop.permute.xlu2 %829  ;;  %vm1869_vm9 = vweird.f32 %v3261_v30 }
 0x360   : > { %v3263_v62 = vpop.eup %3262  ;;  %853 = vst.msk [vmem:[#allocation4] sm:$0xff] %vm808_vm1, %v830_v9  ;;  %vm1870_vm8 = vmor %vm1868_vm14, %vm1869_vm9 }
 0x361   : > { %v1984_v54 = vmul.f32 %v3263_v62, %v1757_v52  ;;  %v1865_v49 = vsub.f32 1.0, %v1864_v55  ;;  %vm1989_vm10 = vweird.f32 %v3263_v62 }
 0x362   : > { %vm1990_vm13 = vmor %vm1988_vm11, %vm1989_vm10  ;;  %vm2344_vm11 = vcmask 261312  }
 0x363   : > { %v1985_v1 = vsub.f32 1.0, %v1984_v54  ;;  %v1866_v8 = vmul.f32 %v3261_v30, %v1865_v49 }
 0x365   : > { %v1986_v0 = vmul.f32 %v3263_v62, %v1985_v1  ;;  %v1867_v29 = vadd.f32 %v3261_v30, %v1866_v8 }
 0x367   : > { %v1987_v3 = vadd.f32 %v3263_v62, %v1986_v0  ;;  %v1871_v53 = vsel %vm1870_vm8, %v3261_v30, %v1867_v29  ;;  %v1210_v19 = vld [vmem:[#allocation4] sm:$0xff]  ;;  %vm2323_vm8 = vcmask 195712  }
 0x368   : > { %v1876_v6 = vsel %vm1873_vm12, %v1875_v34, %v1871_v53 }
 0x369   : > { %v1991_v2 = vsel %vm1990_vm13, %v3263_v62, %v1987_v3  ;;  %v2005_v13 = vmul.f32 %v4089_v14, %v1876_v6  ;;  %v2229_v14 = vunpack.c.l.b16 %v2044_v61 }
 0x36a   : > { %v1996_v23 = vsel %vm1993_vm15, %v1995_v28, %v1991_v2 }
 0x36b   : > { %v2013_v56 = vmul.f32 %v4091_v15, %v1996_v23  ;;  %2021 = vst.msk [vmem:[%s4064_s1 + $0x38] sm:$0xff] %vm1613_vm6, %v2005_v13  ;;  %v2037_v5 = vpack.c.bf16 %v2005_v13, %v2005_v13  ;;  %v1242_v15 = vpack.c.bf16 %v1210_v19, %v1210_v19 }
 0x36c   : > { %v832_v39 = vpop.permute.xlu0 %831 }
 0x36d   : > { %854 = vst.msk [vmem:[#allocation4 + $0x8] sm:$0xff] %vm808_vm1, %v832_v39  ;;  %v2045_v17 = vpack.c.bf16 %v2013_v56, %v2013_v56  ;;  %v2112_v45 = vunpack.c.l.b16 %v2037_v5  ;;  %v2064_v50 = vunpack.c.l.b16 %v1242_v15 }
 0x36e   : > { %2029 = vst.msk [vmem:[%s4064_s1 + $0x78] sm:$0xff] %vm1613_vm6, %v2013_v56  ;;  %v3087_v56 = vld [vmem:[%s4562_s7] sm:$0xff] }
 0x36f   : > { %v2230_v41 = vunpack.c.l.b16 %v2045_v17  ;;  %v2114_v7 = vpack.c.b16 %v2112_v45, %v2111_v63 }
 0x371   : > { %v2232_v43 = vpack.c.b16 %v2230_v41, %v2229_v14  ;;  %3019 = vmatmul.msk.bf16.gmra.mxu0 %vm1613_vm6, %v2114_v7 }
 0x373   : > { %3023 = vmatmul.msk.bf16.gmra.mxu2 %vm1613_vm6, %v2232_v43 }
 0x374   : > { %v1211_v16 = vld [vmem:[#allocation4 + $0x8] sm:$0xff] }
 0x375   : > { %v1243_v22 = vpack.c.bf16 %v1211_v16, %v1211_v16 }
 0x377   : > { %v2065_v44 = vunpack.c.l.b16 %v1243_v22 }
 0x379   : > { %v2072_v25 = vpack.c.b16 %v2065_v44, %v2064_v50 }
 0x37b   : > { %2093 = vmatpush.bf16.msrb.mxu3 %v2072_v25 }
 0x37e   : > { %3016 = vmatmul.msk.bf16.vlgmr.msrb.gmra.mxu3 %vm1613_vm6, %v2054_v59 }
 0x37f   : > { %2387 = vmatpush.bf16.msra.mxu3 %v3088_v18 }
 0x383   : > { %2388 = vmatpush.bf16.msra.mxu3 %v3087_v56 }
 0x397   : > { %v1721_v11 = vpop.xlane.xlu0 %1720 }
 0x398   : > { %3264 = vrcp.f32 %v1721_v11  ;;  %v1718_v27 = vpop.xlane.xlu2 %1717  ;;  %v1814_v12 = vand.u32 2147483648, %v1721_v11  ;;  %v1812_v46 = vand.u32 2147483647, %v1721_v11  ;;  %vm1808_vm4 = vweird.f32 %v1721_v11 }
 0x399   : > { %3266 = vrcp.f32 %v1718_v27  ;;  %v1799_v47 = vand.u32 2147483648, %v1718_v27  ;;  %v1797_v4 = vand.u32 2147483647, %v1718_v27  ;;  %vm1793_vm7 = vweird.f32 %v1718_v27 }
 0x39a   : > { %v1815_v59 = vor.u32 1.1754944e-38, %v1814_v12  ;;  %vm1813_vm9 = vcmp.eq.f32.partialorder %v1812_v46, 8.507059e+37 }
 0x39b   : > { %v1800_v10 = vor.u32 1.1754944e-38, %v1799_v47  ;;  %vm1798_vm10 = vcmp.eq.f32.partialorder %v1797_v4, 8.507059e+37 }
 0x39e   : > { %v3265_v21 = vpop.eup %3264 }
 0x39f   : > { %v3267_v26 = vpop.eup %3266  ;;  %v1804_v20 = vmul.f32 %v3265_v21, %v1721_v11  ;;  %vm1809_vm2 = vweird.f32 %v3265_v21 }
 0x3a0   : > { %v1789_v35 = vmul.f32 %v3267_v26, %v1718_v27  ;;  %vm1794_vm3 = vweird.f32 %v3267_v26  ;;  %vm1810_vm5 = vmor %vm1808_vm4, %vm1809_vm2  ;;  %v3197_v27 = vld [vmem:[%s4563_s8] ss:$0 sm:$0xff] }
 0x3a1   : > { %v1805_v37 = vsub.f32 1.0, %v1804_v20  ;;  %vm1795_vm14 = vmor %vm1793_vm7, %vm1794_vm3  ;;  %v3286_v20 = vld [vmem:[%s3578_s5] sm:$0xff] }
 0x3a2   : > { %v1790_v40 = vsub.f32 1.0, %v1789_v35 }
 0x3a3   : > { %v1806_v58 = vmul.f32 %v3265_v21, %v1805_v37 }
 0x3a4   : > { %v1791_v33 = vmul.f32 %v3267_v26, %v1790_v40 }
 0x3a5   : > { %v1807_v32 = vadd.f32 %v3265_v21, %v1806_v58  ;;  %v3287_v58 = vld [vmem:[%s3578_s5 + $0x8] sm:$0xff] }
 0x3a6   : > { %v1792_v24 = vadd.f32 %v3267_v26, %v1791_v33 }
 0x3a7   : > { %v1811_v48 = vsel %vm1810_vm5, %v3265_v21, %v1807_v32  ;;  %v3288_v32 = vld [vmem:[%s3578_s5 + $0x10] sm:$0xff] }
 0x3a8   : > { %v1796_v51 = vsel %vm1795_vm14, %v3267_v26, %v1792_v24  ;;  %v1816_v52 = vsel %vm1813_vm9, %v1815_v59, %v1811_v48 }
 0x3a9   : > { %v1801_v30 = vsel %vm1798_vm10, %v1800_v10, %v1796_v51  ;;  %v2001_v55 = vmul.f32 %v4112_v42, %v1816_v52  ;;  %v2213_v62 = vpop.f32.mrf.mxu1  ;;  %v3289_v51 = vld [vmem:[%s3578_s5 + $0x18] sm:$0xff] }
 0x3aa   : > { %v2000_v9 = vmul.f32 %v4110_v31, %v1801_v30  ;;  %2311 = vrot.lane.b32.xlu1 %v2213_v62, %s3366_s18  ;;  %v2154_v60 = vpop.f32.mrf.mxu0 }
 0x3ab   : > { %2017 = vst.msk [vmem:[%s4064_s1 + $0x18] sm:$0xff] %vm1613_vm6, %v2001_v55  ;;  %v2033_v54 = vpack.c.bf16 %v2001_v55, %v2001_v55  ;;  %v3369_v55 = vmov 32.0  }
 0x3ac   : > { %2016 = vst.msk [vmem:[%s4064_s1 + $0x10] sm:$0xff] %vm1613_vm6, %v2000_v9  ;;  %v2032_v49 = vpack.c.bf16 %v2000_v9, %v2000_v9  ;;  %3268 = vrcp.f32 %v3369_v55  ;;  %v3097_v55 = vld [vmem:[%s4568_s13 + $0x30] sm:$0xff] }
 0x3ad   : > { %v2053_v1 = vunpack.c.l.b16 %v2033_v54 }
 0x3ae   : > { %v2052_v57 = vunpack.c.l.b16 %v2032_v49 }
 0x3af   : > { %v2272_v36 = vpop.f32.mrf.mxu2 }
 0x3b0   : > { %v2055_v8 = vpack.c.b16 %v2053_v1, %v2052_v57 }
 0x3b1   : > { %v2215_v42 = vpop.f32.mrf.mxu1 }
 0x3b2   : > { %3017 = vmatmul.msk.bf16.gmra.mxu3 %vm1613_vm6, %v2055_v8  ;;  %2290 = vrot.lane.b32.xlu1 %v2154_v60, %s3367_s24  ;;  %v2156_v0 = vpop.f32.mrf.mxu0  ;;  %vm2302_vm6 = vcmask 130112   ;;  %v3269_v9 = vpop.eup %3268 }
 0x3b3   : > { %v2419_v62 = vmul.f32 32.0, %v3269_v9 }
 0x3b5   : > { %v2420_v54 = vsub.f32 1.0, %v2419_v62 }
 0x3b7   : > { %v2274_v31 = vpop.f32.mrf.mxu2  ;;  %v2421_v49 = vmul.f32 %v3269_v9, %v2420_v54 }
 0x3b8   : > { %2334 = vrot.lane.b32.xlu2 %v2274_v31, %s3368_s30 }
 0x3b9   : > { %v2422_v57 = vadd.f32 %v3269_v9, %v2421_v49  ;;  %v3096_v49 = vld [vmem:[%s4568_s13 + $0x28] sm:$0xff] }
 0x3ba   : > { %2313 = vrot.lane.b32.xlu1 %v2215_v42, %s3366_s18 }
 0x3c1   : > { %v2218_v38 = vpop.f32.mrf.mxu1 }
 0x3c2   : > { %2332 = vrot.lane.b32.xlu1 %v2272_v36, %s3368_s30 }
 0x3c9   : > { %v2220_v53 = vpop.f32.mrf.mxu1 }
 0x3ca   : > { %2292 = vrot.lane.b32.xlu1 %v2156_v0, %s3367_s24 }
 0x3d2   : > { %2315 = vrot.lane.b32.xlu1 %v2218_v38, %s3366_s18 }
 0x3ee   : > { %v2159_v29 = vpop.f32.mrf.mxu0 }
 0x3ef   : > { %2294 = vrot.lane.b32.xlu0 %v2159_v29, %s3367_s24 }
 0x3f6   : > { %v2277_v34 = vpop.f32.mrf.mxu2  ;;  %v2161_v3 = vpop.f32.mrf.mxu0 }
 0x3f7   : > { %2336 = vrot.lane.b32.xlu2 %v2277_v34, %s3368_s30  ;;  %2296 = vrot.lane.b32.xlu1 %v2161_v3, %s3367_s24 }
 0x3fe   : > { %v2279_v28 = vpop.f32.mrf.mxu2 }
 0x3ff   : > { %2338 = vrot.lane.b32.xlu0 %v2279_v28, %s3368_s30  ;;  %2317 = vrot.lane.b32.xlu1 %v2220_v53, %s3366_s18  ;;  %s4491_s18 = scalar_lea.vmem %s4631_s2, %s2980_s17 }
 0x401   : > { %v2095_v6 = vpop.f32.mrf.mxu3 }
 0x402   : > { %2282 = vst.msk [vmem:[#allocation5] sm:$0xff] %vm808_vm1, %v2095_v6 }
 0x409   : > { %v2097_v2 = vpop.f32.mrf.mxu3 }
 0x40a   : > { %2283 = vst.msk [vmem:[#allocation5 + $0x8] sm:$0xff] %vm808_vm1, %v2097_v2 }
 0x412   : > { %v2335_v45 = vpop.permute.xlu2 %2334 }
 0x41c   : > { %v2312_v13 = vpop.permute.xlu1 %2311 }
 0x424   : > { %v2291_v23 = vpop.permute.xlu1 %2290 }
 0x425   : > { %2303 = vst.msk [vmem:[#allocation5] sm:$0xff] %vm2302_vm6, %v2291_v23 }
 0x426   : > { %2324 = vst.msk [vmem:[#allocation5] sm:$0xff] %vm2323_vm8, %v2312_v13 }
 0x42c   : > { %v2314_v61 = vpop.permute.xlu1 %2313 }
 0x434   : > { %v2333_v39 = vpop.permute.xlu1 %2332 }
 0x435   : > { %v2100_v5 = vpop.f32.mrf.mxu3  ;;  %2345 = vst.msk [vmem:[#allocation5] sm:$0xff] %vm2344_vm11, %v2333_v39 }
 0x436   : > { %2284 = vst.msk [vmem:[#allocation5 + $0x10] sm:$0xff] %vm808_vm1, %v2100_v5 }
 0x43c   : > { %v2293_v63 = vpop.permute.xlu1 %2292  ;;  %v2349_v14 = vld [vmem:[#allocation5] sm:$0xff] }
 0x43d   : > { %v2102_v17 = vpop.f32.mrf.mxu3  ;;  %2304 = vst.msk [vmem:[#allocation5 + $0x8] sm:$0xff] %vm2302_vm6, %v2293_v63 }
 0x43e   : > { %2285 = vst.msk [vmem:[#allocation5 + $0x18] sm:$0xff] %vm808_vm1, %v2102_v17  ;;  %vm2423_vm1 = vweird.f32 %v3269_v9 }
 0x43f   : > { %2325 = vst.msk [vmem:[#allocation5 + $0x8] sm:$0xff] %vm2323_vm8, %v2314_v61  ;;  %v4382_v1 = vsel %vm2423_vm1, %v3269_v9, %v2422_v57 }
 0x440   : > { %2346 = vst.msk [vmem:[#allocation5 + $0x8] sm:$0xff] %vm2344_vm11, %v2335_v45  ;;  %v3090_v45 = vld [vmem:[%s4566_s11 + $0x8] sm:$0xff] }
 0x441   : > { %2549 = vmatpush.bf16.msrb.mxu0 %v3090_v45 }
 0x444   : > { %v2316_v19 = vpop.permute.xlu1 %2315 }
 0x447   : > { %v2350_v41 = vld [vmem:[#allocation5 + $0x8] sm:$0xff] }
 0x448   : > { %v2353_v7 = vpack.c.bf16 %v2350_v41, %v2349_v14  ;;  %v3089_v14 = vld [vmem:[%s4566_s11] sm:$0xff] }
 0x449   : > { %2550 = vmatpush.bf16.msrb.mxu0 %v3089_v14  ;;  %v3200_v14 = vld [vmem:[%s4567_s12] ss:$0 sm:$0xff] }
 0x44a   : > { %3032 = vmatmul.msk.bf16.vlgmr.msra.gmra.mxu3 %vm721_vm0, %v2353_v7 }
 0x451   : > { %v2337_v15 = vpop.permute.xlu2 %2336 }
 0x461   : > { %v2295_v43 = vpop.permute.xlu0 %2294 }
 0x462   : > { %2305 = vst.msk [vmem:[#allocation5 + $0x10] sm:$0xff] %vm2302_vm6, %v2295_v43 }
 0x463   : > { %2326 = vst.msk [vmem:[#allocation5 + $0x10] sm:$0xff] %vm2323_vm8, %v2316_v19 }
 0x464   : > { %2347 = vst.msk [vmem:[#allocation5 + $0x10] sm:$0xff] %vm2344_vm11, %v2337_v15 }
 0x469   : > { %v2297_v16 = vpop.permute.xlu1 %2296 }
 0x46a   : > { %2306 = vst.msk [vmem:[#allocation5 + $0x18] sm:$0xff] %vm2302_vm6, %v2297_v16 }
 0x46b   : > { %v2351_v44 = vld [vmem:[#allocation5 + $0x10] sm:$0xff] }
 0x471   : > { %v2318_v22 = vpop.permute.xlu1 %2317  ;;  %v2339_v50 = vpop.permute.xlu0 %2338 }
 0x472   : > { %2327 = vst.msk [vmem:[#allocation5 + $0x18] sm:$0xff] %vm2323_vm8, %v2318_v22 }
 0x473   : > { %2348 = vst.msk [vmem:[#allocation5 + $0x18] sm:$0xff] %vm2344_vm11, %v2339_v50 }
 0x47a   : > { %v2352_v25 = vld [vmem:[#allocation5 + $0x18] sm:$0xff] }
 0x47b   : > { %v2354_v11 = vpack.c.bf16 %v2352_v25, %v2351_v44 }
 0x47d   : > { %3033 = vmatmul.msk.bf16.gmra.mxu3 %vm721_vm0, %v2354_v11 }
 0x4cd   : > { %v2390_v21 = vpop.f32.mrf.mxu3 }
 0x4ce   : > { %v2391_v26 = vadd.f32 %v3197_v27, %v2390_v21 }
 0x4d0   : > { %v2400_v35 = vadd.f32 %v3286_v20, %v2391_v26 }
 0x4d2   : > { %v2406_v37 = vsel %vm721_vm0, %v2400_v35, 0.0 }
 0x4d3   : > { %2407 = vadd.xlane.f32.xlu1 %v2406_v37 }
 0x4d5   : > { %v2392_v12 = vpop.f32.mrf.mxu3 }
 0x4d6   : > { %v2393_v40 = vadd.f32 %v3197_v27, %v2392_v12 }
 0x4d8   : > { %v2401_v46 = vadd.f32 %v3287_v58, %v2393_v40  ;;  %v3199_v58 = vld [vmem:[%s4565_s10] ss:$0 sm:$0xff] }
 0x4da   : > { %v2409_v47 = vsel %vm721_vm0, %v2401_v46, 0.0 }
 0x4db   : > { %2410 = vadd.xlane.f32.xlu2 %v2409_v47 }
 0x500   : > { %v2395_v33 = vpop.f32.mrf.mxu3 }
 0x501   : > { %v2396_v4 = vadd.f32 %v3197_v27, %v2395_v33 }
 0x503   : > { %v2402_v59 = vadd.f32 %v3288_v32, %v2396_v4 }
 0x505   : > { %v2412_v24 = vsel %vm721_vm0, %v2402_v59, 0.0 }
 0x506   : > { %2413 = vadd.xlane.f32.xlu0 %v2412_v24 }
 0x508   : > { %v2397_v10 = vpop.f32.mrf.mxu3 }
 0x509   : > { %v2398_v48 = vadd.f32 %v3197_v27, %v2397_v10 }
 0x50b   : > { %v2403_v52 = vadd.f32 %v3289_v51, %v2398_v48  ;;  %v3098_v51 = vld [vmem:[%s4568_s13 + $0x38] sm:$0xff] }
 0x50c   : > { %2636 = vmatpush.bf16.msra.mxu1 %v3098_v51 }
 0x50d   : > { %v2415_v30 = vsel %vm721_vm0, %v2403_v52, 0.0 }
 0x50e   : > { %2416 = vadd.xlane.f32.xlu2 %v2415_v30 }
 0x510   : > { %2637 = vmatpush.bf16.msra.mxu1 %v3097_v55 }
 0x514   : > { %2638 = vmatpush.bf16.msra.mxu1 %v3096_v49 }
 0x546   : > { %v2408_v8 = vpop.xlane.xlu1 %2407 }
 0x547   : > { %v2425_v60 = vmul.f32 %v4382_v1, %v2408_v8 }
 0x549   : > { %v2429_v36 = vsub.f32 %v2400_v35, %v2425_v60  ;;  %v3198_v35 = vld [vmem:[%s4564_s9] ss:$0 sm:$0xff] }
 0x54a   : > { %v3095_v60 = vld [vmem:[%s4568_s13 + $0x20] sm:$0xff] }
 0x54b   : > { %v2433_v31 = vmul.f32 %v2429_v36, %v2429_v36  ;;  %2639 = vmatpush.bf16.msra.mxu1 %v3095_v60 }
 0x54d   : > { %v2437_v42 = vsel %vm721_vm0, %v2433_v31, 0.0 }
 0x54e   : > { %v2411_v0 = vpop.xlane.xlu2 %2410  ;;  %2438 = vadd.xlane.f32.xlu1 %v2437_v42 }
 0x54f   : > { %v2426_v38 = vmul.f32 %v4382_v1, %v2411_v0 }
 0x551   : > { %v2430_v29 = vsub.f32 %v2401_v46, %v2426_v38 }
 0x553   : > { %v2434_v34 = vmul.f32 %v2430_v29, %v2430_v29 }
 0x555   : > { %v2440_v3 = vsel %vm721_vm0, %v2434_v34, 0.0 }
 0x556   : > { %2441 = vadd.xlane.f32.xlu0 %v2440_v3 }
 0x579   : > { %v2414_v53 = vpop.xlane.xlu0 %2413 }
 0x57a   : > { %v2427_v28 = vmul.f32 %v4382_v1, %v2414_v53 }
 0x57c   : > { %v4389_v6 = vsub.f32 %v2402_v59, %v2427_v28 }
 0x57e   : > { %v2435_v2 = vmul.f32 %v4389_v6, %v4389_v6 }
 0x580   : > { %v2443_v13 = vsel %vm721_vm0, %v2435_v2, 0.0 }
 0x581   : > { %v2417_v18 = vpop.xlane.xlu2 %2416  ;;  %2444 = vadd.xlane.f32.xlu2 %v2443_v13 }
 0x582   : > { %v2428_v23 = vmul.f32 %v4382_v1, %v2417_v18 }
 0x584   : > { %v4395_v56 = vsub.f32 %v2403_v52, %v2428_v23 }
 0x586   : > { %v2436_v61 = vmul.f32 %v4395_v56, %v4395_v56 }
 0x588   : > { %v2446_v5 = vsel %vm721_vm0, %v2436_v61, 0.0 }
 0x589   : > { %2447 = vadd.xlane.f32.xlu1 %v2446_v5 }
 0x5c1   : > { %v2439_v39 = vpop.xlane.xlu1 %2438 }
 0x5c2   : > { %v2449_v17 = vmul.f32 %v2439_v39, %v4382_v1 }
 0x5c4   : > { %v2453_v63 = vadd.f32 1e-05, %v2449_v17  ;;  %v3094_v17 = vld [vmem:[%s4568_s13 + $0x18] sm:$0xff] }
 0x5c5   : > { %2640 = vmatpush.bf16.msra.mxu1 %v3094_v17 }
 0x5c6   : > { %3270 = vrsqrt.f32 %v2453_v63  ;;  %vm2463_vm13 = vweird.f32 %v2453_v63 }
 0x5c9   : > { %v2442_v41 = vpop.xlane.xlu0 %2441 }
 0x5ca   : > { %v2450_v7 = vmul.f32 %v2442_v41, %v4382_v1 }
 0x5cc   : > { %v3271_v19 = vpop.eup %3270  ;;  %v2454_v43 = vadd.f32 1e-05, %v2450_v7 }
 0x5cd   : > { %v2458_v15 = vmul.f32 %v3271_v19, %v2453_v63  ;;  %vm2464_vm12 = vweird.f32 %v3271_v19  ;;  %v3091_v63 = vld [vmem:[%s4568_s13] sm:$0xff] }
 0x5ce   : > { %3272 = vrsqrt.f32 %v2454_v43  ;;  %vm2465_vm15 = vmor %vm2463_vm13, %vm2464_vm12  ;;  %vm2473_vm3 = vweird.f32 %v2454_v43 }
 0x5cf   : > { %v2459_v16 = vmul.f32 %v3271_v19, %v2458_v15 }
 0x5d1   : > { %v2460_v22 = vmul.f32 0.5, %v2459_v16 }
 0x5d3   : > { %v2461_v50 = vsub.f32 1.5, %v2460_v22 }
 0x5d4   : > { %v3273_v44 = vpop.eup %3272 }
 0x5d5   : > { %v2462_v25 = vmul.f32 %v3271_v19, %v2461_v50  ;;  %v2468_v11 = vmul.f32 %v3273_v44, %v2454_v43  ;;  %vm2474_vm2 = vweird.f32 %v3273_v44 }
 0x5d6   : > { %vm2475_vm4 = vmor %vm2473_vm3, %vm2474_vm2 }
 0x5d7   : > { %v2469_v27 = vmul.f32 %v3273_v44, %v2468_v11  ;;  %v2466_v21 = vsel %vm2465_vm15, %v3271_v19, %v2462_v25 }
 0x5d8   : > { %v2497_v37 = vmul.f32 %v2466_v21, %v2429_v36 }
 0x5d9   : > { %v2470_v26 = vmul.f32 0.5, %v2469_v27 }
 0x5da   : > { %v2504_v46 = vmul.f32 %v3198_v35, %v2497_v37 }
 0x5db   : > { %v2471_v20 = vsub.f32 1.5, %v2470_v26  ;;  %v3201_v26 = vld [vmem:[%s4569_s14] ss:$0 sm:$0xff] }
 0x5dc   : > { %v4414_v4 = vadd.f32 %v3199_v58, %v2504_v46 }
 0x5dd   : > { %v2472_v12 = vmul.f32 %v3273_v44, %v2471_v20 }
 0x5df   : > { %v2476_v40 = vsel %vm2475_vm4, %v3273_v44, %v2472_v12 }
 0x5e0   : > { %v2498_v47 = vmul.f32 %v2476_v40, %v2430_v29 }
 0x5e2   : > { %v2505_v33 = vmul.f32 %v3198_v35, %v2498_v47 }
 0x5e4   : > { %v4416_v32 = vadd.f32 %v3199_v58, %v2505_v33 }
 0x5e6   : > { %v2515_v59 = vpack.c.bf16 %v4416_v32, %v4414_v4 }
 0x5e8   : > { %3042 = vmatmul.msk.bf16.vlgmr.msrb.gmra.mxu0 %vm721_vm0, %v2515_v59 }
 0x5f4   : > { %v2445_v24 = vpop.xlane.xlu2 %2444 }
 0x5f5   : > { %v2451_v10 = vmul.f32 %v2445_v24, %v4382_v1 }
 0x5f7   : > { %v2455_v48 = vadd.f32 1e-05, %v2451_v10 }
 0x5f9   : > { %3274 = vrsqrt.f32 %v2455_v48  ;;  %vm2483_vm7 = vweird.f32 %v2455_v48 }
 0x5fc   : > { %v2448_v52 = vpop.xlane.xlu1 %2447 }
 0x5fd   : > { %v2452_v30 = vmul.f32 %v2448_v52, %v4382_v1 }
 0x5ff   : > { %v3275_v9 = vpop.eup %3274  ;;  %v2456_v62 = vadd.f32 1e-05, %v2452_v30 }
 0x600   : > { %v2478_v54 = vmul.f32 %v3275_v9, %v2455_v48  ;;  %vm2484_vm5 = vweird.f32 %v3275_v9 }
 0x601   : > { %3276 = vrsqrt.f32 %v2456_v62  ;;  %vm2485_vm9 = vmor %vm2483_vm7, %vm2484_vm5  ;;  %vm2493_vm10 = vweird.f32 %v2456_v62 }
 0x602   : > { %v2479_v57 = vmul.f32 %v3275_v9, %v2478_v54 }
 0x604   : > { %v2480_v8 = vmul.f32 0.5, %v2479_v57 }
 0x606   : > { %v2481_v36 = vsub.f32 1.5, %v2480_v8 }
 0x607   : > { %v3277_v31 = vpop.eup %3276 }
 0x608   : > { %v2482_v42 = vmul.f32 %v3275_v9, %v2481_v36  ;;  %v2488_v0 = vmul.f32 %v3277_v31, %v2456_v62  ;;  %vm2494_vm14 = vweird.f32 %v3277_v31 }
 0x609   : > { %vm2495_vm6 = vmor %vm2493_vm10, %vm2494_vm14 }
 0x60a   : > { %v2489_v38 = vmul.f32 %v3277_v31, %v2488_v0  ;;  %v2486_v29 = vsel %vm2485_vm9, %v3275_v9, %v2482_v42 }
 0x60b   : > { %v2499_v53 = vmul.f32 %v2486_v29, %v4389_v6  ;;  %v3093_v6 = vld [vmem:[%s4568_s13 + $0x10] sm:$0xff] }
 0x60c   : > { %v2490_v34 = vmul.f32 0.5, %v2489_v38  ;;  %2641 = vmatpush.bf16.msra.mxu1 %v3093_v6 }
 0x60d   : > { %v2506_v18 = vmul.f32 %v3198_v35, %v2499_v53 }
 0x60e   : > { %v2491_v3 = vsub.f32 1.5, %v2490_v34 }
 0x60f   : > { %v2513_v61 = vadd.f32 %v3199_v58, %v2506_v18 }
 0x610   : > { %v2492_v28 = vmul.f32 %v3277_v31, %v2491_v3 }
 0x612   : > { %v2496_v2 = vsel %vm2495_vm6, %v3277_v31, %v2492_v28 }
 0x613   : > { %v2500_v13 = vmul.f32 %v2496_v2, %v4395_v56  ;;  %v3092_v56 = vld [vmem:[%s4568_s13 + $0x8] sm:$0xff] }
 0x614   : > { %2642 = vmatpush.bf16.msra.mxu1 %v3092_v56 }
 0x615   : > { %v2507_v23 = vmul.f32 %v3198_v35, %v2500_v13 }
 0x617   : > { %v2514_v5 = vadd.f32 %v3199_v58, %v2507_v23 }
 0x618   : > { %2643 = vmatpush.bf16.msra.mxu1 %v3091_v63 }
 0x619   : > { %v2516_v39 = vpack.c.bf16 %v2514_v5, %v2513_v61 }
 0x61b   : > { %3043 = vmatmul.msk.bf16.gmra.mxu0 %vm721_vm0, %v2516_v39 }
 0x665   : > { %v2552_v45 = vpop.f32.mrf.mxu0 }
 0x666   : > { %v2553_v41 = vadd.f32 %v3200_v14, %v2552_v45 }
 0x668   : > { %v2562_v43 = vmax.f32 %v2553_v41, 0.0 }
 0x66d   : > { %v2554_v7 = vpop.f32.mrf.mxu0 }
 0x66e   : > { %v2555_v19 = vadd.f32 %v3200_v14, %v2554_v7  ;;  %v3202_v7 = vld [vmem:[%s4570_s15] ss:$0 sm:$0xff] }
 0x670   : > { %v2563_v15 = vmax.f32 %v2555_v19, 0.0 }
 0x672   : > { %v2566_v16 = vpack.c.bf16 %v2563_v15, %v2562_v43  ;;  %v3203_v15 = vld [vmem:[%s4571_s16] ss:$0 sm:$0xff] }
 0x674   : > { %2644 = vmatmul.bf16.vlgmr.msra.gmra.mxu1 %v2566_v16 }
 0x698   : > { %v2557_v22 = vpop.f32.mrf.mxu0 }
 0x699   : > { %v2558_v50 = vadd.f32 %v3200_v14, %v2557_v22 }
 0x69b   : > { %v2564_v11 = vmax.f32 %v2558_v50, 0.0 }
 0x6a0   : > { %v2559_v44 = vpop.f32.mrf.mxu0 }
 0x6a1   : > { %v2560_v25 = vadd.f32 %v3200_v14, %v2559_v44 }
 0x6a3   : > { %v2565_v27 = vmax.f32 %v2560_v25, 0.0 }
 0x6a5   : > { %v2567_v21 = vpack.c.bf16 %v2565_v27, %v2564_v11 }
 0x6a7   : > { %2649 = vmatmul.bf16.gmra.mxu1 %v2567_v21 }
 0x6f1   : > { %v2645_v20 = vpop.f32.mrf.mxu1 }
 0x6f2   : > { %v2646_v35 = vadd.f32 %v3201_v26, %v2645_v20 }
 0x6f4   : > { %v2655_v37 = vadd.f32 %v2646_v35, %v4414_v4 }
 0x6f6   : > { %v2661_v12 = vsel %vm721_vm0, %v2655_v37, 0.0 }
 0x6f7   : > { %2662 = vadd.xlane.f32.xlu0 %v2661_v12 }
 0x6f9   : > { %v2647_v40 = vpop.f32.mrf.mxu1 }
 0x6fa   : > { %v2648_v58 = vadd.f32 %v3201_v26, %v2647_v40 }
 0x6fc   : > { %v2656_v46 = vadd.f32 %v2648_v58, %v4416_v32 }
 0x6fe   : > { %v2664_v47 = vsel %vm721_vm0, %v2656_v46, 0.0 }
 0x6ff   : > { %2665 = vadd.xlane.f32.xlu2 %v2664_v47 }
 0x724   : > { %v2650_v33 = vpop.f32.mrf.mxu1 }
 0x725   : > { %v2651_v59 = vadd.f32 %v3201_v26, %v2650_v33 }
 0x727   : > { %v2657_v24 = vadd.f32 %v2651_v59, %v2513_v61 }
 0x729   : > { %v2667_v10 = vsel %vm721_vm0, %v2657_v24, 0.0 }
 0x72a   : > { %2668 = vadd.xlane.f32.xlu1 %v2667_v10 }
 0x72c   : > { %v2652_v48 = vpop.f32.mrf.mxu1 }
 0x72d   : > { %v2653_v51 = vadd.f32 %v3201_v26, %v2652_v48 }
 0x72f   : > { %v2658_v52 = vadd.f32 %v2653_v51, %v2514_v5 }
 0x731   : > { %v2670_v4 = vsel %vm721_vm0, %v2658_v52, 0.0 }
 0x732   : > { %2671 = vadd.xlane.f32.xlu0 %v2670_v4 }
 0x76a   : > { %v2663_v30 = vpop.xlane.xlu0 %2662 }
 0x76b   : > { %v2673_v55 = vmul.f32 %v2663_v30, %v4382_v1 }
 0x76d   : > { %v2677_v9 = vsub.f32 %v2655_v37, %v2673_v55 }
 0x76f   : > { %v2681_v32 = vmul.f32 %v2677_v9, %v2677_v9 }
 0x771   : > { %v2685_v62 = vsel %vm721_vm0, %v2681_v32, 0.0 }
 0x772   : > { %v2666_v54 = vpop.xlane.xlu2 %2665  ;;  %2686 = vadd.xlane.f32.xlu2 %v2685_v62 }
 0x773   : > { %v2674_v49 = vmul.f32 %v2666_v54, %v4382_v1 }
 0x775   : > { %v2678_v57 = vsub.f32 %v2656_v46, %v2674_v49 }
 0x777   : > { %v2682_v8 = vmul.f32 %v2678_v57, %v2678_v57 }
 0x779   : > { %v2688_v60 = vsel %vm721_vm0, %v2682_v8, 0.0 }
 0x77a   : > { %2689 = vadd.xlane.f32.xlu1 %v2688_v60 }
 0x79d   : > { %v2669_v36 = vpop.xlane.xlu1 %2668 }
 0x79e   : > { %v2675_v31 = vmul.f32 %v2669_v36, %v4382_v1 }
 0x7a0   : > { %v4467_v42 = vsub.f32 %v2657_v24, %v2675_v31 }
 0x7a2   : > { %v2683_v0 = vmul.f32 %v4467_v42, %v4467_v42 }
 0x7a4   : > { %v2691_v38 = vsel %vm721_vm0, %v2683_v0, 0.0 }
 0x7a5   : > { %2692 = vadd.xlane.f32.xlu0 %v2691_v38  ;;  %v2672_v29 = vpop.xlane.xlu0 %2671 }
 0x7a6   : > { %v2676_v34 = vmul.f32 %v2672_v29, %v4382_v1 }
 0x7a8   : > { %v4473_v3 = vsub.f32 %v2658_v52, %v2676_v34 }
 0x7aa   : > { %v2684_v53 = vmul.f32 %v4473_v3, %v4473_v3 }
 0x7ac   : > { %v2694_v28 = vsel %vm721_vm0, %v2684_v53, 0.0 }
 0x7ad   : > { %2695 = vadd.xlane.f32.xlu2 %v2694_v28 }
 0x7e5   : > { %v2687_v2 = vpop.xlane.xlu2 %2686 }
 0x7e6   : > { %v2697_v13 = vmul.f32 %v2687_v2, %v4382_v1 }
 0x7e8   : > { %v2701_v18 = vadd.f32 1e-05, %v2697_v13 }
 0x7ea   : > { %3278 = vrsqrt.f32 %v2701_v18  ;;  %vm2711_vm11 = vweird.f32 %v2701_v18 }
 0x7ed   : > { %v2690_v23 = vpop.xlane.xlu1 %2689 }
 0x7ee   : > { %v2698_v61 = vmul.f32 %v2690_v23, %v4382_v1 }
 0x7f0   : > { %v3279_v5 = vpop.eup %3278  ;;  %v2702_v39 = vadd.f32 1e-05, %v2698_v61 }
 0x7f1   : > { %v2706_v17 = vmul.f32 %v3279_v5, %v2701_v18  ;;  %vm2712_vm8 = vweird.f32 %v3279_v5 }
 0x7f2   : > { %3280 = vrsqrt.f32 %v2702_v39  ;;  %vm2713_vm1 = vmor %vm2711_vm11, %vm2712_vm8  ;;  %vm2721_vm13 = vweird.f32 %v2702_v39 }
 0x7f3   : > { %v2707_v6 = vmul.f32 %v3279_v5, %v2706_v17 }
 0x7f5   : > { %v2708_v56 = vmul.f32 0.5, %v2707_v6 }
 0x7f7   : > { %v2709_v63 = vsub.f32 1.5, %v2708_v56 }
 0x7f8   : > { %v3281_v45 = vpop.eup %3280 }
 0x7f9   : > { %v2710_v14 = vmul.f32 %v3279_v5, %v2709_v63  ;;  %v2716_v41 = vmul.f32 %v3281_v45, %v2702_v39  ;;  %vm2722_vm12 = vweird.f32 %v3281_v45 }
 0x7fa   : > { %vm2723_vm15 = vmor %vm2721_vm13, %vm2722_vm12 }
 0x7fb   : > { %v2714_v19 = vsel %vm2713_vm1, %v3279_v5, %v2710_v14  ;;  %v2717_v43 = vmul.f32 %v3281_v45, %v2716_v41 }
 0x7fc   : > { %v2745_v16 = vmul.f32 %v2714_v19, %v2677_v9 }
 0x7fd   : > { %v2718_v22 = vmul.f32 0.5, %v2717_v43 }
 0x7fe   : > { %v2752_v50 = vmul.f32 %v3202_v7, %v2745_v16 }
 0x7ff   : > { %v2719_v44 = vsub.f32 1.5, %v2718_v22 }
 0x800   : > { %v2759_v25 = vadd.f32 %v3203_v15, %v2752_v50 }
 0x801   : > { %v2720_v11 = vmul.f32 %v3281_v45, %v2719_v44 }
 0x802   : > { %2763 = vst.msk [vmem:[%s4491_s18] sm:$0xff] %vm721_vm0, %v2759_v25 }
 0x803   : > { %v2724_v27 = vsel %vm2723_vm15, %v3281_v45, %v2720_v11 }
 0x804   : > { %v2746_v21 = vmul.f32 %v2724_v27, %v2678_v57 }
 0x806   : > { %v2753_v26 = vmul.f32 %v3202_v7, %v2746_v21 }
 0x808   : > { %v2760_v20 = vadd.f32 %v3203_v15, %v2753_v26 }
 0x80a   : > { %2764 = vst.msk [vmem:[%s4491_s18 + $0x8] sm:$0xff] %vm721_vm0, %v2760_v20 }
 0x818   : > { %v2693_v35 = vpop.xlane.xlu0 %2692 }
 0x819   : > { %v2699_v37 = vmul.f32 %v2693_v35, %v4382_v1 }
 0x81b   : > { %v2703_v12 = vadd.f32 1e-05, %v2699_v37 }
 0x81d   : > { %3282 = vrsqrt.f32 %v2703_v12  ;;  %vm2731_vm3 = vweird.f32 %v2703_v12 }
 0x820   : > { %v2696_v40 = vpop.xlane.xlu2 %2695 }
 0x821   : > { %v2700_v58 = vmul.f32 %v2696_v40, %v4382_v1 }
 0x823   : > { %v3283_v46 = vpop.eup %3282  ;;  %v2704_v47 = vadd.f32 1e-05, %v2700_v58 }
 0x824   : > { %v2726_v33 = vmul.f32 %v3283_v46, %v2703_v12  ;;  %vm2732_vm2 = vweird.f32 %v3283_v46 }
 0x825   : > { %3284 = vrsqrt.f32 %v2704_v47  ;;  %vm2733_vm4 = vmor %vm2731_vm3, %vm2732_vm2  ;;  %vm2741_vm7 = vweird.f32 %v2704_v47 }
 0x826   : > { %v2727_v59 = vmul.f32 %v3283_v46, %v2726_v33 }
 0x828   : > { %v2728_v24 = vmul.f32 0.5, %v2727_v59 }
 0x82a   : > { %v2729_v10 = vsub.f32 1.5, %v2728_v24 }
 0x82b   : > { %v3285_v48 = vpop.eup %3284 }
 0x82c   : > { %v2730_v51 = vmul.f32 %v3283_v46, %v2729_v10  ;;  %v2736_v52 = vmul.f32 %v3285_v48, %v2704_v47  ;;  %vm2742_vm5 = vweird.f32 %v3285_v48 }
 0x82d   : > { %vm2743_vm9 = vmor %vm2741_vm7, %vm2742_vm5 }
 0x82e   : > { %v2734_v4 = vsel %vm2733_vm4, %v3283_v46, %v2730_v51  ;;  %v2737_v30 = vmul.f32 %v3285_v48, %v2736_v52 }
 0x82f   : > { %v2747_v1 = vmul.f32 %v2734_v4, %v4467_v42 }
 0x830   : > { %v2738_v55 = vmul.f32 0.5, %v2737_v30 }
 0x831   : > { %v2754_v9 = vmul.f32 %v3202_v7, %v2747_v1 }
 0x832   : > { %v2739_v32 = vsub.f32 1.5, %v2738_v55 }
 0x833   : > { %v2761_v62 = vadd.f32 %v3203_v15, %v2754_v9 }
 0x834   : > { %v2740_v54 = vmul.f32 %v3285_v48, %v2739_v32 }
 0x835   : > { %2765 = vst.msk [vmem:[%s4491_s18 + $0x10] sm:$0xff] %vm721_vm0, %v2761_v62 }
 0x836   : > { %v2744_v49 = vsel %vm2743_vm9, %v3285_v48, %v2740_v54 }
 0x837   : > { %v2748_v57 = vmul.f32 %v2744_v49, %v4473_v3 }
 0x839   : > { %v2755_v8 = vmul.f32 %v3202_v7, %v2748_v57 }
 0x83b   : > { %v2762_v60 = vadd.f32 %v3203_v15, %v2755_v8 }
 0x83d   : > { %2766 = vst.msk [vmem:[%s4491_s18 + $0x18] sm:$0xff] %vm721_vm0, %v2762_v60 }
 0x83e   : > { %s3078_s17 = sshll.u32 %s3344_s0, 5  ;;  %s2805_s5 = sshll.u32 %s4064_s1, 4  ;;  %s2806_s5 = int_to_ptr.vmem [resolvable:$true] %s2805_s5 }
 0x83f   : > { %s2792_s24 = sadd.s32 %s3078_s17, %s3562_s27  ;;  %s4632_s19 = sld [smem:[#allocation24_spill]] }
 0x840   : > { %s3079_s30 = sshll.u32 %s2792_s24, 3  ;;  %s3370_s29 = smov 512  }
 0x841   : > { %3099 = sst [smem:[#allocation9]] (%p3523_p3), %s3370_s29  ;;  %s3371_s18 = smov 1024  }
 0x842   : > { %3100 = sst [smem:[#allocation9 + $0x1]] (%p3523_p3), %s3371_s18  ;;  %s3372_s0 = smov 4  }
 0x843   : > { %3101 = sst [smem:[#allocation9 + $0x2]] (%p3523_p3), %s3372_s0  ;;  %s3373_s27 = smov 128  }
 0x844   : > { %3102 = sst [smem:[#allocation9 + $0x3]] (%p3523_p3), %s3373_s27  ;;  %s3374_s1 = smov 8  }
 0x845   : > { %s2794_s26 = scalar_lea.hbm %s4632_s19, %s3079_s30  ;;  %3103 = sst [smem:[#allocation9 + $0x4]] (%p3523_p3), %s3373_s27 }
 0x846   : > { %s2807_s2 = sshll.u32 %s2794_s26, 4  ;;  %3104 = sst [smem:[#allocation9 + $0x5]] (%p3523_p3), %s3374_s1  ;;  %s2808_s2 = int_to_ptr.hbm [resolvable:$true] %s2807_s2 }
 0x847   : > { %s3375_s17 = smov [#allocation8]   ;;  %s3376_s24 = smov 0  }
 0x848   : > { %3105 = dma.general (%p3523_p3), %s2806_s5, 2048, %s2808_s2, %s2777_s22, %s3375_s17, [#allocation9], %s3376_s24, 0  }
 0x849 PF: > { %s4633_s30 = sld [smem:[#allocation11_spill]]  ;;  %p3111_p1 = scmp.ge.s32.totalorder %s3356_s20, 2 }
 0x84b   : > { %p3108_p2 = pnand %p3111_p1, %p3532_p8 }
 0x84d   : > { %p3109_p4 = pneg %p3108_p2 }
 0x84f   : > { %s2847_s21 = sand.u32 1, %s4633_s30  }
 0x850   : > { %s2848_s19 = scalar_lea.sflag [#allocation7], %s2847_s21 }
 0x851   : > { %3323 = dma.done.wait (%p3109_p4), %s2848_s19, 2048  }
 0x852   : > { %3325 = vsyncadd (%p3109_p4), %s2848_s19, 4294965248  ;;  %s32_s20 = sadd.s32 1, %s3356_s20   ;;  %s4635_s26 = sld [smem:[#allocation12_spill]] }
 0x853   : > { %p29_p5 = scmp.ge.s32.totalorder %s32_s20, 6   ;;  %s4636_s29 = sld [smem:[#allocation18_spill]] }
 0x854   : > { %s4637_s30 = sld [smem:[#allocation13_spill]]  ;;  %s4641_s27 = smov %s3332_s28 }
 0x855   : > { %s4638_s0 = sld [smem:[#allocation14_spill]]  ;;  %31 = sbr.rel (!%p29_p5) target bundleno = 12 (0xc), region = 155 }
 0x856   : > { %s4639_s19 = sld [smem:[#allocation15_spill]] }
 0x857   : > { %s4640_s1 = sld [smem:[#allocation16_spill]] }
 0x858   : > { %s4642_s28 = smov %s4635_s26 }
 0x85a   :  { %2854 = vsyncpa [#allocation7], 1 }
 0x85b   :  { %2856 = vsyncpa [#allocation7 + $0x1], 1 }

</bundles_post_ra>
